<compile_context>
chip_gen: v6e
topology: v6e:2x2x1
jax: 0.10.0
libtpu: 0.0.40
codegen_flags: <defaults>
</compile_context>

<pallas_src>
import functools

import numpy as np
import jax
import jax.numpy as jnp
from jax.experimental import pallas as pl
from jax.experimental.pallas import tpu as pltpu

N_QUBITS = 4
N_ACTIONS = 2
DIM = 1 << N_QUBITS  # 16


def _atan(x):
    # Cephes-style float32 atan built only from ops with guaranteed Mosaic lowerings.
    sgn = jnp.where(x < 0.0, -1.0, 1.0)
    ax = jnp.abs(x)
    big = ax > 2.414213562373095                                   # tan(3*pi/8)
    mid = jnp.logical_and(ax > 0.4142135623730951, jnp.logical_not(big))  # tan(pi/8)
    xr = jnp.where(big, -1.0 / jnp.maximum(ax, 1e-30),
                   jnp.where(mid, (ax - 1.0) / (ax + 1.0), ax))
    yoff = jnp.where(big, float(np.pi / 2),
                     jnp.where(mid, float(np.pi / 4), 0.0))
    z = xr * xr
    poly = (((8.05374449538e-2 * z - 1.38776856032e-1) * z
             + 1.99777106478e-1) * z - 3.33329491539e-1) * z * xr + xr
    return sgn * (yoff + poly)


def _qnet_kernel(n_layers, data_reupload,
                 x_ref, w_in_ref, w_out_ref, y_ref, zt_ref, out_ref):
    bt = x_ref.shape[1]

    # ---- input scaling + atan: per-batch encoding angles, batch on lanes ----
    theta = _atan(x_ref[...] * w_in_ref[...])                      # (4, bt)
    c_enc = jnp.cos(0.5 * theta)
    s_enc = jnp.sin(0.5 * theta)

    # ---- shared RY weights: cos/sin for all layers at once ----
    cy = jnp.cos(0.5 * y_ref[...])                                 # (L, 4)
    sy = jnp.sin(0.5 * y_ref[...])

    # ---- constant tables from iota bit math (no HBM inputs needed) ----
    sub = jax.lax.broadcasted_iota(jnp.int32, (DIM, 1), 0)         # (16, 1) amplitude index
    bit_f = [((sub >> (N_QUBITS - 1 - w)) & 1).astype(jnp.float32)
             for w in range(N_QUBITS)]                             # 0/1 if bit of wire w set
    sign = [2.0 * b - 1.0 for b in bit_f]                          # +1 if bit set else -1
    czd = jnp.ones((DIM, 1), jnp.float32)                          # CZ-ring diagonal (+-1)
    for w in range(N_QUBITS):
        czd = czd * (1.0 - 2.0 * bit_f[w] * bit_f[(w + 1) % N_QUBITS])

    # ---- fold the 4 RZ gates of each layer + the CZ ring into one diagonal per layer ----
    p_all = jnp.zeros((DIM, n_layers), jnp.float32)
    for w in range(N_QUBITS):
        p_all = p_all + sign[w] * zt_ref[w:w + 1, :]               # (16,1)*(1,L) -> (16,L)
    p_all = 0.5 * p_all
    dcos = jnp.cos(p_all) * czd                                    # (16, L), czd folded in
    dsin = jnp.sin(p_all) * czd

    # ---- initial state |0000>: (16, bt) real / imag ----
    sub_full = jax.lax.broadcasted_iota(jnp.int32, (DIM, bt), 0)
    r = (sub_full == 0).astype(jnp.float32)
    im = jnp.zeros((DIM, bt), jnp.float32)

    def flip(v, w):
        # v[i] -> v[i ^ m]: blend of two sublane rotations (slice/concat + VPU select).
        m = 1 << (N_QUBITS - 1 - w)
        down = jnp.concatenate([v[m:, :], v[:m, :]], axis=0)            # v[(i+m) % 16]
        if m == DIM // 2:
            return down                                                 # XOR 8 == rotate 8
        up = jnp.concatenate([v[DIM - m:, :], v[:DIM - m, :]], axis=0)  # v[(i-m) % 16]
        return down + bit_f[w] * (up - down)

    for l in range(n_layers):
        if l == 0 or data_reupload:
            # RX(inputs[w]) on wire w, per-batch angle
            for w in range(N_QUBITS):
                c = c_enc[w:w + 1, :]                              # (1, bt)
                s = s_enc[w:w + 1, :]
                rf, imf = flip(r, w), flip(im, w)
                r, im = c * r + s * imf, c * im - s * rf
        # RY(y[l, w]) on each wire (shared angle)
        for w in range(N_QUBITS):
            c = cy[l:l + 1, w:w + 1]                               # (1, 1)
            ssg = sy[l:l + 1, w:w + 1] * sign[w]                   # (16, 1)
            rf, imf = flip(r, w), flip(im, w)
            r, im = c * r + ssg * rf, c * im + ssg * imf
        # combined RZ-layer + CZ-ring diagonal (single complex multiply)
        cp = dcos[:, l:l + 1]
        sp = dsin[:, l:l + 1]
        r, im = cp * r - sp * im, sp * r + cp * im

    # ---- measurement <Z0 Z1>, <Z2 Z3> + output scaling, one lane-dense store ----
    prob = r * r + im * im                                         # (16, bt)
    e0 = jnp.sum(prob * (sign[0] * sign[1]), axis=0, keepdims=True)  # (1, bt)
    e1 = jnp.sum(prob * (sign[2] * sign[3]), axis=0, keepdims=True)
    o0 = (1.0 + e0) * 0.5 * w_out_ref[0:1, :]
    o1 = (1.0 + e1) * 0.5 * w_out_ref[1:2, :]
    out_ref[...] = jnp.concatenate([o0, o1], axis=0)               # (2, bt), single store


def _round_up(n, m):
    return ((n + m - 1) // m) * m


def quantum_net_forward(x, w_input, w_output, y_weights, z_weights,
                        *, n_layers, data_reupload, block_b=512):
    x = jnp.asarray(x, jnp.float32)
    B = x.shape[0]
    bt = min(block_b, _round_up(B, 128))       # lane-width per block (<= 512 -> no spills)
    bp = _round_up(B, bt)

    x_t = jnp.pad(x.T, ((0, 0), (0, bp - B)))                       # (4, bp), batch on lanes
    w_in = jnp.asarray(w_input, jnp.float32).reshape(N_QUBITS, 1)
    w_out = jnp.asarray(w_output, jnp.float32).reshape(N_ACTIONS, 1)
    y = jnp.asarray(y_weights, jnp.float32).reshape(n_layers, N_QUBITS)
    zt = jnp.asarray(z_weights, jnp.float32).reshape(n_layers, N_QUBITS).T  # (4, L)

    kernel = functools.partial(_qnet_kernel, n_layers, data_reupload)
    out = pl.pallas_call(
        kernel,
        out_shape=jax.ShapeDtypeStruct((N_ACTIONS, bp), jnp.float32),
        grid_spec=pltpu.PrefetchScalarGridSpec(
            num_scalar_prefetch=0,
            grid=(bp // bt,),
            in_specs=[
                pl.BlockSpec((N_QUBITS, bt), lambda i: (0, i)),
                pl.BlockSpec((N_QUBITS, 1), lambda i: (0, 0)),
                pl.BlockSpec((N_ACTIONS, 1), lambda i: (0, 0)),
                pl.BlockSpec((n_layers, N_QUBITS), lambda i: (0, 0)),
                pl.BlockSpec((N_QUBITS, n_layers), lambda i: (0, 0)),
            ],
            out_specs=pl.BlockSpec((N_ACTIONS, bt), lambda i: (0, i)),
        ),
        compiler_params=pltpu.CompilerParams(
            dimension_semantics=("parallel",)),
    )(x_t, w_in, w_out, y, zt)
    return out[:, :B].T                                             # (B, 2)


def _reference(x, w_input, w_output, y, z, n_layers, data_reupload):
    # Independent complex128 statevector simulation for a correctness check.
    x = np.arctan(np.asarray(x, np.float64) * np.asarray(w_input, np.float64))
    y = np.asarray(y, np.float64)
    z = np.asarray(z, np.float64)
    w_output = np.asarray(w_output, np.float64)
    B = x.shape[0]
    I2 = np.eye(2, dtype=complex)

    def kron_on(wire, g):
        ops = [I2] * N_QUBITS
        ops[wire] = g
        out = ops[0]
        for o in ops[1:]:
            out = np.kron(out, o)
        return out

    def RX(t):
        c, s = np.cos(t / 2), np.sin(t / 2)
        return np.array([[c, -1j * s], [-1j * s, c]])

    def RY(t):
        c, s = np.cos(t / 2), np.sin(t / 2)
        return np.array([[c, -s], [s, c]], dtype=complex)

    def RZ(t):
        return np.array([[np.exp(-1j * t / 2), 0], [0, np.exp(1j * t / 2)]])

    def CZ(a, b):
        d = np.ones(DIM, complex)
        for i in range(DIM):
            if ((i >> (3 - a)) & 1) and ((i >> (3 - b)) & 1):
                d[i] = -1
        return np.diag(d)

    def zdiag(w):
        return np.array([1.0 if ((i >> (3 - w)) & 1) == 0 else -1.0 for i in range(DIM)])

    outs = np.zeros((B, N_ACTIONS))
    for b in range(B):
        psi = np.zeros(DIM, complex)
        psi[0] = 1.0
        for l in range(n_layers):
            if l == 0 or data_reupload:
                for w in range(N_QUBITS):
                    psi = kron_on(w, RX(x[b, w])) @ psi
            for w in range(N_QUBITS):
                psi = kron_on(w, RY(y[l, w])) @ psi
            for w in range(N_QUBITS):
                psi = kron_on(w, RZ(z[l, w])) @ psi
            for w in range(N_QUBITS):
                psi = CZ(w, (w + 1) % N_QUBITS) @ psi
        prob = np.abs(psi) ** 2
        e0 = np.sum(prob * zdiag(0) * zdiag(1))
        e1 = np.sum(prob * zdiag(2) * zdiag(3))
        outs[b, 0] = (1 + e0) / 2 * w_output[0]
        outs[b, 1] = (1 + e1) / 2 * w_output[1]
    return outs


if __name__ == "__main__":
    n_layers = 3
    data_reupload = True
    B = 2

    key = jax.random.PRNGKey(0)
    k1, k2, k3, k4, k5 = jax.random.split(key, 5)
    # Deterministic synthetic parameter init (mirrors module shapes / init distributions).
    w_input = jax.random.normal(k1, (N_QUBITS,), jnp.float32)               # nn.init.normal_
    w_output = 90.0 + jax.random.normal(k2, (N_ACTIONS,), jnp.float32)      # normal_(mean=90)
    y_weights = jax.random.uniform(k3, (n_layers, N_QUBITS), jnp.float32, 0.0, 2 * np.pi)
    z_weights = jax.random.uniform(k4, (n_layers, N_QUBITS), jnp.float32, 0.0, 2 * np.pi)
    x = jax.random.normal(k5, (B, N_QUBITS), jnp.float32)

    out = quantum_net_forward(x, w_input, w_output, y_weights, z_weights,
                              n_layers=n_layers, data_reupload=data_reupload)
    out = jax.block_until_ready(out)
    assert out.shape == (B, N_ACTIONS)

    ref = _reference(np.asarray(x), np.asarray(w_input), np.asarray(w_output),
                     np.asarray(y_weights), np.asarray(z_weights),
                     n_layers, data_reupload)
    np.testing.assert_allclose(np.asarray(out), ref, rtol=2e-3, atol=2e-3)

    print("KERNEL_OK")
</pallas_src>

<mosaic_0001>
module attributes {stable_mosaic.version = 11 : i64} {
  func.func @_qnet_kernel(%arg0: i32, %arg1: memref<4x128xf32, #tpu.memory_space<vmem>>, %arg2: memref<4x1xf32, #tpu.memory_space<vmem>>, %arg3: memref<2x1xf32, #tpu.memory_space<vmem>>, %arg4: memref<3x4xf32, #tpu.memory_space<vmem>>, %arg5: memref<4x3xf32, #tpu.memory_space<vmem>>, %arg6: memref<2x128xf32, #tpu.memory_space<vmem>>) attributes {dimension_semantics = [#tpu.dimension_semantics<parallel>], iteration_bounds = array<i64: 1>, scalar_prefetch = 0 : i64, scratch_operands = 0 : i64, tpu.core_type = #tpu.core_type<tc>, window_params = [{transform_indices = @transform_0, window_bounds = array<i64: 4, 128>}, {pipeline_mode = #tpu.pipeline_mode<synchronous>, transform_indices = @transform_1, window_bounds = array<i64: 4, 1>}, {pipeline_mode = #tpu.pipeline_mode<synchronous>, transform_indices = @transform_2, window_bounds = array<i64: 2, 1>}, {pipeline_mode = #tpu.pipeline_mode<synchronous>, transform_indices = @transform_3, window_bounds = array<i64: 3, 4>}, {pipeline_mode = #tpu.pipeline_mode<synchronous>, transform_indices = @transform_4, window_bounds = array<i64: 4, 3>}, {transform_indices = @transform_5, window_bounds = array<i64: 2, 128>}]} {
    %c0 = arith.constant 0 : index
    %c0_0 = arith.constant 0 : index
    %0 = vector.load %arg1[%c0, %c0_0] : memref<4x128xf32, #tpu.memory_space<vmem>>, vector<4x128xf32>
    %c0_1 = arith.constant 0 : index
    %c0_2 = arith.constant 0 : index
    %1 = vector.load %arg2[%c0_1, %c0_2] : memref<4x1xf32, #tpu.memory_space<vmem>>, vector<4x1xf32>
    %2 = vector.broadcast %1 : vector<4x1xf32> to vector<4x128xf32>
    %3 = arith.mulf %0, %2 : vector<4x128xf32>
    %cst = arith.constant 0.000000e+00 : f32
    %4 = vector.broadcast %cst : f32 to vector<4x128xf32>
    %5 = arith.cmpf olt, %3, %4 : vector<4x128xf32>
    %cst_3 = arith.constant -1.000000e+00 : f32
    %cst_4 = arith.constant 1.000000e+00 : f32
    %6 = vector.broadcast %cst_3 : f32 to vector<4x128xf32>
    %7 = vector.broadcast %cst_4 : f32 to vector<4x128xf32>
    %8 = arith.select %5, %6, %7 : vector<4x128xi1>, vector<4x128xf32>
    %9 = math.absf %3 : vector<4x128xf32>
    %cst_5 = arith.constant 2.41421366 : f32
    %10 = vector.broadcast %cst_5 : f32 to vector<4x128xf32>
    %11 = arith.cmpf ogt, %9, %10 : vector<4x128xf32>
    %cst_6 = arith.constant 0.414213568 : f32
    %12 = vector.broadcast %cst_6 : f32 to vector<4x128xf32>
    %13 = arith.cmpf ogt, %9, %12 : vector<4x128xf32>
    %cst_7 = arith.constant dense<true> : vector<4x128xi1>
    %14 = arith.xori %11, %cst_7 : vector<4x128xi1>
    %15 = arith.andi %13, %14 : vector<4x128xi1>
    %cst_8 = arith.constant 1.000000e-30 : f32
    %16 = vector.broadcast %cst_8 : f32 to vector<4x128xf32>
    %17 = arith.maximumf %9, %16 : vector<4x128xf32>
    %cst_9 = arith.constant -1.000000e+00 : f32
    %18 = vector.broadcast %cst_9 : f32 to vector<4x128xf32>
    %19 = arith.divf %18, %17 : vector<4x128xf32>
    %cst_10 = arith.constant 1.000000e+00 : f32
    %20 = vector.broadcast %cst_10 : f32 to vector<4x128xf32>
    %21 = arith.subf %9, %20 : vector<4x128xf32>
    %cst_11 = arith.constant 1.000000e+00 : f32
    %22 = vector.broadcast %cst_11 : f32 to vector<4x128xf32>
    %23 = arith.addf %9, %22 : vector<4x128xf32>
    %24 = arith.divf %21, %23 : vector<4x128xf32>
    %25 = arith.select %15, %24, %9 : vector<4x128xi1>, vector<4x128xf32>
    %26 = arith.select %11, %19, %25 : vector<4x128xi1>, vector<4x128xf32>
    %cst_12 = arith.constant 0.785398185 : f32
    %cst_13 = arith.constant 0.000000e+00 : f32
    %27 = vector.broadcast %cst_12 : f32 to vector<4x128xf32>
    %28 = vector.broadcast %cst_13 : f32 to vector<4x128xf32>
    %29 = arith.select %15, %27, %28 : vector<4x128xi1>, vector<4x128xf32>
    %cst_14 = arith.constant 1.57079637 : f32
    %30 = vector.broadcast %cst_14 : f32 to vector<4x128xf32>
    %31 = arith.select %11, %30, %29 : vector<4x128xi1>, vector<4x128xf32>
    %32 = arith.mulf %26, %26 : vector<4x128xf32>
    %cst_15 = arith.constant 0.0805374458 : f32
    %33 = vector.broadcast %cst_15 : f32 to vector<4x128xf32>
    %34 = arith.mulf %33, %32 : vector<4x128xf32>
    %cst_16 = arith.constant 0.138776854 : f32
    %35 = vector.broadcast %cst_16 : f32 to vector<4x128xf32>
    %36 = arith.subf %34, %35 : vector<4x128xf32>
    %37 = arith.mulf %36, %32 : vector<4x128xf32>
    %cst_17 = arith.constant 0.199777111 : f32
    %38 = vector.broadcast %cst_17 : f32 to vector<4x128xf32>
    %39 = arith.addf %37, %38 : vector<4x128xf32>
    %40 = arith.mulf %39, %32 : vector<4x128xf32>
    %cst_18 = arith.constant 0.333329499 : f32
    %41 = vector.broadcast %cst_18 : f32 to vector<4x128xf32>
    %42 = arith.subf %40, %41 : vector<4x128xf32>
    %43 = arith.mulf %42, %32 : vector<4x128xf32>
    %44 = arith.mulf %43, %26 : vector<4x128xf32>
    %45 = arith.addf %44, %26 : vector<4x128xf32>
    %46 = arith.addf %31, %45 : vector<4x128xf32>
    %47 = arith.mulf %8, %46 : vector<4x128xf32>
    %cst_19 = arith.constant 5.000000e-01 : f32
    %48 = vector.broadcast %cst_19 : f32 to vector<4x128xf32>
    %49 = arith.mulf %48, %47 : vector<4x128xf32>
    %50 = math.cos %49 : vector<4x128xf32>
    %cst_20 = arith.constant 5.000000e-01 : f32
    %51 = vector.broadcast %cst_20 : f32 to vector<4x128xf32>
    %52 = arith.mulf %51, %47 : vector<4x128xf32>
    %53 = math.sin %52 : vector<4x128xf32>
    %c0_21 = arith.constant 0 : index
    %c0_22 = arith.constant 0 : index
    %54 = vector.load %arg4[%c0_21, %c0_22] : memref<3x4xf32, #tpu.memory_space<vmem>>, vector<3x4xf32>
    %cst_23 = arith.constant 5.000000e-01 : f32
    %55 = vector.broadcast %cst_23 : f32 to vector<3x4xf32>
    %56 = arith.mulf %55, %54 : vector<3x4xf32>
    %57 = math.cos %56 : vector<3x4xf32>
    %c0_24 = arith.constant 0 : index
    %c0_25 = arith.constant 0 : index
    %58 = vector.load %arg4[%c0_24, %c0_25] : memref<3x4xf32, #tpu.memory_space<vmem>>, vector<3x4xf32>
    %cst_26 = arith.constant 5.000000e-01 : f32
    %59 = vector.broadcast %cst_26 : f32 to vector<3x4xf32>
    %60 = arith.mulf %59, %58 : vector<3x4xf32>
    %61 = math.sin %60 : vector<3x4xf32>
    %62 = tpu.iota {dimensions = array<i32: 0>} : vector<16x1xi32>
    %c3_i32 = arith.constant 3 : i32
    %63 = vector.broadcast %c3_i32 : i32 to vector<16x1xi32>
    %64 = arith.shrsi %62, %63 : vector<16x1xi32>
    %c1_i32 = arith.constant 1 : i32
    %65 = vector.broadcast %c1_i32 : i32 to vector<16x1xi32>
    %66 = arith.andi %64, %65 : vector<16x1xi32>
    %67 = arith.sitofp %66 : vector<16x1xi32> to vector<16x1xf32>
    %c2_i32 = arith.constant 2 : i32
    %68 = vector.broadcast %c2_i32 : i32 to vector<16x1xi32>
    %69 = arith.shrsi %62, %68 : vector<16x1xi32>
    %c1_i32_27 = arith.constant 1 : i32
    %70 = vector.broadcast %c1_i32_27 : i32 to vector<16x1xi32>
    %71 = arith.andi %69, %70 : vector<16x1xi32>
    %72 = arith.sitofp %71 : vector<16x1xi32> to vector<16x1xf32>
    %c1_i32_28 = arith.constant 1 : i32
    %73 = vector.broadcast %c1_i32_28 : i32 to vector<16x1xi32>
    %74 = arith.shrsi %62, %73 : vector<16x1xi32>
    %c1_i32_29 = arith.constant 1 : i32
    %75 = vector.broadcast %c1_i32_29 : i32 to vector<16x1xi32>
    %76 = arith.andi %74, %75 : vector<16x1xi32>
    %77 = arith.sitofp %76 : vector<16x1xi32> to vector<16x1xf32>
    %c0_i32 = arith.constant 0 : i32
    %78 = vector.broadcast %c0_i32 : i32 to vector<16x1xi32>
    %79 = arith.shrsi %62, %78 : vector<16x1xi32>
    %c1_i32_30 = arith.constant 1 : i32
    %80 = vector.broadcast %c1_i32_30 : i32 to vector<16x1xi32>
    %81 = arith.andi %79, %80 : vector<16x1xi32>
    %82 = arith.sitofp %81 : vector<16x1xi32> to vector<16x1xf32>
    %cst_31 = arith.constant 2.000000e+00 : f32
    %83 = vector.broadcast %cst_31 : f32 to vector<16x1xf32>
    %84 = arith.mulf %83, %67 : vector<16x1xf32>
    %cst_32 = arith.constant 1.000000e+00 : f32
    %85 = vector.broadcast %cst_32 : f32 to vector<16x1xf32>
    %86 = arith.subf %84, %85 : vector<16x1xf32>
    %cst_33 = arith.constant 2.000000e+00 : f32
    %87 = vector.broadcast %cst_33 : f32 to vector<16x1xf32>
    %88 = arith.mulf %87, %72 : vector<16x1xf32>
    %cst_34 = arith.constant 1.000000e+00 : f32
    %89 = vector.broadcast %cst_34 : f32 to vector<16x1xf32>
    %90 = arith.subf %88, %89 : vector<16x1xf32>
    %cst_35 = arith.constant 2.000000e+00 : f32
    %91 = vector.broadcast %cst_35 : f32 to vector<16x1xf32>
    %92 = arith.mulf %91, %77 : vector<16x1xf32>
    %cst_36 = arith.constant 1.000000e+00 : f32
    %93 = vector.broadcast %cst_36 : f32 to vector<16x1xf32>
    %94 = arith.subf %92, %93 : vector<16x1xf32>
    %cst_37 = arith.constant 2.000000e+00 : f32
    %95 = vector.broadcast %cst_37 : f32 to vector<16x1xf32>
    %96 = arith.mulf %95, %82 : vector<16x1xf32>
    %cst_38 = arith.constant 1.000000e+00 : f32
    %97 = vector.broadcast %cst_38 : f32 to vector<16x1xf32>
    %98 = arith.subf %96, %97 : vector<16x1xf32>
    %cst_39 = arith.constant 1.000000e+00 : f32
    %99 = vector.broadcast %cst_39 : f32 to vector<16x1xf32>
    %cst_40 = arith.constant 2.000000e+00 : f32
    %100 = vector.broadcast %cst_40 : f32 to vector<16x1xf32>
    %101 = arith.mulf %100, %67 : vector<16x1xf32>
    %102 = arith.mulf %101, %72 : vector<16x1xf32>
    %cst_41 = arith.constant 1.000000e+00 : f32
    %103 = vector.broadcast %cst_41 : f32 to vector<16x1xf32>
    %104 = arith.subf %103, %102 : vector<16x1xf32>
    %105 = arith.mulf %99, %104 : vector<16x1xf32>
    %cst_42 = arith.constant 2.000000e+00 : f32
    %106 = vector.broadcast %cst_42 : f32 to vector<16x1xf32>
    %107 = arith.mulf %106, %72 : vector<16x1xf32>
    %108 = arith.mulf %107, %77 : vector<16x1xf32>
    %cst_43 = arith.constant 1.000000e+00 : f32
    %109 = vector.broadcast %cst_43 : f32 to vector<16x1xf32>
    %110 = arith.subf %109, %108 : vector<16x1xf32>
    %111 = arith.mulf %105, %110 : vector<16x1xf32>
    %cst_44 = arith.constant 2.000000e+00 : f32
    %112 = vector.broadcast %cst_44 : f32 to vector<16x1xf32>
    %113 = arith.mulf %112, %77 : vector<16x1xf32>
    %114 = arith.mulf %113, %82 : vector<16x1xf32>
    %cst_45 = arith.constant 1.000000e+00 : f32
    %115 = vector.broadcast %cst_45 : f32 to vector<16x1xf32>
    %116 = arith.subf %115, %114 : vector<16x1xf32>
    %117 = arith.mulf %111, %116 : vector<16x1xf32>
    %cst_46 = arith.constant 2.000000e+00 : f32
    %118 = vector.broadcast %cst_46 : f32 to vector<16x1xf32>
    %119 = arith.mulf %118, %82 : vector<16x1xf32>
    %120 = arith.mulf %119, %67 : vector<16x1xf32>
    %cst_47 = arith.constant 1.000000e+00 : f32
    %121 = vector.broadcast %cst_47 : f32 to vector<16x1xf32>
    %122 = arith.subf %121, %120 : vector<16x1xf32>
    %123 = arith.mulf %117, %122 : vector<16x1xf32>
    %cst_48 = arith.constant 0.000000e+00 : f32
    %124 = vector.broadcast %cst_48 : f32 to vector<16x3xf32>
    %c0_49 = arith.constant 0 : index
    %c0_50 = arith.constant 0 : index
    %125 = vector.load %arg5[%c0_49, %c0_50] : memref<4x3xf32, #tpu.memory_space<vmem>>, vector<1x3xf32>
    %126 = vector.broadcast %86 : vector<16x1xf32> to vector<16x3xf32>
    %127 = vector.broadcast %125 : vector<1x3xf32> to vector<16x3xf32>
    %128 = arith.mulf %126, %127 : vector<16x3xf32>
    %129 = arith.addf %124, %128 : vector<16x3xf32>
    %c1 = arith.constant 1 : index
    %c0_51 = arith.constant 0 : index
    %130 = vector.load %arg5[%c1, %c0_51] : memref<4x3xf32, #tpu.memory_space<vmem>>, vector<1x3xf32>
    %131 = vector.broadcast %90 : vector<16x1xf32> to vector<16x3xf32>
    %132 = vector.broadcast %130 : vector<1x3xf32> to vector<16x3xf32>
    %133 = arith.mulf %131, %132 : vector<16x3xf32>
    %134 = arith.addf %129, %133 : vector<16x3xf32>
    %c2 = arith.constant 2 : index
    %c0_52 = arith.constant 0 : index
    %135 = vector.load %arg5[%c2, %c0_52] : memref<4x3xf32, #tpu.memory_space<vmem>>, vector<1x3xf32>
    %136 = vector.broadcast %94 : vector<16x1xf32> to vector<16x3xf32>
    %137 = vector.broadcast %135 : vector<1x3xf32> to vector<16x3xf32>
    %138 = arith.mulf %136, %137 : vector<16x3xf32>
    %139 = arith.addf %134, %138 : vector<16x3xf32>
    %c3 = arith.constant 3 : index
    %c0_53 = arith.constant 0 : index
    %140 = vector.load %arg5[%c3, %c0_53] : memref<4x3xf32, #tpu.memory_space<vmem>>, vector<1x3xf32>
    %141 = vector.broadcast %98 : vector<16x1xf32> to vector<16x3xf32>
    %142 = vector.broadcast %140 : vector<1x3xf32> to vector<16x3xf32>
    %143 = arith.mulf %141, %142 : vector<16x3xf32>
    %144 = arith.addf %139, %143 : vector<16x3xf32>
    %cst_54 = arith.constant 5.000000e-01 : f32
    %145 = vector.broadcast %cst_54 : f32 to vector<16x3xf32>
    %146 = arith.mulf %145, %144 : vector<16x3xf32>
    %147 = math.cos %146 : vector<16x3xf32>
    %148 = vector.broadcast %123 : vector<16x1xf32> to vector<16x3xf32>
    %149 = arith.mulf %147, %148 : vector<16x3xf32>
    %150 = math.sin %146 : vector<16x3xf32>
    %151 = vector.broadcast %123 : vector<16x1xf32> to vector<16x3xf32>
    %152 = arith.mulf %150, %151 : vector<16x3xf32>
    %153 = tpu.iota {dimensions = array<i32: 0>} : vector<16x128xi32>
    %c0_i32_55 = arith.constant 0 : i32
    %154 = vector.broadcast %c0_i32_55 : i32 to vector<16x128xi32>
    %155 = arith.cmpi eq, %153, %154 : vector<16x128xi32>
    %156 = arith.extui %155 : vector<16x128xi1> to vector<16x128xi32>
    %157 = arith.sitofp %156 : vector<16x128xi32> to vector<16x128xf32>
    %cst_56 = arith.constant 0.000000e+00 : f32
    %158 = vector.broadcast %cst_56 : f32 to vector<16x128xf32>
    %159 = vector.extract_strided_slice %50 {offsets = [0, 0], sizes = [1, 128], strides = [1, 1]} : vector<4x128xf32> to vector<1x128xf32>
    %160 = vector.extract_strided_slice %53 {offsets = [0, 0], sizes = [1, 128], strides = [1, 1]} : vector<4x128xf32> to vector<1x128xf32>
    %161 = vector.extract_strided_slice %157 {offsets = [8, 0], sizes = [8, 128], strides = [1, 1]} : vector<16x128xf32> to vector<8x128xf32>
    %162 = vector.extract_strided_slice %157 {offsets = [0, 0], sizes = [8, 128], strides = [1, 1]} : vector<16x128xf32> to vector<8x128xf32>
    %163 = tpu.concatenate %161, %162 in 0 : vector<8x128xf32>, vector<8x128xf32> -> vector<16x128xf32>
    %164 = vector.extract_strided_slice %158 {offsets = [8, 0], sizes = [8, 128], strides = [1, 1]} : vector<16x128xf32> to vector<8x128xf32>
    %165 = vector.extract_strided_slice %158 {offsets = [0, 0], sizes = [8, 128], strides = [1, 1]} : vector<16x128xf32> to vector<8x128xf32>
    %166 = tpu.concatenate %164, %165 in 0 : vector<8x128xf32>, vector<8x128xf32> -> vector<16x128xf32>
    %167 = vector.broadcast %159 : vector<1x128xf32> to vector<16x128xf32>
    %168 = arith.mulf %167, %157 : vector<16x128xf32>
    %169 = vector.broadcast %160 : vector<1x128xf32> to vector<16x128xf32>
    %170 = arith.mulf %169, %166 : vector<16x128xf32>
    %171 = arith.addf %168, %170 : vector<16x128xf32>
    %172 = vector.broadcast %159 : vector<1x128xf32> to vector<16x128xf32>
    %173 = arith.mulf %172, %158 : vector<16x128xf32>
    %174 = vector.broadcast %160 : vector<1x128xf32> to vector<16x128xf32>
    %175 = arith.mulf %174, %163 : vector<16x128xf32>
    %176 = arith.subf %173, %175 : vector<16x128xf32>
    %177 = vector.extract_strided_slice %50 {offsets = [1, 0], sizes = [1, 128], strides = [1, 1]} : vector<4x128xf32> to vector<1x128xf32>
    %178 = vector.extract_strided_slice %53 {offsets = [1, 0], sizes = [1, 128], strides = [1, 1]} : vector<4x128xf32> to vector<1x128xf32>
    %179 = vector.extract_strided_slice %171 {offsets = [4, 0], sizes = [12, 128], strides = [1, 1]} : vector<16x128xf32> to vector<12x128xf32>
    %180 = vector.extract_strided_slice %171 {offsets = [0, 0], sizes = [4, 128], strides = [1, 1]} : vector<16x128xf32> to vector<4x128xf32>
    %181 = tpu.concatenate %179, %180 in 0 : vector<12x128xf32>, vector<4x128xf32> -> vector<16x128xf32>
    %182 = vector.extract_strided_slice %171 {offsets = [12, 0], sizes = [4, 128], strides = [1, 1]} : vector<16x128xf32> to vector<4x128xf32>
    %183 = vector.extract_strided_slice %171 {offsets = [0, 0], sizes = [12, 128], strides = [1, 1]} : vector<16x128xf32> to vector<12x128xf32>
    %184 = tpu.concatenate %182, %183 in 0 : vector<4x128xf32>, vector<12x128xf32> -> vector<16x128xf32>
    %185 = arith.subf %184, %181 : vector<16x128xf32>
    %186 = vector.broadcast %72 : vector<16x1xf32> to vector<16x128xf32>
    %187 = arith.mulf %186, %185 : vector<16x128xf32>
    %188 = arith.addf %181, %187 : vector<16x128xf32>
    %189 = vector.extract_strided_slice %176 {offsets = [4, 0], sizes = [12, 128], strides = [1, 1]} : vector<16x128xf32> to vector<12x128xf32>
    %190 = vector.extract_strided_slice %176 {offsets = [0, 0], sizes = [4, 128], strides = [1, 1]} : vector<16x128xf32> to vector<4x128xf32>
    %191 = tpu.concatenate %189, %190 in 0 : vector<12x128xf32>, vector<4x128xf32> -> vector<16x128xf32>
    %192 = vector.extract_strided_slice %176 {offsets = [12, 0], sizes = [4, 128], strides = [1, 1]} : vector<16x128xf32> to vector<4x128xf32>
    %193 = vector.extract_strided_slice %176 {offsets = [0, 0], sizes = [12, 128], strides = [1, 1]} : vector<16x128xf32> to vector<12x128xf32>
    %194 = tpu.concatenate %192, %193 in 0 : vector<4x128xf32>, vector<12x128xf32> -> vector<16x128xf32>
    %195 = arith.subf %194, %191 : vector<16x128xf32>
    %196 = vector.broadcast %72 : vector<16x1xf32> to vector<16x128xf32>
    %197 = arith.mulf %196, %195 : vector<16x128xf32>
    %198 = arith.addf %191, %197 : vector<16x128xf32>
    %199 = vector.broadcast %177 : vector<1x128xf32> to vector<16x128xf32>
    %200 = arith.mulf %199, %171 : vector<16x128xf32>
    %201 = vector.broadcast %178 : vector<1x128xf32> to vector<16x128xf32>
    %202 = arith.mulf %201, %198 : vector<16x128xf32>
    %203 = arith.addf %200, %202 : vector<16x128xf32>
    %204 = vector.broadcast %177 : vector<1x128xf32> to vector<16x128xf32>
    %205 = arith.mulf %204, %176 : vector<16x128xf32>
    %206 = vector.broadcast %178 : vector<1x128xf32> to vector<16x128xf32>
    %207 = arith.mulf %206, %188 : vector<16x128xf32>
    %208 = arith.subf %205, %207 : vector<16x128xf32>
    %209 = vector.extract_strided_slice %50 {offsets = [2, 0], sizes = [1, 128], strides = [1, 1]} : vector<4x128xf32> to vector<1x128xf32>
    %210 = vector.extract_strided_slice %53 {offsets = [2, 0], sizes = [1, 128], strides = [1, 1]} : vector<4x128xf32> to vector<1x128xf32>
    %211 = vector.extract_strided_slice %203 {offsets = [2, 0], sizes = [14, 128], strides = [1, 1]} : vector<16x128xf32> to vector<14x128xf32>
    %212 = vector.extract_strided_slice %203 {offsets = [0, 0], sizes = [2, 128], strides = [1, 1]} : vector<16x128xf32> to vector<2x128xf32>
    %213 = tpu.concatenate %211, %212 in 0 : vector<14x128xf32>, vector<2x128xf32> -> vector<16x128xf32>
    %214 = vector.extract_strided_slice %203 {offsets = [14, 0], sizes = [2, 128], strides = [1, 1]} : vector<16x128xf32> to vector<2x128xf32>
    %215 = vector.extract_strided_slice %203 {offsets = [0, 0], sizes = [14, 128], strides = [1, 1]} : vector<16x128xf32> to vector<14x128xf32>
    %216 = tpu.concatenate %214, %215 in 0 : vector<2x128xf32>, vector<14x128xf32> -> vector<16x128xf32>
    %217 = arith.subf %216, %213 : vector<16x128xf32>
    %218 = vector.broadcast %77 : vector<16x1xf32> to vector<16x128xf32>
    %219 = arith.mulf %218, %217 : vector<16x128xf32>
    %220 = arith.addf %213, %219 : vector<16x128xf32>
    %221 = vector.extract_strided_slice %208 {offsets = [2, 0], sizes = [14, 128], strides = [1, 1]} : vector<16x128xf32> to vector<14x128xf32>
    %222 = vector.extract_strided_slice %208 {offsets = [0, 0], sizes = [2, 128], strides = [1, 1]} : vector<16x128xf32> to vector<2x128xf32>
    %223 = tpu.concatenate %221, %222 in 0 : vector<14x128xf32>, vector<2x128xf32> -> vector<16x128xf32>
    %224 = vector.extract_strided_slice %208 {offsets = [14, 0], sizes = [2, 128], strides = [1, 1]} : vector<16x128xf32> to vector<2x128xf32>
    %225 = vector.extract_strided_slice %208 {offsets = [0, 0], sizes = [14, 128], strides = [1, 1]} : vector<16x128xf32> to vector<14x128xf32>
    %226 = tpu.concatenate %224, %225 in 0 : vector<2x128xf32>, vector<14x128xf32> -> vector<16x128xf32>
    %227 = arith.subf %226, %223 : vector<16x128xf32>
    %228 = vector.broadcast %77 : vector<16x1xf32> to vector<16x128xf32>
    %229 = arith.mulf %228, %227 : vector<16x128xf32>
    %230 = arith.addf %223, %229 : vector<16x128xf32>
    %231 = vector.broadcast %209 : vector<1x128xf32> to vector<16x128xf32>
    %232 = arith.mulf %231, %203 : vector<16x128xf32>
    %233 = vector.broadcast %210 : vector<1x128xf32> to vector<16x128xf32>
    %234 = arith.mulf %233, %230 : vector<16x128xf32>
    %235 = arith.addf %232, %234 : vector<16x128xf32>
    %236 = vector.broadcast %209 : vector<1x128xf32> to vector<16x128xf32>
    %237 = arith.mulf %236, %208 : vector<16x128xf32>
    %238 = vector.broadcast %210 : vector<1x128xf32> to vector<16x128xf32>
    %239 = arith.mulf %238, %220 : vector<16x128xf32>
    %240 = arith.subf %237, %239 : vector<16x128xf32>
    %241 = vector.extract_strided_slice %50 {offsets = [3, 0], sizes = [1, 128], strides = [1, 1]} : vector<4x128xf32> to vector<1x128xf32>
    %242 = vector.extract_strided_slice %53 {offsets = [3, 0], sizes = [1, 128], strides = [1, 1]} : vector<4x128xf32> to vector<1x128xf32>
    %243 = vector.extract_strided_slice %235 {offsets = [1, 0], sizes = [15, 128], strides = [1, 1]} : vector<16x128xf32> to vector<15x128xf32>
    %244 = vector.extract_strided_slice %235 {offsets = [0, 0], sizes = [1, 128], strides = [1, 1]} : vector<16x128xf32> to vector<1x128xf32>
    %245 = tpu.concatenate %243, %244 in 0 : vector<15x128xf32>, vector<1x128xf32> -> vector<16x128xf32>
    %246 = vector.extract_strided_slice %235 {offsets = [15, 0], sizes = [1, 128], strides = [1, 1]} : vector<16x128xf32> to vector<1x128xf32>
    %247 = vector.extract_strided_slice %235 {offsets = [0, 0], sizes = [15, 128], strides = [1, 1]} : vector<16x128xf32> to vector<15x128xf32>
    %248 = tpu.concatenate %246, %247 in 0 : vector<1x128xf32>, vector<15x128xf32> -> vector<16x128xf32>
    %249 = arith.subf %248, %245 : vector<16x128xf32>
    %250 = vector.broadcast %82 : vector<16x1xf32> to vector<16x128xf32>
    %251 = arith.mulf %250, %249 : vector<16x128xf32>
    %252 = arith.addf %245, %251 : vector<16x128xf32>
    %253 = vector.extract_strided_slice %240 {offsets = [1, 0], sizes = [15, 128], strides = [1, 1]} : vector<16x128xf32> to vector<15x128xf32>
    %254 = vector.extract_strided_slice %240 {offsets = [0, 0], sizes = [1, 128], strides = [1, 1]} : vector<16x128xf32> to vector<1x128xf32>
    %255 = tpu.concatenate %253, %254 in 0 : vector<15x128xf32>, vector<1x128xf32> -> vector<16x128xf32>
    %256 = vector.extract_strided_slice %240 {offsets = [15, 0], sizes = [1, 128], strides = [1, 1]} : vector<16x128xf32> to vector<1x128xf32>
    %257 = vector.extract_strided_slice %240 {offsets = [0, 0], sizes = [15, 128], strides = [1, 1]} : vector<16x128xf32> to vector<15x128xf32>
    %258 = tpu.concatenate %256, %257 in 0 : vector<1x128xf32>, vector<15x128xf32> -> vector<16x128xf32>
    %259 = arith.subf %258, %255 : vector<16x128xf32>
    %260 = vector.broadcast %82 : vector<16x1xf32> to vector<16x128xf32>
    %261 = arith.mulf %260, %259 : vector<16x128xf32>
    %262 = arith.addf %255, %261 : vector<16x128xf32>
    %263 = vector.broadcast %241 : vector<1x128xf32> to vector<16x128xf32>
    %264 = arith.mulf %263, %235 : vector<16x128xf32>
    %265 = vector.broadcast %242 : vector<1x128xf32> to vector<16x128xf32>
    %266 = arith.mulf %265, %262 : vector<16x128xf32>
    %267 = arith.addf %264, %266 : vector<16x128xf32>
    %268 = vector.broadcast %241 : vector<1x128xf32> to vector<16x128xf32>
    %269 = arith.mulf %268, %240 : vector<16x128xf32>
    %270 = vector.broadcast %242 : vector<1x128xf32> to vector<16x128xf32>
    %271 = arith.mulf %270, %252 : vector<16x128xf32>
    %272 = arith.subf %269, %271 : vector<16x128xf32>
    %273 = vector.extract_strided_slice %57 {offsets = [0, 0], sizes = [1, 1], strides = [1, 1]} : vector<3x4xf32> to vector<1x1xf32>
    %274 = vector.extract_strided_slice %61 {offsets = [0, 0], sizes = [1, 1], strides = [1, 1]} : vector<3x4xf32> to vector<1x1xf32>
    %275 = vector.broadcast %274 : vector<1x1xf32> to vector<16x1xf32>
    %276 = arith.mulf %275, %86 : vector<16x1xf32>
    %277 = vector.extract_strided_slice %267 {offsets = [8, 0], sizes = [8, 128], strides = [1, 1]} : vector<16x128xf32> to vector<8x128xf32>
    %278 = vector.extract_strided_slice %267 {offsets = [0, 0], sizes = [8, 128], strides = [1, 1]} : vector<16x128xf32> to vector<8x128xf32>
    %279 = tpu.concatenate %277, %278 in 0 : vector<8x128xf32>, vector<8x128xf32> -> vector<16x128xf32>
    %280 = vector.extract_strided_slice %272 {offsets = [8, 0], sizes = [8, 128], strides = [1, 1]} : vector<16x128xf32> to vector<8x128xf32>
    %281 = vector.extract_strided_slice %272 {offsets = [0, 0], sizes = [8, 128], strides = [1, 1]} : vector<16x128xf32> to vector<8x128xf32>
    %282 = tpu.concatenate %280, %281 in 0 : vector<8x128xf32>, vector<8x128xf32> -> vector<16x128xf32>
    %283 = vector.broadcast %273 : vector<1x1xf32> to vector<16x128xf32>
    %284 = arith.mulf %283, %267 : vector<16x128xf32>
    %285 = vector.broadcast %276 : vector<16x1xf32> to vector<16x128xf32>
    %286 = arith.mulf %285, %279 : vector<16x128xf32>
    %287 = arith.addf %284, %286 : vector<16x128xf32>
    %288 = vector.broadcast %273 : vector<1x1xf32> to vector<16x128xf32>
    %289 = arith.mulf %288, %272 : vector<16x128xf32>
    %290 = vector.broadcast %276 : vector<16x1xf32> to vector<16x128xf32>
    %291 = arith.mulf %290, %282 : vector<16x128xf32>
    %292 = arith.addf %289, %291 : vector<16x128xf32>
    %293 = vector.extract_strided_slice %57 {offsets = [0, 1], sizes = [1, 1], strides = [1, 1]} : vector<3x4xf32> to vector<1x1xf32>
    %294 = vector.extract_strided_slice %61 {offsets = [0, 1], sizes = [1, 1], strides = [1, 1]} : vector<3x4xf32> to vector<1x1xf32>
    %295 = vector.broadcast %294 : vector<1x1xf32> to vector<16x1xf32>
    %296 = arith.mulf %295, %90 : vector<16x1xf32>
    %297 = vector.extract_strided_slice %287 {offsets = [4, 0], sizes = [12, 128], strides = [1, 1]} : vector<16x128xf32> to vector<12x128xf32>
    %298 = vector.extract_strided_slice %287 {offsets = [0, 0], sizes = [4, 128], strides = [1, 1]} : vector<16x128xf32> to vector<4x128xf32>
    %299 = tpu.concatenate %297, %298 in 0 : vector<12x128xf32>, vector<4x128xf32> -> vector<16x128xf32>
    %300 = vector.extract_strided_slice %287 {offsets = [12, 0], sizes = [4, 128], strides = [1, 1]} : vector<16x128xf32> to vector<4x128xf32>
    %301 = vector.extract_strided_slice %287 {offsets = [0, 0], sizes = [12, 128], strides = [1, 1]} : vector<16x128xf32> to vector<12x128xf32>
    %302 = tpu.concatenate %300, %301 in 0 : vector<4x128xf32>, vector<12x128xf32> -> vector<16x128xf32>
    %303 = arith.subf %302, %299 : vector<16x128xf32>
    %304 = vector.broadcast %72 : vector<16x1xf32> to vector<16x128xf32>
    %305 = arith.mulf %304, %303 : vector<16x128xf32>
    %306 = arith.addf %299, %305 : vector<16x128xf32>
    %307 = vector.extract_strided_slice %292 {offsets = [4, 0], sizes = [12, 128], strides = [1, 1]} : vector<16x128xf32> to vector<12x128xf32>
    %308 = vector.extract_strided_slice %292 {offsets = [0, 0], sizes = [4, 128], strides = [1, 1]} : vector<16x128xf32> to vector<4x128xf32>
    %309 = tpu.concatenate %307, %308 in 0 : vector<12x128xf32>, vector<4x128xf32> -> vector<16x128xf32>
    %310 = vector.extract_strided_slice %292 {offsets = [12, 0], sizes = [4, 128], strides = [1, 1]} : vector<16x128xf32> to vector<4x128xf32>
    %311 = vector.extract_strided_slice %292 {offsets = [0, 0], sizes = [12, 128], strides = [1, 1]} : vector<16x128xf32> to vector<12x128xf32>
    %312 = tpu.concatenate %310, %311 in 0 : vector<4x128xf32>, vector<12x128xf32> -> vector<16x128xf32>
    %313 = arith.subf %312, %309 : vector<16x128xf32>
    %314 = vector.broadcast %72 : vector<16x1xf32> to vector<16x128xf32>
    %315 = arith.mulf %314, %313 : vector<16x128xf32>
    %316 = arith.addf %309, %315 : vector<16x128xf32>
    %317 = vector.broadcast %293 : vector<1x1xf32> to vector<16x128xf32>
    %318 = arith.mulf %317, %287 : vector<16x128xf32>
    %319 = vector.broadcast %296 : vector<16x1xf32> to vector<16x128xf32>
    %320 = arith.mulf %319, %306 : vector<16x128xf32>
    %321 = arith.addf %318, %320 : vector<16x128xf32>
    %322 = vector.broadcast %293 : vector<1x1xf32> to vector<16x128xf32>
    %323 = arith.mulf %322, %292 : vector<16x128xf32>
    %324 = vector.broadcast %296 : vector<16x1xf32> to vector<16x128xf32>
    %325 = arith.mulf %324, %316 : vector<16x128xf32>
    %326 = arith.addf %323, %325 : vector<16x128xf32>
    %327 = vector.extract_strided_slice %57 {offsets = [0, 2], sizes = [1, 1], strides = [1, 1]} : vector<3x4xf32> to vector<1x1xf32>
    %328 = vector.extract_strided_slice %61 {offsets = [0, 2], sizes = [1, 1], strides = [1, 1]} : vector<3x4xf32> to vector<1x1xf32>
    %329 = vector.broadcast %328 : vector<1x1xf32> to vector<16x1xf32>
    %330 = arith.mulf %329, %94 : vector<16x1xf32>
    %331 = vector.extract_strided_slice %321 {offsets = [2, 0], sizes = [14, 128], strides = [1, 1]} : vector<16x128xf32> to vector<14x128xf32>
    %332 = vector.extract_strided_slice %321 {offsets = [0, 0], sizes = [2, 128], strides = [1, 1]} : vector<16x128xf32> to vector<2x128xf32>
    %333 = tpu.concatenate %331, %332 in 0 : vector<14x128xf32>, vector<2x128xf32> -> vector<16x128xf32>
    %334 = vector.extract_strided_slice %321 {offsets = [14, 0], sizes = [2, 128], strides = [1, 1]} : vector<16x128xf32> to vector<2x128xf32>
    %335 = vector.extract_strided_slice %321 {offsets = [0, 0], sizes = [14, 128], strides = [1, 1]} : vector<16x128xf32> to vector<14x128xf32>
    %336 = tpu.concatenate %334, %335 in 0 : vector<2x128xf32>, vector<14x128xf32> -> vector<16x128xf32>
    %337 = arith.subf %336, %333 : vector<16x128xf32>
    %338 = vector.broadcast %77 : vector<16x1xf32> to vector<16x128xf32>
    %339 = arith.mulf %338, %337 : vector<16x128xf32>
    %340 = arith.addf %333, %339 : vector<16x128xf32>
    %341 = vector.extract_strided_slice %326 {offsets = [2, 0], sizes = [14, 128], strides = [1, 1]} : vector<16x128xf32> to vector<14x128xf32>
    %342 = vector.extract_strided_slice %326 {offsets = [0, 0], sizes = [2, 128], strides = [1, 1]} : vector<16x128xf32> to vector<2x128xf32>
    %343 = tpu.concatenate %341, %342 in 0 : vector<14x128xf32>, vector<2x128xf32> -> vector<16x128xf32>
    %344 = vector.extract_strided_slice %326 {offsets = [14, 0], sizes = [2, 128], strides = [1, 1]} : vector<16x128xf32> to vector<2x128xf32>
    %345 = vector.extract_strided_slice %326 {offsets = [0, 0], sizes = [14, 128], strides = [1, 1]} : vector<16x128xf32> to vector<14x128xf32>
    %346 = tpu.concatenate %344, %345 in 0 : vector<2x128xf32>, vector<14x128xf32> -> vector<16x128xf32>
    %347 = arith.subf %346, %343 : vector<16x128xf32>
    %348 = vector.broadcast %77 : vector<16x1xf32> to vector<16x128xf32>
    %349 = arith.mulf %348, %347 : vector<16x128xf32>
    %350 = arith.addf %343, %349 : vector<16x128xf32>
    %351 = vector.broadcast %327 : vector<1x1xf32> to vector<16x128xf32>
    %352 = arith.mulf %351, %321 : vector<16x128xf32>
    %353 = vector.broadcast %330 : vector<16x1xf32> to vector<16x128xf32>
    %354 = arith.mulf %353, %340 : vector<16x128xf32>
    %355 = arith.addf %352, %354 : vector<16x128xf32>
    %356 = vector.broadcast %327 : vector<1x1xf32> to vector<16x128xf32>
    %357 = arith.mulf %356, %326 : vector<16x128xf32>
    %358 = vector.broadcast %330 : vector<16x1xf32> to vector<16x128xf32>
    %359 = arith.mulf %358, %350 : vector<16x128xf32>
    %360 = arith.addf %357, %359 : vector<16x128xf32>
    %361 = vector.extract_strided_slice %57 {offsets = [0, 3], sizes = [1, 1], strides = [1, 1]} : vector<3x4xf32> to vector<1x1xf32>
    %362 = vector.extract_strided_slice %61 {offsets = [0, 3], sizes = [1, 1], strides = [1, 1]} : vector<3x4xf32> to vector<1x1xf32>
    %363 = vector.broadcast %362 : vector<1x1xf32> to vector<16x1xf32>
    %364 = arith.mulf %363, %98 : vector<16x1xf32>
    %365 = vector.extract_strided_slice %355 {offsets = [1, 0], sizes = [15, 128], strides = [1, 1]} : vector<16x128xf32> to vector<15x128xf32>
    %366 = vector.extract_strided_slice %355 {offsets = [0, 0], sizes = [1, 128], strides = [1, 1]} : vector<16x128xf32> to vector<1x128xf32>
    %367 = tpu.concatenate %365, %366 in 0 : vector<15x128xf32>, vector<1x128xf32> -> vector<16x128xf32>
    %368 = vector.extract_strided_slice %355 {offsets = [15, 0], sizes = [1, 128], strides = [1, 1]} : vector<16x128xf32> to vector<1x128xf32>
    %369 = vector.extract_strided_slice %355 {offsets = [0, 0], sizes = [15, 128], strides = [1, 1]} : vector<16x128xf32> to vector<15x128xf32>
    %370 = tpu.concatenate %368, %369 in 0 : vector<1x128xf32>, vector<15x128xf32> -> vector<16x128xf32>
    %371 = arith.subf %370, %367 : vector<16x128xf32>
    %372 = vector.broadcast %82 : vector<16x1xf32> to vector<16x128xf32>
    %373 = arith.mulf %372, %371 : vector<16x128xf32>
    %374 = arith.addf %367, %373 : vector<16x128xf32>
    %375 = vector.extract_strided_slice %360 {offsets = [1, 0], sizes = [15, 128], strides = [1, 1]} : vector<16x128xf32> to vector<15x128xf32>
    %376 = vector.extract_strided_slice %360 {offsets = [0, 0], sizes = [1, 128], strides = [1, 1]} : vector<16x128xf32> to vector<1x128xf32>
    %377 = tpu.concatenate %375, %376 in 0 : vector<15x128xf32>, vector<1x128xf32> -> vector<16x128xf32>
    %378 = vector.extract_strided_slice %360 {offsets = [15, 0], sizes = [1, 128], strides = [1, 1]} : vector<16x128xf32> to vector<1x128xf32>
    %379 = vector.extract_strided_slice %360 {offsets = [0, 0], sizes = [15, 128], strides = [1, 1]} : vector<16x128xf32> to vector<15x128xf32>
    %380 = tpu.concatenate %378, %379 in 0 : vector<1x128xf32>, vector<15x128xf32> -> vector<16x128xf32>
    %381 = arith.subf %380, %377 : vector<16x128xf32>
    %382 = vector.broadcast %82 : vector<16x1xf32> to vector<16x128xf32>
    %383 = arith.mulf %382, %381 : vector<16x128xf32>
    %384 = arith.addf %377, %383 : vector<16x128xf32>
    %385 = vector.broadcast %361 : vector<1x1xf32> to vector<16x128xf32>
    %386 = arith.mulf %385, %355 : vector<16x128xf32>
    %387 = vector.broadcast %364 : vector<16x1xf32> to vector<16x128xf32>
    %388 = arith.mulf %387, %374 : vector<16x128xf32>
    %389 = arith.addf %386, %388 : vector<16x128xf32>
    %390 = vector.broadcast %361 : vector<1x1xf32> to vector<16x128xf32>
    %391 = arith.mulf %390, %360 : vector<16x128xf32>
    %392 = vector.broadcast %364 : vector<16x1xf32> to vector<16x128xf32>
    %393 = arith.mulf %392, %384 : vector<16x128xf32>
    %394 = arith.addf %391, %393 : vector<16x128xf32>
    %395 = vector.extract_strided_slice %149 {offsets = [0, 0], sizes = [16, 1], strides = [1, 1]} : vector<16x3xf32> to vector<16x1xf32>
    %396 = vector.extract_strided_slice %152 {offsets = [0, 0], sizes = [16, 1], strides = [1, 1]} : vector<16x3xf32> to vector<16x1xf32>
    %397 = vector.broadcast %395 : vector<16x1xf32> to vector<16x128xf32>
    %398 = arith.mulf %397, %389 : vector<16x128xf32>
    %399 = vector.broadcast %396 : vector<16x1xf32> to vector<16x128xf32>
    %400 = arith.mulf %399, %394 : vector<16x128xf32>
    %401 = arith.subf %398, %400 : vector<16x128xf32>
    %402 = vector.broadcast %396 : vector<16x1xf32> to vector<16x128xf32>
    %403 = arith.mulf %402, %389 : vector<16x128xf32>
    %404 = vector.broadcast %395 : vector<16x1xf32> to vector<16x128xf32>
    %405 = arith.mulf %404, %394 : vector<16x128xf32>
    %406 = arith.addf %403, %405 : vector<16x128xf32>
    %407 = vector.extract_strided_slice %50 {offsets = [0, 0], sizes = [1, 128], strides = [1, 1]} : vector<4x128xf32> to vector<1x128xf32>
    %408 = vector.extract_strided_slice %53 {offsets = [0, 0], sizes = [1, 128], strides = [1, 1]} : vector<4x128xf32> to vector<1x128xf32>
    %409 = vector.extract_strided_slice %401 {offsets = [8, 0], sizes = [8, 128], strides = [1, 1]} : vector<16x128xf32> to vector<8x128xf32>
    %410 = vector.extract_strided_slice %401 {offsets = [0, 0], sizes = [8, 128], strides = [1, 1]} : vector<16x128xf32> to vector<8x128xf32>
    %411 = tpu.concatenate %409, %410 in 0 : vector<8x128xf32>, vector<8x128xf32> -> vector<16x128xf32>
    %412 = vector.extract_strided_slice %406 {offsets = [8, 0], sizes = [8, 128], strides = [1, 1]} : vector<16x128xf32> to vector<8x128xf32>
    %413 = vector.extract_strided_slice %406 {offsets = [0, 0], sizes = [8, 128], strides = [1, 1]} : vector<16x128xf32> to vector<8x128xf32>
    %414 = tpu.concatenate %412, %413 in 0 : vector<8x128xf32>, vector<8x128xf32> -> vector<16x128xf32>
    %415 = vector.broadcast %407 : vector<1x128xf32> to vector<16x128xf32>
    %416 = arith.mulf %415, %401 : vector<16x128xf32>
    %417 = vector.broadcast %408 : vector<1x128xf32> to vector<16x128xf32>
    %418 = arith.mulf %417, %414 : vector<16x128xf32>
    %419 = arith.addf %416, %418 : vector<16x128xf32>
    %420 = vector.broadcast %407 : vector<1x128xf32> to vector<16x128xf32>
    %421 = arith.mulf %420, %406 : vector<16x128xf32>
    %422 = vector.broadcast %408 : vector<1x128xf32> to vector<16x128xf32>
    %423 = arith.mulf %422, %411 : vector<16x128xf32>
    %424 = arith.subf %421, %423 : vector<16x128xf32>
    %425 = vector.extract_strided_slice %50 {offsets = [1, 0], sizes = [1, 128], strides = [1, 1]} : vector<4x128xf32> to vector<1x128xf32>
    %426 = vector.extract_strided_slice %53 {offsets = [1, 0], sizes = [1, 128], strides = [1, 1]} : vector<4x128xf32> to vector<1x128xf32>
    %427 = vector.extract_strided_slice %419 {offsets = [4, 0], sizes = [12, 128], strides = [1, 1]} : vector<16x128xf32> to vector<12x128xf32>
    %428 = vector.extract_strided_slice %419 {offsets = [0, 0], sizes = [4, 128], strides = [1, 1]} : vector<16x128xf32> to vector<4x128xf32>
    %429 = tpu.concatenate %427, %428 in 0 : vector<12x128xf32>, vector<4x128xf32> -> vector<16x128xf32>
    %430 = vector.extract_strided_slice %419 {offsets = [12, 0], sizes = [4, 128], strides = [1, 1]} : vector<16x128xf32> to vector<4x128xf32>
    %431 = vector.extract_strided_slice %419 {offsets = [0, 0], sizes = [12, 128], strides = [1, 1]} : vector<16x128xf32> to vector<12x128xf32>
    %432 = tpu.concatenate %430, %431 in 0 : vector<4x128xf32>, vector<12x128xf32> -> vector<16x128xf32>
    %433 = arith.subf %432, %429 : vector<16x128xf32>
    %434 = vector.broadcast %72 : vector<16x1xf32> to vector<16x128xf32>
    %435 = arith.mulf %434, %433 : vector<16x128xf32>
    %436 = arith.addf %429, %435 : vector<16x128xf32>
    %437 = vector.extract_strided_slice %424 {offsets = [4, 0], sizes = [12, 128], strides = [1, 1]} : vector<16x128xf32> to vector<12x128xf32>
    %438 = vector.extract_strided_slice %424 {offsets = [0, 0], sizes = [4, 128], strides = [1, 1]} : vector<16x128xf32> to vector<4x128xf32>
    %439 = tpu.concatenate %437, %438 in 0 : vector<12x128xf32>, vector<4x128xf32> -> vector<16x128xf32>
    %440 = vector.extract_strided_slice %424 {offsets = [12, 0], sizes = [4, 128], strides = [1, 1]} : vector<16x128xf32> to vector<4x128xf32>
    %441 = vector.extract_strided_slice %424 {offsets = [0, 0], sizes = [12, 128], strides = [1, 1]} : vector<16x128xf32> to vector<12x128xf32>
    %442 = tpu.concatenate %440, %441 in 0 : vector<4x128xf32>, vector<12x128xf32> -> vector<16x128xf32>
    %443 = arith.subf %442, %439 : vector<16x128xf32>
    %444 = vector.broadcast %72 : vector<16x1xf32> to vector<16x128xf32>
    %445 = arith.mulf %444, %443 : vector<16x128xf32>
    %446 = arith.addf %439, %445 : vector<16x128xf32>
    %447 = vector.broadcast %425 : vector<1x128xf32> to vector<16x128xf32>
    %448 = arith.mulf %447, %419 : vector<16x128xf32>
    %449 = vector.broadcast %426 : vector<1x128xf32> to vector<16x128xf32>
    %450 = arith.mulf %449, %446 : vector<16x128xf32>
    %451 = arith.addf %448, %450 : vector<16x128xf32>
    %452 = vector.broadcast %425 : vector<1x128xf32> to vector<16x128xf32>
    %453 = arith.mulf %452, %424 : vector<16x128xf32>
    %454 = vector.broadcast %426 : vector<1x128xf32> to vector<16x128xf32>
    %455 = arith.mulf %454, %436 : vector<16x128xf32>
    %456 = arith.subf %453, %455 : vector<16x128xf32>
    %457 = vector.extract_strided_slice %50 {offsets = [2, 0], sizes = [1, 128], strides = [1, 1]} : vector<4x128xf32> to vector<1x128xf32>
    %458 = vector.extract_strided_slice %53 {offsets = [2, 0], sizes = [1, 128], strides = [1, 1]} : vector<4x128xf32> to vector<1x128xf32>
    %459 = vector.extract_strided_slice %451 {offsets = [2, 0], sizes = [14, 128], strides = [1, 1]} : vector<16x128xf32> to vector<14x128xf32>
    %460 = vector.extract_strided_slice %451 {offsets = [0, 0], sizes = [2, 128], strides = [1, 1]} : vector<16x128xf32> to vector<2x128xf32>
    %461 = tpu.concatenate %459, %460 in 0 : vector<14x128xf32>, vector<2x128xf32> -> vector<16x128xf32>
    %462 = vector.extract_strided_slice %451 {offsets = [14, 0], sizes = [2, 128], strides = [1, 1]} : vector<16x128xf32> to vector<2x128xf32>
    %463 = vector.extract_strided_slice %451 {offsets = [0, 0], sizes = [14, 128], strides = [1, 1]} : vector<16x128xf32> to vector<14x128xf32>
    %464 = tpu.concatenate %462, %463 in 0 : vector<2x128xf32>, vector<14x128xf32> -> vector<16x128xf32>
    %465 = arith.subf %464, %461 : vector<16x128xf32>
    %466 = vector.broadcast %77 : vector<16x1xf32> to vector<16x128xf32>
    %467 = arith.mulf %466, %465 : vector<16x128xf32>
    %468 = arith.addf %461, %467 : vector<16x128xf32>
    %469 = vector.extract_strided_slice %456 {offsets = [2, 0], sizes = [14, 128], strides = [1, 1]} : vector<16x128xf32> to vector<14x128xf32>
    %470 = vector.extract_strided_slice %456 {offsets = [0, 0], sizes = [2, 128], strides = [1, 1]} : vector<16x128xf32> to vector<2x128xf32>
    %471 = tpu.concatenate %469, %470 in 0 : vector<14x128xf32>, vector<2x128xf32> -> vector<16x128xf32>
    %472 = vector.extract_strided_slice %456 {offsets = [14, 0], sizes = [2, 128], strides = [1, 1]} : vector<16x128xf32> to vector<2x128xf32>
    %473 = vector.extract_strided_slice %456 {offsets = [0, 0], sizes = [14, 128], strides = [1, 1]} : vector<16x128xf32> to vector<14x128xf32>
    %474 = tpu.concatenate %472, %473 in 0 : vector<2x128xf32>, vector<14x128xf32> -> vector<16x128xf32>
    %475 = arith.subf %474, %471 : vector<16x128xf32>
    %476 = vector.broadcast %77 : vector<16x1xf32> to vector<16x128xf32>
    %477 = arith.mulf %476, %475 : vector<16x128xf32>
    %478 = arith.addf %471, %477 : vector<16x128xf32>
    %479 = vector.broadcast %457 : vector<1x128xf32> to vector<16x128xf32>
    %480 = arith.mulf %479, %451 : vector<16x128xf32>
    %481 = vector.broadcast %458 : vector<1x128xf32> to vector<16x128xf32>
    %482 = arith.mulf %481, %478 : vector<16x128xf32>
    %483 = arith.addf %480, %482 : vector<16x128xf32>
    %484 = vector.broadcast %457 : vector<1x128xf32> to vector<16x128xf32>
    %485 = arith.mulf %484, %456 : vector<16x128xf32>
    %486 = vector.broadcast %458 : vector<1x128xf32> to vector<16x128xf32>
    %487 = arith.mulf %486, %468 : vector<16x128xf32>
    %488 = arith.subf %485, %487 : vector<16x128xf32>
    %489 = vector.extract_strided_slice %50 {offsets = [3, 0], sizes = [1, 128], strides = [1, 1]} : vector<4x128xf32> to vector<1x128xf32>
    %490 = vector.extract_strided_slice %53 {offsets = [3, 0], sizes = [1, 128], strides = [1, 1]} : vector<4x128xf32> to vector<1x128xf32>
    %491 = vector.extract_strided_slice %483 {offsets = [1, 0], sizes = [15, 128], strides = [1, 1]} : vector<16x128xf32> to vector<15x128xf32>
    %492 = vector.extract_strided_slice %483 {offsets = [0, 0], sizes = [1, 128], strides = [1, 1]} : vector<16x128xf32> to vector<1x128xf32>
    %493 = tpu.concatenate %491, %492 in 0 : vector<15x128xf32>, vector<1x128xf32> -> vector<16x128xf32>
    %494 = vector.extract_strided_slice %483 {offsets = [15, 0], sizes = [1, 128], strides = [1, 1]} : vector<16x128xf32> to vector<1x128xf32>
    %495 = vector.extract_strided_slice %483 {offsets = [0, 0], sizes = [15, 128], strides = [1, 1]} : vector<16x128xf32> to vector<15x128xf32>
    %496 = tpu.concatenate %494, %495 in 0 : vector<1x128xf32>, vector<15x128xf32> -> vector<16x128xf32>
    %497 = arith.subf %496, %493 : vector<16x128xf32>
    %498 = vector.broadcast %82 : vector<16x1xf32> to vector<16x128xf32>
    %499 = arith.mulf %498, %497 : vector<16x128xf32>
    %500 = arith.addf %493, %499 : vector<16x128xf32>
    %501 = vector.extract_strided_slice %488 {offsets = [1, 0], sizes = [15, 128], strides = [1, 1]} : vector<16x128xf32> to vector<15x128xf32>
    %502 = vector.extract_strided_slice %488 {offsets = [0, 0], sizes = [1, 128], strides = [1, 1]} : vector<16x128xf32> to vector<1x128xf32>
    %503 = tpu.concatenate %501, %502 in 0 : vector<15x128xf32>, vector<1x128xf32> -> vector<16x128xf32>
    %504 = vector.extract_strided_slice %488 {offsets = [15, 0], sizes = [1, 128], strides = [1, 1]} : vector<16x128xf32> to vector<1x128xf32>
    %505 = vector.extract_strided_slice %488 {offsets = [0, 0], sizes = [15, 128], strides = [1, 1]} : vector<16x128xf32> to vector<15x128xf32>
    %506 = tpu.concatenate %504, %505 in 0 : vector<1x128xf32>, vector<15x128xf32> -> vector<16x128xf32>
    %507 = arith.subf %506, %503 : vector<16x128xf32>
    %508 = vector.broadcast %82 : vector<16x1xf32> to vector<16x128xf32>
    %509 = arith.mulf %508, %507 : vector<16x128xf32>
    %510 = arith.addf %503, %509 : vector<16x128xf32>
    %511 = vector.broadcast %489 : vector<1x128xf32> to vector<16x128xf32>
    %512 = arith.mulf %511, %483 : vector<16x128xf32>
    %513 = vector.broadcast %490 : vector<1x128xf32> to vector<16x128xf32>
    %514 = arith.mulf %513, %510 : vector<16x128xf32>
    %515 = arith.addf %512, %514 : vector<16x128xf32>
    %516 = vector.broadcast %489 : vector<1x128xf32> to vector<16x128xf32>
    %517 = arith.mulf %516, %488 : vector<16x128xf32>
    %518 = vector.broadcast %490 : vector<1x128xf32> to vector<16x128xf32>
    %519 = arith.mulf %518, %500 : vector<16x128xf32>
    %520 = arith.subf %517, %519 : vector<16x128xf32>
    %521 = vector.extract_strided_slice %57 {offsets = [1, 0], sizes = [1, 1], strides = [1, 1]} : vector<3x4xf32> to vector<1x1xf32>
    %522 = vector.extract_strided_slice %61 {offsets = [1, 0], sizes = [1, 1], strides = [1, 1]} : vector<3x4xf32> to vector<1x1xf32>
    %523 = vector.broadcast %522 : vector<1x1xf32> to vector<16x1xf32>
    %524 = arith.mulf %523, %86 : vector<16x1xf32>
    %525 = vector.extract_strided_slice %515 {offsets = [8, 0], sizes = [8, 128], strides = [1, 1]} : vector<16x128xf32> to vector<8x128xf32>
    %526 = vector.extract_strided_slice %515 {offsets = [0, 0], sizes = [8, 128], strides = [1, 1]} : vector<16x128xf32> to vector<8x128xf32>
    %527 = tpu.concatenate %525, %526 in 0 : vector<8x128xf32>, vector<8x128xf32> -> vector<16x128xf32>
    %528 = vector.extract_strided_slice %520 {offsets = [8, 0], sizes = [8, 128], strides = [1, 1]} : vector<16x128xf32> to vector<8x128xf32>
    %529 = vector.extract_strided_slice %520 {offsets = [0, 0], sizes = [8, 128], strides = [1, 1]} : vector<16x128xf32> to vector<8x128xf32>
    %530 = tpu.concatenate %528, %529 in 0 : vector<8x128xf32>, vector<8x128xf32> -> vector<16x128xf32>
    %531 = vector.broadcast %521 : vector<1x1xf32> to vector<16x128xf32>
    %532 = arith.mulf %531, %515 : vector<16x128xf32>
    %533 = vector.broadcast %524 : vector<16x1xf32> to vector<16x128xf32>
    %534 = arith.mulf %533, %527 : vector<16x128xf32>
    %535 = arith.addf %532, %534 : vector<16x128xf32>
    %536 = vector.broadcast %521 : vector<1x1xf32> to vector<16x128xf32>
    %537 = arith.mulf %536, %520 : vector<16x128xf32>
    %538 = vector.broadcast %524 : vector<16x1xf32> to vector<16x128xf32>
    %539 = arith.mulf %538, %530 : vector<16x128xf32>
    %540 = arith.addf %537, %539 : vector<16x128xf32>
    %541 = vector.extract_strided_slice %57 {offsets = [1, 1], sizes = [1, 1], strides = [1, 1]} : vector<3x4xf32> to vector<1x1xf32>
    %542 = vector.extract_strided_slice %61 {offsets = [1, 1], sizes = [1, 1], strides = [1, 1]} : vector<3x4xf32> to vector<1x1xf32>
    %543 = vector.broadcast %542 : vector<1x1xf32> to vector<16x1xf32>
    %544 = arith.mulf %543, %90 : vector<16x1xf32>
    %545 = vector.extract_strided_slice %535 {offsets = [4, 0], sizes = [12, 128], strides = [1, 1]} : vector<16x128xf32> to vector<12x128xf32>
    %546 = vector.extract_strided_slice %535 {offsets = [0, 0], sizes = [4, 128], strides = [1, 1]} : vector<16x128xf32> to vector<4x128xf32>
    %547 = tpu.concatenate %545, %546 in 0 : vector<12x128xf32>, vector<4x128xf32> -> vector<16x128xf32>
    %548 = vector.extract_strided_slice %535 {offsets = [12, 0], sizes = [4, 128], strides = [1, 1]} : vector<16x128xf32> to vector<4x128xf32>
    %549 = vector.extract_strided_slice %535 {offsets = [0, 0], sizes = [12, 128], strides = [1, 1]} : vector<16x128xf32> to vector<12x128xf32>
    %550 = tpu.concatenate %548, %549 in 0 : vector<4x128xf32>, vector<12x128xf32> -> vector<16x128xf32>
    %551 = arith.subf %550, %547 : vector<16x128xf32>
    %552 = vector.broadcast %72 : vector<16x1xf32> to vector<16x128xf32>
    %553 = arith.mulf %552, %551 : vector<16x128xf32>
    %554 = arith.addf %547, %553 : vector<16x128xf32>
    %555 = vector.extract_strided_slice %540 {offsets = [4, 0], sizes = [12, 128], strides = [1, 1]} : vector<16x128xf32> to vector<12x128xf32>
    %556 = vector.extract_strided_slice %540 {offsets = [0, 0], sizes = [4, 128], strides = [1, 1]} : vector<16x128xf32> to vector<4x128xf32>
    %557 = tpu.concatenate %555, %556 in 0 : vector<12x128xf32>, vector<4x128xf32> -> vector<16x128xf32>
    %558 = vector.extract_strided_slice %540 {offsets = [12, 0], sizes = [4, 128], strides = [1, 1]} : vector<16x128xf32> to vector<4x128xf32>
    %559 = vector.extract_strided_slice %540 {offsets = [0, 0], sizes = [12, 128], strides = [1, 1]} : vector<16x128xf32> to vector<12x128xf32>
    %560 = tpu.concatenate %558, %559 in 0 : vector<4x128xf32>, vector<12x128xf32> -> vector<16x128xf32>
    %561 = arith.subf %560, %557 : vector<16x128xf32>
    %562 = vector.broadcast %72 : vector<16x1xf32> to vector<16x128xf32>
    %563 = arith.mulf %562, %561 : vector<16x128xf32>
    %564 = arith.addf %557, %563 : vector<16x128xf32>
    %565 = vector.broadcast %541 : vector<1x1xf32> to vector<16x128xf32>
    %566 = arith.mulf %565, %535 : vector<16x128xf32>
    %567 = vector.broadcast %544 : vector<16x1xf32> to vector<16x128xf32>
    %568 = arith.mulf %567, %554 : vector<16x128xf32>
    %569 = arith.addf %566, %568 : vector<16x128xf32>
    %570 = vector.broadcast %541 : vector<1x1xf32> to vector<16x128xf32>
    %571 = arith.mulf %570, %540 : vector<16x128xf32>
    %572 = vector.broadcast %544 : vector<16x1xf32> to vector<16x128xf32>
    %573 = arith.mulf %572, %564 : vector<16x128xf32>
    %574 = arith.addf %571, %573 : vector<16x128xf32>
    %575 = vector.extract_strided_slice %57 {offsets = [1, 2], sizes = [1, 1], strides = [1, 1]} : vector<3x4xf32> to vector<1x1xf32>
    %576 = vector.extract_strided_slice %61 {offsets = [1, 2], sizes = [1, 1], strides = [1, 1]} : vector<3x4xf32> to vector<1x1xf32>
    %577 = vector.broadcast %576 : vector<1x1xf32> to vector<16x1xf32>
    %578 = arith.mulf %577, %94 : vector<16x1xf32>
    %579 = vector.extract_strided_slice %569 {offsets = [2, 0], sizes = [14, 128], strides = [1, 1]} : vector<16x128xf32> to vector<14x128xf32>
    %580 = vector.extract_strided_slice %569 {offsets = [0, 0], sizes = [2, 128], strides = [1, 1]} : vector<16x128xf32> to vector<2x128xf32>
    %581 = tpu.concatenate %579, %580 in 0 : vector<14x128xf32>, vector<2x128xf32> -> vector<16x128xf32>
    %582 = vector.extract_strided_slice %569 {offsets = [14, 0], sizes = [2, 128], strides = [1, 1]} : vector<16x128xf32> to vector<2x128xf32>
    %583 = vector.extract_strided_slice %569 {offsets = [0, 0], sizes = [14, 128], strides = [1, 1]} : vector<16x128xf32> to vector<14x128xf32>
    %584 = tpu.concatenate %582, %583 in 0 : vector<2x128xf32>, vector<14x128xf32> -> vector<16x128xf32>
    %585 = arith.subf %584, %581 : vector<16x128xf32>
    %586 = vector.broadcast %77 : vector<16x1xf32> to vector<16x128xf32>
    %587 = arith.mulf %586, %585 : vector<16x128xf32>
    %588 = arith.addf %581, %587 : vector<16x128xf32>
    %589 = vector.extract_strided_slice %574 {offsets = [2, 0], sizes = [14, 128], strides = [1, 1]} : vector<16x128xf32> to vector<14x128xf32>
    %590 = vector.extract_strided_slice %574 {offsets = [0, 0], sizes = [2, 128], strides = [1, 1]} : vector<16x128xf32> to vector<2x128xf32>
    %591 = tpu.concatenate %589, %590 in 0 : vector<14x128xf32>, vector<2x128xf32> -> vector<16x128xf32>
    %592 = vector.extract_strided_slice %574 {offsets = [14, 0], sizes = [2, 128], strides = [1, 1]} : vector<16x128xf32> to vector<2x128xf32>
    %593 = vector.extract_strided_slice %574 {offsets = [0, 0], sizes = [14, 128], strides = [1, 1]} : vector<16x128xf32> to vector<14x128xf32>
    %594 = tpu.concatenate %592, %593 in 0 : vector<2x128xf32>, vector<14x128xf32> -> vector<16x128xf32>
    %595 = arith.subf %594, %591 : vector<16x128xf32>
    %596 = vector.broadcast %77 : vector<16x1xf32> to vector<16x128xf32>
    %597 = arith.mulf %596, %595 : vector<16x128xf32>
    %598 = arith.addf %591, %597 : vector<16x128xf32>
    %599 = vector.broadcast %575 : vector<1x1xf32> to vector<16x128xf32>
    %600 = arith.mulf %599, %569 : vector<16x128xf32>
    %601 = vector.broadcast %578 : vector<16x1xf32> to vector<16x128xf32>
    %602 = arith.mulf %601, %588 : vector<16x128xf32>
    %603 = arith.addf %600, %602 : vector<16x128xf32>
    %604 = vector.broadcast %575 : vector<1x1xf32> to vector<16x128xf32>
    %605 = arith.mulf %604, %574 : vector<16x128xf32>
    %606 = vector.broadcast %578 : vector<16x1xf32> to vector<16x128xf32>
    %607 = arith.mulf %606, %598 : vector<16x128xf32>
    %608 = arith.addf %605, %607 : vector<16x128xf32>
    %609 = vector.extract_strided_slice %57 {offsets = [1, 3], sizes = [1, 1], strides = [1, 1]} : vector<3x4xf32> to vector<1x1xf32>
    %610 = vector.extract_strided_slice %61 {offsets = [1, 3], sizes = [1, 1], strides = [1, 1]} : vector<3x4xf32> to vector<1x1xf32>
    %611 = vector.broadcast %610 : vector<1x1xf32> to vector<16x1xf32>
    %612 = arith.mulf %611, %98 : vector<16x1xf32>
    %613 = vector.extract_strided_slice %603 {offsets = [1, 0], sizes = [15, 128], strides = [1, 1]} : vector<16x128xf32> to vector<15x128xf32>
    %614 = vector.extract_strided_slice %603 {offsets = [0, 0], sizes = [1, 128], strides = [1, 1]} : vector<16x128xf32> to vector<1x128xf32>
    %615 = tpu.concatenate %613, %614 in 0 : vector<15x128xf32>, vector<1x128xf32> -> vector<16x128xf32>
    %616 = vector.extract_strided_slice %603 {offsets = [15, 0], sizes = [1, 128], strides = [1, 1]} : vector<16x128xf32> to vector<1x128xf32>
    %617 = vector.extract_strided_slice %603 {offsets = [0, 0], sizes = [15, 128], strides = [1, 1]} : vector<16x128xf32> to vector<15x128xf32>
    %618 = tpu.concatenate %616, %617 in 0 : vector<1x128xf32>, vector<15x128xf32> -> vector<16x128xf32>
    %619 = arith.subf %618, %615 : vector<16x128xf32>
    %620 = vector.broadcast %82 : vector<16x1xf32> to vector<16x128xf32>
    %621 = arith.mulf %620, %619 : vector<16x128xf32>
    %622 = arith.addf %615, %621 : vector<16x128xf32>
    %623 = vector.extract_strided_slice %608 {offsets = [1, 0], sizes = [15, 128], strides = [1, 1]} : vector<16x128xf32> to vector<15x128xf32>
    %624 = vector.extract_strided_slice %608 {offsets = [0, 0], sizes = [1, 128], strides = [1, 1]} : vector<16x128xf32> to vector<1x128xf32>
    %625 = tpu.concatenate %623, %624 in 0 : vector<15x128xf32>, vector<1x128xf32> -> vector<16x128xf32>
    %626 = vector.extract_strided_slice %608 {offsets = [15, 0], sizes = [1, 128], strides = [1, 1]} : vector<16x128xf32> to vector<1x128xf32>
    %627 = vector.extract_strided_slice %608 {offsets = [0, 0], sizes = [15, 128], strides = [1, 1]} : vector<16x128xf32> to vector<15x128xf32>
    %628 = tpu.concatenate %626, %627 in 0 : vector<1x128xf32>, vector<15x128xf32> -> vector<16x128xf32>
    %629 = arith.subf %628, %625 : vector<16x128xf32>
    %630 = vector.broadcast %82 : vector<16x1xf32> to vector<16x128xf32>
    %631 = arith.mulf %630, %629 : vector<16x128xf32>
    %632 = arith.addf %625, %631 : vector<16x128xf32>
    %633 = vector.broadcast %609 : vector<1x1xf32> to vector<16x128xf32>
    %634 = arith.mulf %633, %603 : vector<16x128xf32>
    %635 = vector.broadcast %612 : vector<16x1xf32> to vector<16x128xf32>
    %636 = arith.mulf %635, %622 : vector<16x128xf32>
    %637 = arith.addf %634, %636 : vector<16x128xf32>
    %638 = vector.broadcast %609 : vector<1x1xf32> to vector<16x128xf32>
    %639 = arith.mulf %638, %608 : vector<16x128xf32>
    %640 = vector.broadcast %612 : vector<16x1xf32> to vector<16x128xf32>
    %641 = arith.mulf %640, %632 : vector<16x128xf32>
    %642 = arith.addf %639, %641 : vector<16x128xf32>
    %643 = vector.extract_strided_slice %149 {offsets = [0, 1], sizes = [16, 1], strides = [1, 1]} : vector<16x3xf32> to vector<16x1xf32>
    %644 = vector.extract_strided_slice %152 {offsets = [0, 1], sizes = [16, 1], strides = [1, 1]} : vector<16x3xf32> to vector<16x1xf32>
    %645 = vector.broadcast %643 : vector<16x1xf32> to vector<16x128xf32>
    %646 = arith.mulf %645, %637 : vector<16x128xf32>
    %647 = vector.broadcast %644 : vector<16x1xf32> to vector<16x128xf32>
    %648 = arith.mulf %647, %642 : vector<16x128xf32>
    %649 = arith.subf %646, %648 : vector<16x128xf32>
    %650 = vector.broadcast %644 : vector<16x1xf32> to vector<16x128xf32>
    %651 = arith.mulf %650, %637 : vector<16x128xf32>
    %652 = vector.broadcast %643 : vector<16x1xf32> to vector<16x128xf32>
    %653 = arith.mulf %652, %642 : vector<16x128xf32>
    %654 = arith.addf %651, %653 : vector<16x128xf32>
    %655 = vector.extract_strided_slice %50 {offsets = [0, 0], sizes = [1, 128], strides = [1, 1]} : vector<4x128xf32> to vector<1x128xf32>
    %656 = vector.extract_strided_slice %53 {offsets = [0, 0], sizes = [1, 128], strides = [1, 1]} : vector<4x128xf32> to vector<1x128xf32>
    %657 = vector.extract_strided_slice %649 {offsets = [8, 0], sizes = [8, 128], strides = [1, 1]} : vector<16x128xf32> to vector<8x128xf32>
    %658 = vector.extract_strided_slice %649 {offsets = [0, 0], sizes = [8, 128], strides = [1, 1]} : vector<16x128xf32> to vector<8x128xf32>
    %659 = tpu.concatenate %657, %658 in 0 : vector<8x128xf32>, vector<8x128xf32> -> vector<16x128xf32>
    %660 = vector.extract_strided_slice %654 {offsets = [8, 0], sizes = [8, 128], strides = [1, 1]} : vector<16x128xf32> to vector<8x128xf32>
    %661 = vector.extract_strided_slice %654 {offsets = [0, 0], sizes = [8, 128], strides = [1, 1]} : vector<16x128xf32> to vector<8x128xf32>
    %662 = tpu.concatenate %660, %661 in 0 : vector<8x128xf32>, vector<8x128xf32> -> vector<16x128xf32>
    %663 = vector.broadcast %655 : vector<1x128xf32> to vector<16x128xf32>
    %664 = arith.mulf %663, %649 : vector<16x128xf32>
    %665 = vector.broadcast %656 : vector<1x128xf32> to vector<16x128xf32>
    %666 = arith.mulf %665, %662 : vector<16x128xf32>
    %667 = arith.addf %664, %666 : vector<16x128xf32>
    %668 = vector.broadcast %655 : vector<1x128xf32> to vector<16x128xf32>
    %669 = arith.mulf %668, %654 : vector<16x128xf32>
    %670 = vector.broadcast %656 : vector<1x128xf32> to vector<16x128xf32>
    %671 = arith.mulf %670, %659 : vector<16x128xf32>
    %672 = arith.subf %669, %671 : vector<16x128xf32>
    %673 = vector.extract_strided_slice %50 {offsets = [1, 0], sizes = [1, 128], strides = [1, 1]} : vector<4x128xf32> to vector<1x128xf32>
    %674 = vector.extract_strided_slice %53 {offsets = [1, 0], sizes = [1, 128], strides = [1, 1]} : vector<4x128xf32> to vector<1x128xf32>
    %675 = vector.extract_strided_slice %667 {offsets = [4, 0], sizes = [12, 128], strides = [1, 1]} : vector<16x128xf32> to vector<12x128xf32>
    %676 = vector.extract_strided_slice %667 {offsets = [0, 0], sizes = [4, 128], strides = [1, 1]} : vector<16x128xf32> to vector<4x128xf32>
    %677 = tpu.concatenate %675, %676 in 0 : vector<12x128xf32>, vector<4x128xf32> -> vector<16x128xf32>
    %678 = vector.extract_strided_slice %667 {offsets = [12, 0], sizes = [4, 128], strides = [1, 1]} : vector<16x128xf32> to vector<4x128xf32>
    %679 = vector.extract_strided_slice %667 {offsets = [0, 0], sizes = [12, 128], strides = [1, 1]} : vector<16x128xf32> to vector<12x128xf32>
    %680 = tpu.concatenate %678, %679 in 0 : vector<4x128xf32>, vector<12x128xf32> -> vector<16x128xf32>
    %681 = arith.subf %680, %677 : vector<16x128xf32>
    %682 = vector.broadcast %72 : vector<16x1xf32> to vector<16x128xf32>
    %683 = arith.mulf %682, %681 : vector<16x128xf32>
    %684 = arith.addf %677, %683 : vector<16x128xf32>
    %685 = vector.extract_strided_slice %672 {offsets = [4, 0], sizes = [12, 128], strides = [1, 1]} : vector<16x128xf32> to vector<12x128xf32>
    %686 = vector.extract_strided_slice %672 {offsets = [0, 0], sizes = [4, 128], strides = [1, 1]} : vector<16x128xf32> to vector<4x128xf32>
    %687 = tpu.concatenate %685, %686 in 0 : vector<12x128xf32>, vector<4x128xf32> -> vector<16x128xf32>
    %688 = vector.extract_strided_slice %672 {offsets = [12, 0], sizes = [4, 128], strides = [1, 1]} : vector<16x128xf32> to vector<4x128xf32>
    %689 = vector.extract_strided_slice %672 {offsets = [0, 0], sizes = [12, 128], strides = [1, 1]} : vector<16x128xf32> to vector<12x128xf32>
    %690 = tpu.concatenate %688, %689 in 0 : vector<4x128xf32>, vector<12x128xf32> -> vector<16x128xf32>
    %691 = arith.subf %690, %687 : vector<16x128xf32>
    %692 = vector.broadcast %72 : vector<16x1xf32> to vector<16x128xf32>
    %693 = arith.mulf %692, %691 : vector<16x128xf32>
    %694 = arith.addf %687, %693 : vector<16x128xf32>
    %695 = vector.broadcast %673 : vector<1x128xf32> to vector<16x128xf32>
    %696 = arith.mulf %695, %667 : vector<16x128xf32>
    %697 = vector.broadcast %674 : vector<1x128xf32> to vector<16x128xf32>
    %698 = arith.mulf %697, %694 : vector<16x128xf32>
    %699 = arith.addf %696, %698 : vector<16x128xf32>
    %700 = vector.broadcast %673 : vector<1x128xf32> to vector<16x128xf32>
    %701 = arith.mulf %700, %672 : vector<16x128xf32>
    %702 = vector.broadcast %674 : vector<1x128xf32> to vector<16x128xf32>
    %703 = arith.mulf %702, %684 : vector<16x128xf32>
    %704 = arith.subf %701, %703 : vector<16x128xf32>
    %705 = vector.extract_strided_slice %50 {offsets = [2, 0], sizes = [1, 128], strides = [1, 1]} : vector<4x128xf32> to vector<1x128xf32>
    %706 = vector.extract_strided_slice %53 {offsets = [2, 0], sizes = [1, 128], strides = [1, 1]} : vector<4x128xf32> to vector<1x128xf32>
    %707 = vector.extract_strided_slice %699 {offsets = [2, 0], sizes = [14, 128], strides = [1, 1]} : vector<16x128xf32> to vector<14x128xf32>
    %708 = vector.extract_strided_slice %699 {offsets = [0, 0], sizes = [2, 128], strides = [1, 1]} : vector<16x128xf32> to vector<2x128xf32>
    %709 = tpu.concatenate %707, %708 in 0 : vector<14x128xf32>, vector<2x128xf32> -> vector<16x128xf32>
    %710 = vector.extract_strided_slice %699 {offsets = [14, 0], sizes = [2, 128], strides = [1, 1]} : vector<16x128xf32> to vector<2x128xf32>
    %711 = vector.extract_strided_slice %699 {offsets = [0, 0], sizes = [14, 128], strides = [1, 1]} : vector<16x128xf32> to vector<14x128xf32>
    %712 = tpu.concatenate %710, %711 in 0 : vector<2x128xf32>, vector<14x128xf32> -> vector<16x128xf32>
    %713 = arith.subf %712, %709 : vector<16x128xf32>
    %714 = vector.broadcast %77 : vector<16x1xf32> to vector<16x128xf32>
    %715 = arith.mulf %714, %713 : vector<16x128xf32>
    %716 = arith.addf %709, %715 : vector<16x128xf32>
    %717 = vector.extract_strided_slice %704 {offsets = [2, 0], sizes = [14, 128], strides = [1, 1]} : vector<16x128xf32> to vector<14x128xf32>
    %718 = vector.extract_strided_slice %704 {offsets = [0, 0], sizes = [2, 128], strides = [1, 1]} : vector<16x128xf32> to vector<2x128xf32>
    %719 = tpu.concatenate %717, %718 in 0 : vector<14x128xf32>, vector<2x128xf32> -> vector<16x128xf32>
    %720 = vector.extract_strided_slice %704 {offsets = [14, 0], sizes = [2, 128], strides = [1, 1]} : vector<16x128xf32> to vector<2x128xf32>
    %721 = vector.extract_strided_slice %704 {offsets = [0, 0], sizes = [14, 128], strides = [1, 1]} : vector<16x128xf32> to vector<14x128xf32>
    %722 = tpu.concatenate %720, %721 in 0 : vector<2x128xf32>, vector<14x128xf32> -> vector<16x128xf32>
    %723 = arith.subf %722, %719 : vector<16x128xf32>
    %724 = vector.broadcast %77 : vector<16x1xf32> to vector<16x128xf32>
    %725 = arith.mulf %724, %723 : vector<16x128xf32>
    %726 = arith.addf %719, %725 : vector<16x128xf32>
    %727 = vector.broadcast %705 : vector<1x128xf32> to vector<16x128xf32>
    %728 = arith.mulf %727, %699 : vector<16x128xf32>
    %729 = vector.broadcast %706 : vector<1x128xf32> to vector<16x128xf32>
    %730 = arith.mulf %729, %726 : vector<16x128xf32>
    %731 = arith.addf %728, %730 : vector<16x128xf32>
    %732 = vector.broadcast %705 : vector<1x128xf32> to vector<16x128xf32>
    %733 = arith.mulf %732, %704 : vector<16x128xf32>
    %734 = vector.broadcast %706 : vector<1x128xf32> to vector<16x128xf32>
    %735 = arith.mulf %734, %716 : vector<16x128xf32>
    %736 = arith.subf %733, %735 : vector<16x128xf32>
    %737 = vector.extract_strided_slice %50 {offsets = [3, 0], sizes = [1, 128], strides = [1, 1]} : vector<4x128xf32> to vector<1x128xf32>
    %738 = vector.extract_strided_slice %53 {offsets = [3, 0], sizes = [1, 128], strides = [1, 1]} : vector<4x128xf32> to vector<1x128xf32>
    %739 = vector.extract_strided_slice %731 {offsets = [1, 0], sizes = [15, 128], strides = [1, 1]} : vector<16x128xf32> to vector<15x128xf32>
    %740 = vector.extract_strided_slice %731 {offsets = [0, 0], sizes = [1, 128], strides = [1, 1]} : vector<16x128xf32> to vector<1x128xf32>
    %741 = tpu.concatenate %739, %740 in 0 : vector<15x128xf32>, vector<1x128xf32> -> vector<16x128xf32>
    %742 = vector.extract_strided_slice %731 {offsets = [15, 0], sizes = [1, 128], strides = [1, 1]} : vector<16x128xf32> to vector<1x128xf32>
    %743 = vector.extract_strided_slice %731 {offsets = [0, 0], sizes = [15, 128], strides = [1, 1]} : vector<16x128xf32> to vector<15x128xf32>
    %744 = tpu.concatenate %742, %743 in 0 : vector<1x128xf32>, vector<15x128xf32> -> vector<16x128xf32>
    %745 = arith.subf %744, %741 : vector<16x128xf32>
    %746 = vector.broadcast %82 : vector<16x1xf32> to vector<16x128xf32>
    %747 = arith.mulf %746, %745 : vector<16x128xf32>
    %748 = arith.addf %741, %747 : vector<16x128xf32>
    %749 = vector.extract_strided_slice %736 {offsets = [1, 0], sizes = [15, 128], strides = [1, 1]} : vector<16x128xf32> to vector<15x128xf32>
    %750 = vector.extract_strided_slice %736 {offsets = [0, 0], sizes = [1, 128], strides = [1, 1]} : vector<16x128xf32> to vector<1x128xf32>
    %751 = tpu.concatenate %749, %750 in 0 : vector<15x128xf32>, vector<1x128xf32> -> vector<16x128xf32>
    %752 = vector.extract_strided_slice %736 {offsets = [15, 0], sizes = [1, 128], strides = [1, 1]} : vector<16x128xf32> to vector<1x128xf32>
    %753 = vector.extract_strided_slice %736 {offsets = [0, 0], sizes = [15, 128], strides = [1, 1]} : vector<16x128xf32> to vector<15x128xf32>
    %754 = tpu.concatenate %752, %753 in 0 : vector<1x128xf32>, vector<15x128xf32> -> vector<16x128xf32>
    %755 = arith.subf %754, %751 : vector<16x128xf32>
    %756 = vector.broadcast %82 : vector<16x1xf32> to vector<16x128xf32>
    %757 = arith.mulf %756, %755 : vector<16x128xf32>
    %758 = arith.addf %751, %757 : vector<16x128xf32>
    %759 = vector.broadcast %737 : vector<1x128xf32> to vector<16x128xf32>
    %760 = arith.mulf %759, %731 : vector<16x128xf32>
    %761 = vector.broadcast %738 : vector<1x128xf32> to vector<16x128xf32>
    %762 = arith.mulf %761, %758 : vector<16x128xf32>
    %763 = arith.addf %760, %762 : vector<16x128xf32>
    %764 = vector.broadcast %737 : vector<1x128xf32> to vector<16x128xf32>
    %765 = arith.mulf %764, %736 : vector<16x128xf32>
    %766 = vector.broadcast %738 : vector<1x128xf32> to vector<16x128xf32>
    %767 = arith.mulf %766, %748 : vector<16x128xf32>
    %768 = arith.subf %765, %767 : vector<16x128xf32>
    %769 = vector.extract_strided_slice %57 {offsets = [2, 0], sizes = [1, 1], strides = [1, 1]} : vector<3x4xf32> to vector<1x1xf32>
    %770 = vector.extract_strided_slice %61 {offsets = [2, 0], sizes = [1, 1], strides = [1, 1]} : vector<3x4xf32> to vector<1x1xf32>
    %771 = vector.broadcast %770 : vector<1x1xf32> to vector<16x1xf32>
    %772 = arith.mulf %771, %86 : vector<16x1xf32>
    %773 = vector.extract_strided_slice %763 {offsets = [8, 0], sizes = [8, 128], strides = [1, 1]} : vector<16x128xf32> to vector<8x128xf32>
    %774 = vector.extract_strided_slice %763 {offsets = [0, 0], sizes = [8, 128], strides = [1, 1]} : vector<16x128xf32> to vector<8x128xf32>
    %775 = tpu.concatenate %773, %774 in 0 : vector<8x128xf32>, vector<8x128xf32> -> vector<16x128xf32>
    %776 = vector.extract_strided_slice %768 {offsets = [8, 0], sizes = [8, 128], strides = [1, 1]} : vector<16x128xf32> to vector<8x128xf32>
    %777 = vector.extract_strided_slice %768 {offsets = [0, 0], sizes = [8, 128], strides = [1, 1]} : vector<16x128xf32> to vector<8x128xf32>
    %778 = tpu.concatenate %776, %777 in 0 : vector<8x128xf32>, vector<8x128xf32> -> vector<16x128xf32>
    %779 = vector.broadcast %769 : vector<1x1xf32> to vector<16x128xf32>
    %780 = arith.mulf %779, %763 : vector<16x128xf32>
    %781 = vector.broadcast %772 : vector<16x1xf32> to vector<16x128xf32>
    %782 = arith.mulf %781, %775 : vector<16x128xf32>
    %783 = arith.addf %780, %782 : vector<16x128xf32>
    %784 = vector.broadcast %769 : vector<1x1xf32> to vector<16x128xf32>
    %785 = arith.mulf %784, %768 : vector<16x128xf32>
    %786 = vector.broadcast %772 : vector<16x1xf32> to vector<16x128xf32>
    %787 = arith.mulf %786, %778 : vector<16x128xf32>
    %788 = arith.addf %785, %787 : vector<16x128xf32>
    %789 = vector.extract_strided_slice %57 {offsets = [2, 1], sizes = [1, 1], strides = [1, 1]} : vector<3x4xf32> to vector<1x1xf32>
    %790 = vector.extract_strided_slice %61 {offsets = [2, 1], sizes = [1, 1], strides = [1, 1]} : vector<3x4xf32> to vector<1x1xf32>
    %791 = vector.broadcast %790 : vector<1x1xf32> to vector<16x1xf32>
    %792 = arith.mulf %791, %90 : vector<16x1xf32>
    %793 = vector.extract_strided_slice %783 {offsets = [4, 0], sizes = [12, 128], strides = [1, 1]} : vector<16x128xf32> to vector<12x128xf32>
    %794 = vector.extract_strided_slice %783 {offsets = [0, 0], sizes = [4, 128], strides = [1, 1]} : vector<16x128xf32> to vector<4x128xf32>
    %795 = tpu.concatenate %793, %794 in 0 : vector<12x128xf32>, vector<4x128xf32> -> vector<16x128xf32>
    %796 = vector.extract_strided_slice %783 {offsets = [12, 0], sizes = [4, 128], strides = [1, 1]} : vector<16x128xf32> to vector<4x128xf32>
    %797 = vector.extract_strided_slice %783 {offsets = [0, 0], sizes = [12, 128], strides = [1, 1]} : vector<16x128xf32> to vector<12x128xf32>
    %798 = tpu.concatenate %796, %797 in 0 : vector<4x128xf32>, vector<12x128xf32> -> vector<16x128xf32>
    %799 = arith.subf %798, %795 : vector<16x128xf32>
    %800 = vector.broadcast %72 : vector<16x1xf32> to vector<16x128xf32>
    %801 = arith.mulf %800, %799 : vector<16x128xf32>
    %802 = arith.addf %795, %801 : vector<16x128xf32>
    %803 = vector.extract_strided_slice %788 {offsets = [4, 0], sizes = [12, 128], strides = [1, 1]} : vector<16x128xf32> to vector<12x128xf32>
    %804 = vector.extract_strided_slice %788 {offsets = [0, 0], sizes = [4, 128], strides = [1, 1]} : vector<16x128xf32> to vector<4x128xf32>
    %805 = tpu.concatenate %803, %804 in 0 : vector<12x128xf32>, vector<4x128xf32> -> vector<16x128xf32>
    %806 = vector.extract_strided_slice %788 {offsets = [12, 0], sizes = [4, 128], strides = [1, 1]} : vector<16x128xf32> to vector<4x128xf32>
    %807 = vector.extract_strided_slice %788 {offsets = [0, 0], sizes = [12, 128], strides = [1, 1]} : vector<16x128xf32> to vector<12x128xf32>
    %808 = tpu.concatenate %806, %807 in 0 : vector<4x128xf32>, vector<12x128xf32> -> vector<16x128xf32>
    %809 = arith.subf %808, %805 : vector<16x128xf32>
    %810 = vector.broadcast %72 : vector<16x1xf32> to vector<16x128xf32>
    %811 = arith.mulf %810, %809 : vector<16x128xf32>
    %812 = arith.addf %805, %811 : vector<16x128xf32>
    %813 = vector.broadcast %789 : vector<1x1xf32> to vector<16x128xf32>
    %814 = arith.mulf %813, %783 : vector<16x128xf32>
    %815 = vector.broadcast %792 : vector<16x1xf32> to vector<16x128xf32>
    %816 = arith.mulf %815, %802 : vector<16x128xf32>
    %817 = arith.addf %814, %816 : vector<16x128xf32>
    %818 = vector.broadcast %789 : vector<1x1xf32> to vector<16x128xf32>
    %819 = arith.mulf %818, %788 : vector<16x128xf32>
    %820 = vector.broadcast %792 : vector<16x1xf32> to vector<16x128xf32>
    %821 = arith.mulf %820, %812 : vector<16x128xf32>
    %822 = arith.addf %819, %821 : vector<16x128xf32>
    %823 = vector.extract_strided_slice %57 {offsets = [2, 2], sizes = [1, 1], strides = [1, 1]} : vector<3x4xf32> to vector<1x1xf32>
    %824 = vector.extract_strided_slice %61 {offsets = [2, 2], sizes = [1, 1], strides = [1, 1]} : vector<3x4xf32> to vector<1x1xf32>
    %825 = vector.broadcast %824 : vector<1x1xf32> to vector<16x1xf32>
    %826 = arith.mulf %825, %94 : vector<16x1xf32>
    %827 = vector.extract_strided_slice %817 {offsets = [2, 0], sizes = [14, 128], strides = [1, 1]} : vector<16x128xf32> to vector<14x128xf32>
    %828 = vector.extract_strided_slice %817 {offsets = [0, 0], sizes = [2, 128], strides = [1, 1]} : vector<16x128xf32> to vector<2x128xf32>
    %829 = tpu.concatenate %827, %828 in 0 : vector<14x128xf32>, vector<2x128xf32> -> vector<16x128xf32>
    %830 = vector.extract_strided_slice %817 {offsets = [14, 0], sizes = [2, 128], strides = [1, 1]} : vector<16x128xf32> to vector<2x128xf32>
    %831 = vector.extract_strided_slice %817 {offsets = [0, 0], sizes = [14, 128], strides = [1, 1]} : vector<16x128xf32> to vector<14x128xf32>
    %832 = tpu.concatenate %830, %831 in 0 : vector<2x128xf32>, vector<14x128xf32> -> vector<16x128xf32>
    %833 = arith.subf %832, %829 : vector<16x128xf32>
    %834 = vector.broadcast %77 : vector<16x1xf32> to vector<16x128xf32>
    %835 = arith.mulf %834, %833 : vector<16x128xf32>
    %836 = arith.addf %829, %835 : vector<16x128xf32>
    %837 = vector.extract_strided_slice %822 {offsets = [2, 0], sizes = [14, 128], strides = [1, 1]} : vector<16x128xf32> to vector<14x128xf32>
    %838 = vector.extract_strided_slice %822 {offsets = [0, 0], sizes = [2, 128], strides = [1, 1]} : vector<16x128xf32> to vector<2x128xf32>
    %839 = tpu.concatenate %837, %838 in 0 : vector<14x128xf32>, vector<2x128xf32> -> vector<16x128xf32>
    %840 = vector.extract_strided_slice %822 {offsets = [14, 0], sizes = [2, 128], strides = [1, 1]} : vector<16x128xf32> to vector<2x128xf32>
    %841 = vector.extract_strided_slice %822 {offsets = [0, 0], sizes = [14, 128], strides = [1, 1]} : vector<16x128xf32> to vector<14x128xf32>
    %842 = tpu.concatenate %840, %841 in 0 : vector<2x128xf32>, vector<14x128xf32> -> vector<16x128xf32>
    %843 = arith.subf %842, %839 : vector<16x128xf32>
    %844 = vector.broadcast %77 : vector<16x1xf32> to vector<16x128xf32>
    %845 = arith.mulf %844, %843 : vector<16x128xf32>
    %846 = arith.addf %839, %845 : vector<16x128xf32>
    %847 = vector.broadcast %823 : vector<1x1xf32> to vector<16x128xf32>
    %848 = arith.mulf %847, %817 : vector<16x128xf32>
    %849 = vector.broadcast %826 : vector<16x1xf32> to vector<16x128xf32>
    %850 = arith.mulf %849, %836 : vector<16x128xf32>
    %851 = arith.addf %848, %850 : vector<16x128xf32>
    %852 = vector.broadcast %823 : vector<1x1xf32> to vector<16x128xf32>
    %853 = arith.mulf %852, %822 : vector<16x128xf32>
    %854 = vector.broadcast %826 : vector<16x1xf32> to vector<16x128xf32>
    %855 = arith.mulf %854, %846 : vector<16x128xf32>
    %856 = arith.addf %853, %855 : vector<16x128xf32>
    %857 = vector.extract_strided_slice %57 {offsets = [2, 3], sizes = [1, 1], strides = [1, 1]} : vector<3x4xf32> to vector<1x1xf32>
    %858 = vector.extract_strided_slice %61 {offsets = [2, 3], sizes = [1, 1], strides = [1, 1]} : vector<3x4xf32> to vector<1x1xf32>
    %859 = vector.broadcast %858 : vector<1x1xf32> to vector<16x1xf32>
    %860 = arith.mulf %859, %98 : vector<16x1xf32>
    %861 = vector.extract_strided_slice %851 {offsets = [1, 0], sizes = [15, 128], strides = [1, 1]} : vector<16x128xf32> to vector<15x128xf32>
    %862 = vector.extract_strided_slice %851 {offsets = [0, 0], sizes = [1, 128], strides = [1, 1]} : vector<16x128xf32> to vector<1x128xf32>
    %863 = tpu.concatenate %861, %862 in 0 : vector<15x128xf32>, vector<1x128xf32> -> vector<16x128xf32>
    %864 = vector.extract_strided_slice %851 {offsets = [15, 0], sizes = [1, 128], strides = [1, 1]} : vector<16x128xf32> to vector<1x128xf32>
    %865 = vector.extract_strided_slice %851 {offsets = [0, 0], sizes = [15, 128], strides = [1, 1]} : vector<16x128xf32> to vector<15x128xf32>
    %866 = tpu.concatenate %864, %865 in 0 : vector<1x128xf32>, vector<15x128xf32> -> vector<16x128xf32>
    %867 = arith.subf %866, %863 : vector<16x128xf32>
    %868 = vector.broadcast %82 : vector<16x1xf32> to vector<16x128xf32>
    %869 = arith.mulf %868, %867 : vector<16x128xf32>
    %870 = arith.addf %863, %869 : vector<16x128xf32>
    %871 = vector.extract_strided_slice %856 {offsets = [1, 0], sizes = [15, 128], strides = [1, 1]} : vector<16x128xf32> to vector<15x128xf32>
    %872 = vector.extract_strided_slice %856 {offsets = [0, 0], sizes = [1, 128], strides = [1, 1]} : vector<16x128xf32> to vector<1x128xf32>
    %873 = tpu.concatenate %871, %872 in 0 : vector<15x128xf32>, vector<1x128xf32> -> vector<16x128xf32>
    %874 = vector.extract_strided_slice %856 {offsets = [15, 0], sizes = [1, 128], strides = [1, 1]} : vector<16x128xf32> to vector<1x128xf32>
    %875 = vector.extract_strided_slice %856 {offsets = [0, 0], sizes = [15, 128], strides = [1, 1]} : vector<16x128xf32> to vector<15x128xf32>
    %876 = tpu.concatenate %874, %875 in 0 : vector<1x128xf32>, vector<15x128xf32> -> vector<16x128xf32>
    %877 = arith.subf %876, %873 : vector<16x128xf32>
    %878 = vector.broadcast %82 : vector<16x1xf32> to vector<16x128xf32>
    %879 = arith.mulf %878, %877 : vector<16x128xf32>
    %880 = arith.addf %873, %879 : vector<16x128xf32>
    %881 = vector.broadcast %857 : vector<1x1xf32> to vector<16x128xf32>
    %882 = arith.mulf %881, %851 : vector<16x128xf32>
    %883 = vector.broadcast %860 : vector<16x1xf32> to vector<16x128xf32>
    %884 = arith.mulf %883, %870 : vector<16x128xf32>
    %885 = arith.addf %882, %884 : vector<16x128xf32>
    %886 = vector.broadcast %857 : vector<1x1xf32> to vector<16x128xf32>
    %887 = arith.mulf %886, %856 : vector<16x128xf32>
    %888 = vector.broadcast %860 : vector<16x1xf32> to vector<16x128xf32>
    %889 = arith.mulf %888, %880 : vector<16x128xf32>
    %890 = arith.addf %887, %889 : vector<16x128xf32>
    %891 = vector.extract_strided_slice %149 {offsets = [0, 2], sizes = [16, 1], strides = [1, 1]} : vector<16x3xf32> to vector<16x1xf32>
    %892 = vector.extract_strided_slice %152 {offsets = [0, 2], sizes = [16, 1], strides = [1, 1]} : vector<16x3xf32> to vector<16x1xf32>
    %893 = vector.broadcast %891 : vector<16x1xf32> to vector<16x128xf32>
    %894 = arith.mulf %893, %885 : vector<16x128xf32>
    %895 = vector.broadcast %892 : vector<16x1xf32> to vector<16x128xf32>
    %896 = arith.mulf %895, %890 : vector<16x128xf32>
    %897 = arith.subf %894, %896 : vector<16x128xf32>
    %898 = vector.broadcast %892 : vector<16x1xf32> to vector<16x128xf32>
    %899 = arith.mulf %898, %885 : vector<16x128xf32>
    %900 = vector.broadcast %891 : vector<16x1xf32> to vector<16x128xf32>
    %901 = arith.mulf %900, %890 : vector<16x128xf32>
    %902 = arith.addf %899, %901 : vector<16x128xf32>
    %903 = arith.mulf %897, %897 : vector<16x128xf32>
    %904 = arith.mulf %902, %902 : vector<16x128xf32>
    %905 = arith.addf %903, %904 : vector<16x128xf32>
    %906 = arith.mulf %86, %90 : vector<16x1xf32>
    %907 = vector.broadcast %906 : vector<16x1xf32> to vector<16x128xf32>
    %908 = arith.mulf %905, %907 : vector<16x128xf32>
    %cst_57 = arith.constant dense<0.000000e+00> : vector<128xf32>
    %909 = vector.multi_reduction <add>, %908, %cst_57 [0] : vector<16x128xf32> to vector<128xf32>
    %910 = vector.shape_cast %909 : vector<128xf32> to vector<1x128xf32>
    %911 = arith.mulf %94, %98 : vector<16x1xf32>
    %912 = vector.broadcast %911 : vector<16x1xf32> to vector<16x128xf32>
    %913 = arith.mulf %905, %912 : vector<16x128xf32>
    %cst_58 = arith.constant dense<0.000000e+00> : vector<128xf32>
    %914 = vector.multi_reduction <add>, %913, %cst_58 [0] : vector<16x128xf32> to vector<128xf32>
    %915 = vector.shape_cast %914 : vector<128xf32> to vector<1x128xf32>
    %cst_59 = arith.constant 1.000000e+00 : f32
    %916 = vector.broadcast %cst_59 : f32 to vector<1x128xf32>
    %917 = arith.addf %916, %910 : vector<1x128xf32>
    %cst_60 = arith.constant 5.000000e-01 : f32
    %918 = vector.broadcast %cst_60 : f32 to vector<1x128xf32>
    %919 = arith.mulf %917, %918 : vector<1x128xf32>
    %c0_61 = arith.constant 0 : index
    %c0_62 = arith.constant 0 : index
    %920 = vector.load %arg3[%c0_61, %c0_62] : memref<2x1xf32, #tpu.memory_space<vmem>>, vector<1x1xf32>
    %921 = vector.broadcast %920 : vector<1x1xf32> to vector<1x128xf32>
    %922 = arith.mulf %919, %921 : vector<1x128xf32>
    %cst_63 = arith.constant 1.000000e+00 : f32
    %923 = vector.broadcast %cst_63 : f32 to vector<1x128xf32>
    %924 = arith.addf %923, %915 : vector<1x128xf32>
    %cst_64 = arith.constant 5.000000e-01 : f32
    %925 = vector.broadcast %cst_64 : f32 to vector<1x128xf32>
    %926 = arith.mulf %924, %925 : vector<1x128xf32>
    %c1_65 = arith.constant 1 : index
    %c0_66 = arith.constant 0 : index
    %927 = vector.load %arg3[%c1_65, %c0_66] : memref<2x1xf32, #tpu.memory_space<vmem>>, vector<1x1xf32>
    %928 = vector.broadcast %927 : vector<1x1xf32> to vector<1x128xf32>
    %929 = arith.mulf %926, %928 : vector<1x128xf32>
    %930 = tpu.concatenate %922, %929 in 0 : vector<1x128xf32>, vector<1x128xf32> -> vector<2x128xf32>
    %c0_67 = arith.constant 0 : index
    %c0_68 = arith.constant 0 : index
    %931 = vector.load %arg6[%c0_67, %c0_68] : memref<2x128xf32, #tpu.memory_space<vmem>>, vector<2x128xf32>
    tpu.vector_store %arg6[%c0_67, %c0_68], %930 {strides = array<i32>} : memref<2x128xf32, #tpu.memory_space<vmem>>, vector<2x128xf32>,
    return
  }
  func.func @transform_0(%arg0: i32) -> (i32, i32) {
    %c0_i32 = arith.constant 0 : i32
    %c0_i32_0 = arith.constant 0 : i32
    return %c0_i32, %arg0 : i32, i32
  }
  func.func @transform_1(%arg0: i32) -> (i32, i32) {
    %c0_i32 = arith.constant 0 : i32
    %c0_i32_0 = arith.constant 0 : i32
    %c0_i32_1 = arith.constant 0 : i32
    return %c0_i32, %c0_i32_0 : i32, i32
  }
  func.func @transform_2(%arg0: i32) -> (i32, i32) {
    %c0_i32 = arith.constant 0 : i32
    %c0_i32_0 = arith.constant 0 : i32
    %c0_i32_1 = arith.constant 0 : i32
    return %c0_i32, %c0_i32_0 : i32, i32
  }
  func.func @transform_3(%arg0: i32) -> (i32, i32) {
    %c0_i32 = arith.constant 0 : i32
    %c0_i32_0 = arith.constant 0 : i32
    %c0_i32_1 = arith.constant 0 : i32
    return %c0_i32, %c0_i32_0 : i32, i32
  }
  func.func @transform_4(%arg0: i32) -> (i32, i32) {
    %c0_i32 = arith.constant 0 : i32
    %c0_i32_0 = arith.constant 0 : i32
    %c0_i32_1 = arith.constant 0 : i32
    return %c0_i32, %c0_i32_0 : i32, i32
  }
  func.func @transform_5(%arg0: i32) -> (i32, i32) {
    %c0_i32 = arith.constant 0 : i32
    %c0_i32_0 = arith.constant 0 : i32
    return %c0_i32, %arg0 : i32, i32
  }
}

</mosaic_0001>

<bundles_post_ra>
// kernel: tpu_custom_call.1
= control target key start
LH: loop header
LB: loop body
LE: loop exit
PB: predicated region body
PF: predicated region fallthrough
CT: control target
= control target key end

     0   :  { %v476_v1 = vlaneseq  ;;  %v3613_v2 = vmov 0   ;;  %s3607_s0 = inlined_call_operand.vmem [shape: f32[4,128], index: 0, kind: input, shape index: {}]   ;;  %s3608_s1 = inlined_call_operand.vmem [shape: f32[4,1], index: 1, kind: input, shape index: {}]   ;;  %s3609_s2 = inlined_call_operand.vmem [shape: f32[2,1], index: 2, kind: input, shape index: {}]   ;;  %s3610_s3 = inlined_call_operand.vmem [shape: f32[3,4], index: 3, kind: input, shape index: {}]   ;;  %s3611_s4 = inlined_call_operand.vmem [shape: f32[4,3], index: 4, kind: input, shape index: {}]   ;;  %s3612_s5 = inlined_call_operand.hbm [shape: f32[2,128], index: 5, kind: output, shape index: {}]  }
   0x1   :  { %v22_v0 = vld [vmem:[%s3608_s1] sm:$0xf]  ;;  %2503 = vset.pattern.permute.xlu0 %v3613_v2  ;;  %2504 = vset.pattern.permute.xlu1 %v3613_v2 }
   0x2   :  { %25 = vperm.xlu0 %2503, %v22_v0   ;;  %v267_v3 = vld [vmem:[%s3610_s3] sm:$0x7]  ;;  %v2629_v5 = vshrl.u32 %v476_v1, 7 }
   0x3   :  { %v2627_v4 = vmul.f32 0.5, %v267_v3 }
   0x4   :  { %v485_v8 = vshra.s32 %v2629_v5, 2  ;;  %v491_v12 = vshra.s32 %v2629_v5, 1  ;;  %v479_v13 = vshra.s32 %v2629_v5, 3  ;;  %v478_v14 = vadd.s32 8, %v2629_v5 }
   0x5   :  { %v269_v6 = vand.u32 2147483647, %v2627_v4  ;;  %v272_v7 = vand.u32 2139095040, %v2627_v4 }
   0x6   :  { %v487_v11 = vand.u32 1, %v485_v8 }
   0x7   :  { %v273_v9 = vshrl.u32 %v272_v7, 23  ;;  %v276_v10 = vand.u32 8388607, %v269_v6 }
   0x8   :  { %10 = vsyncpa [#allocation3], 0  ;;  %v2639_v17 = vcvt.s32.f32 %v487_v11  ;;  %v2641_v18 = vand.u32 1, %v479_v13  ;;  %v486_v19 = vshra.s32 %v478_v14, 2  ;;  %v480_v20 = vshra.s32 %v478_v14, 3  ;;  %s2580_s28 = smov 126  }
   0x9   :  { %v2409_v15 = vadd.s32 4294967169, %v273_v9  ;;  %v277_v16 = vor.u32 8388608, %v276_v10  ;;  %v492_v22 = vshra.s32 %v478_v14, 1  ;;  %v498_v23 = vand.u32 1, %v478_v14  ;;  %s2581_s29 = smov 125   ;;  %s2588_s21 = smov [#allocation2]  }
   0xa   :  { %v3616_v24 = vcvt.s32.f32 %v2641_v18  ;;  %v488_v25 = vand.u32 1, %v486_v19  ;;  %v2644_v26 = vand.u32 1, %v480_v20  ;;  %v493_v27 = vand.u32 1, %v491_v12  ;;  %s2390_s1 = sshll.u32 %s2588_s21, 4  ;;  %s2391_s1 = int_to_ptr.vmem [resolvable:$true] %s2390_s1 }
   0xb   :  { %v279_v21 = vadd.s32 1, %v2409_v15  ;;  %v2646_v28 = vshll.u32 %v277_v16, 8  ;;  %v494_v29 = vand.u32 1, %v492_v22  ;;  %v2649_v30 = vmul.f32 2.0, %v2639_v17  ;;  %s2550_s3 = scalar_lea.vmem %s2391_s1, 32  ;;  %p2555_p1 = scmp.lt.s32.totalorder %s2391_s1, %s2391_s1 }
   0xc   :  { %v2653_v32 = vmul.f32 2.0, %v3616_v24  ;;  %v2655_v33 = vcvt.s32.f32 %v488_v25  ;;  %v3617_v34 = vcvt.s32.f32 %v2644_v26  ;;  %v2660_v38 = vcvt.s32.f32 %v498_v23  ;;  %v2425_v23 = vld [vmem:[%s3611_s4] ss:$0 sm:$0xff]  ;;  %p2551_p0 = scmp.ne.s32.totalorder %s2391_s1, %s2550_s3  ;;  %p2556_p2 = scmp.lt.s32.totalorder %s2550_s3, %s2550_s3 }
   0xd   :  { %vm280_vm0 = vcmp.gt.s32.totalorder %v279_v21, 0  ;;  %v2658_v37 = vcvt.s32.f32 %v494_v29  ;;  %v2672_v42 = vcvt.s32.f32 %v493_v27  ;;  %v2573_v44 = vmov 683565275  }
   0xe   :  { %v281_v31 = vsel %vm280_vm0, %v279_v21, 0  ;;  %v2663_v39 = vadd.f32 -1.0, %v2653_v32  ;;  %v2667_v40 = vmul.f32 2.0, %v3617_v34  ;;  %v2670_v41 = vmul.f32 2.0, %v2655_v33  ;;  %p2557_p3 = por %p2556_p2, %p2555_p1 }
   0xf   :  { %v282_v35 = vshrl.u32 %v281_v31, 5  ;;  %v283_v36 = vand.u32 31, %v281_v31  ;;  %v3618_v46 = vmov 2475754826   ;;  %v2575_v48 = vmov 2131351028  }
  0x10   :  { %3628 = vst [vmem:[#allocation5_spill] sm:$0xff] %v2663_v39  ;;  %v3620_v50 = vmov 2102212464   ;;  %v2577_v52 = vmov 920167782   ;;  %v2680_v54 = vadd.f32 -1.0, %v2649_v30  ;;  %p2558_p4 = pnand %p2557_p3, %p2551_p0 }
  0x11   :  { %v284_v43 = vsub.s32 32, %v283_v36  ;;  %v286_v45 = vshll.u32 %v2573_v44, %v283_v36  ;;  %v289_v47 = vshll.u32 %v3618_v46, %v283_v36  ;;  %v292_v49 = vshll.u32 %v2575_v48, %v283_v36 }
  0x12   :  { %v295_v51 = vshll.u32 %v3620_v50, %v283_v36  ;;  %v298_v53 = vshll.u32 %v2577_v52, %v283_v36  ;;  %vm301_vm1 = vcmp.lt.s32.totalorder %v282_v35, 1  ;;  %3629 = vst [vmem:[#allocation6_spill] sm:$0xff] %v2680_v54  ;;  %v2578_v60 = vmov 1326507024   ;;  %v2426_v36 = vld [vmem:[%s3611_s4 + $0x1] ss:$0 sm:$0xff] }
  0x13   :  { %v285_v55 = vshrl.u32 %v2573_v44, %v284_v43  ;;  %v287_v56 = vshrl.u32 %v3618_v46, %v284_v43  ;;  %v290_v57 = vshrl.u32 %v2575_v48, %v284_v43  ;;  %v293_v58 = vshrl.u32 %v3620_v50, %v284_v43 }
  0x14   :  { %v296_v59 = vshrl.u32 %v2577_v52, %v284_v43  ;;  %v299_v61 = vshrl.u32 %v2578_v60, %v284_v43  ;;  %vm302_vm2 = vcmp.lt.s32.totalorder %v282_v35, 2  ;;  %vm303_vm3 = vcmp.lt.s32.totalorder %v282_v35, 3 }
  0x15   :  { %v288_v62 = vor.u32 %v287_v56, %v286_v45  ;;  %v291_v63 = vor.u32 %v290_v57, %v289_v47  ;;  %v294_v0 = vor.u32 %v293_v58, %v292_v49  ;;  %vm304_vm4 = vcmp.lt.s32.totalorder %v282_v35, 4  ;;  %v2427_v57 = vld [vmem:[%s3611_s4 + $0x2] ss:$0 sm:$0xff]  ;;  %v2428_v58 = vld [vmem:[%s3611_s4 + $0x3] ss:$0 sm:$0xff]  ;;  %s2579_s4 = smov 127  }
  0x16   :  { %v297_v1 = vor.u32 %v296_v59, %v295_v51  ;;  %v300_v3 = vor.u32 %v299_v61, %v298_v53  ;;  %v2689_v7 = vadd.f32 -1.0, %v2667_v40  ;;  %v2692_v8 = vmul.f32 2.0, %v2672_v42 }
  0x17   :  { %v305_v9 = vsel %vm301_vm1, %v285_v55, %v288_v62  ;;  %v306_v10 = vsel %vm304_vm4, %v294_v0, 2102212464  ;;  %v309_v11 = vsel %vm301_vm1, %v288_v62, %v291_v63  ;;  %v313_v12 = vsel %vm301_vm1, %v291_v63, %v294_v0 }
  0x18   :  { %v307_v13 = vsel %vm303_vm3, %v291_v63, %v306_v10  ;;  %v310_v14 = vsel %vm304_vm4, %v297_v1, 920167782  ;;  %v314_v15 = vsel %vm304_vm4, %v300_v3, 1326507024  ;;  %v2699_v16 = vadd.f32 -1.0, %v2670_v41 }
  0x19   :  { %v311_v19 = vsel %vm303_vm3, %v294_v0, %v310_v14  ;;  %v315_v20 = vsel %vm303_vm3, %v297_v1, %v314_v15  ;;  %v2704_v21 = vadd.f32 -1.0, %v2692_v8  ;;  %v497_v22 = vand.u32 1, %v2629_v5 }
  0x1a   :  { %v308_v25 = vsel %vm302_vm2, %v305_v9, %v307_v13  ;;  %v312_v27 = vsel %vm302_vm2, %v309_v11, %v311_v19  ;;  %v316_v29 = vsel %vm302_vm2, %v313_v12, %v315_v20  ;;  %v2714_v31 = vmul.f32 2.0, %v2660_v38 }
  0x1b   :  { %3630 = vst [vmem:[#allocation7_spill] sm:$0xff] %v2704_v21  ;;  %v2720_v43 = vmul.u32.u64.low %v2646_v28, %v316_v29  ;;  %v2721_v45 = vmul.u32.u64.high %v2646_v28, %v316_v29, %v2720_v43  ;;  %v2724_v47 = vmul.u32.u64.low %v2646_v28, %v312_v27  ;;  %v2725_v49 = vmul.u32.u64.high %v2646_v28, %v312_v27, %v2724_v47 }
  0x1c   :  { %v2727_v51 = vcvt.s32.f32 %v497_v22  ;;  %v2730_v35 = vadd.f32 -1.0, %v2714_v31  ;;  %v2733_v53 = vmul.f32 2.0, %v2658_v37  ;;  %v545_v55 = vmul.f32 %v2425_v23, %v2689_v7 }
  0x1d   :  { %v554_v56 = vmul.f32 %v2426_v36, %v2699_v16  ;;  %v544_v59 = vmul.f32 %v2425_v23, %v2663_v39  ;;  %v553_v61 = vmul.f32 %v2426_v36, %v2680_v54  ;;  %v324_v62 = vmul.u32 %v2646_v28, %v308_v25 }
  0x1e   :  { %3631 = vst [vmem:[#allocation8_spill] sm:$0xff] %v2730_v35  ;;  %v2747_v63 = vmul.f32 2.0, %v2727_v51  ;;  %v2750_v0 = vadd.f32 -1.0, %v2733_v53  ;;  %v562_v1 = vmul.f32 %v2427_v57, %v2704_v21  ;;  %vm326_vm5 = vc.u32 %v2721_v45, %v2724_v47 }
  0x1f   :  { %v327_v3 = vadd.s32 1, %v2725_v49  ;;  %v556_v9 = vadd.f32 %v554_v56, %v545_v55  ;;  %v572_v28 = vmul.f32 %v2428_v58, %v2730_v35  ;;  %v555_v12 = vadd.f32 %v553_v61, %v544_v59 }
  0x20   :  { %v2756_v10 = vadd.f32 -1.0, %v2747_v63  ;;  %v563_v11 = vmul.f32 %v2427_v57, %v2750_v0  ;;  %vm271_vm8 = vcmp.lt.s32.totalorder %v2627_v4, 0  ;;  %vm270_vm14 = vcmp.le.f32.partialorder %v269_v6, 0.7853982 }
  0x21   :  { %v328_v13 = vsel %vm326_vm5, %v327_v3, %v2725_v49  ;;  %v564_v19 = vadd.f32 %v562_v1, %v555_v12  ;;  %vm361_vm1 = vweird.f32 %v2627_v4 }
  0x22   :  { %3632 = vst [vmem:[#allocation9_spill] sm:$0xff] %v2756_v10  ;;  %v329_v14 = vadd.s32 %v328_v13, %v324_v62  ;;  %v565_v15 = vadd.f32 %v563_v11, %v556_v9  ;;  %v571_v20 = vmul.f32 %v2428_v58, %v2756_v10 }
  0x24   :  { %v330_v22 = vadd.s32 536870912, %v329_v14  ;;  %v574_v23 = vadd.f32 %v572_v28, %v565_v15  ;;  %v573_v25 = vadd.f32 %v571_v20, %v564_v19  ;;  %v325_v15 = vadd.s32 %v2724_v47, %v2721_v45 }
  0x26   :  { %v2762_v27 = vshrl.u32 %v330_v22, 30  ;;  %v2764_v29 = vmul.f32 0.5, %v574_v23  ;;  %v2766_v36 = vmul.f32 0.5, %v573_v25 }
  0x28   :  { %v332_v43 = vshll.u32 %v2762_v27, 30  ;;  %v683_v55 = vand.u32 2139095040, %v2764_v29  ;;  %v580_v49 = vand.u32 2139095040, %v2766_v36  ;;  %v3615_v59 = vand.u32 2147483647, %v2764_v29 }
  0x29   :  { %v355_v22 = vsub.s32 4, %v2762_v27 }
  0x2a   :  { %v333_v56 = vsub.s32 %v329_v14, %v332_v43  ;;  %v684_v57 = vshrl.u32 %v683_v55, 23  ;;  %v581_v62 = vshrl.u32 %v580_v49, 23  ;;  %v687_v3 = vand.u32 8388607, %v3615_v59 }
  0x2b   :  { %v2776_v14 = vsub.s32 0, %v2629_v5 }
  0x2c   :  { %v335_v58 = vsub.s32 0, %v333_v56  ;;  %v2433_v61 = vadd.s32 4294967169, %v684_v57  ;;  %v2429_v28 = vadd.s32 4294967169, %v581_v62  ;;  %v688_v19 = vor.u32 8388608, %v687_v3 }
  0x2e   :  { %v2410_v1 = vmin.u32 %v335_v58, %v333_v56  ;;  %v690_v9 = vadd.s32 1, %v2433_v61  ;;  %v587_v25 = vadd.s32 1, %v2429_v28 }
  0x30   :  { %v337_v11 = vclz %v2410_v1  ;;  %vm691_vm6 = vcmp.gt.s32.totalorder %v690_v9, 0  ;;  %vm588_vm9 = vcmp.gt.s32.totalorder %v587_v25, 0 }
  0x31   :  { %v692_v13 = vsel %vm691_vm6, %v690_v9, 0  ;;  %v2786_v9 = vshll.u32 %v688_v19, 8 }
  0x32   :  { %v2411_v12 = vadd.s32 4294967294, %v337_v11  ;;  %v694_v20 = vand.u32 31, %v692_v13  ;;  %v693_v62 = vshrl.u32 %v692_v13, 5 }
  0x34   :  { %vm2412_vm7 = vcmp.lt.s32.totalorder %v2411_v12, 0  ;;  %v695_v55 = vsub.s32 32, %v694_v20  ;;  %v697_v49 = vshll.u32 %v2573_v44, %v694_v20  ;;  %v700_v57 = vshll.u32 %v3618_v46, %v694_v20 }
  0x35   :  { %v340_v43 = vsel %vm2412_vm7, 0, %v2411_v12  ;;  %v703_v61 = vshll.u32 %v2575_v48, %v694_v20  ;;  %v709_v19 = vshll.u32 %v2577_v52, %v694_v20  ;;  %vm712_vm10 = vcmp.lt.s32.totalorder %v693_v62, 1 }
  0x36   :  { %v341_v45 = vsub.s32 32, %v340_v43  ;;  %v342_v47 = vshll.u32 %v333_v56, %v340_v43  ;;  %v345_v58 = vsub.s32 4294967266, %v340_v43  ;;  %v698_v1 = vshrl.u32 %v3618_v46, %v695_v55 }
  0x37   :  { %v701_v3 = vshrl.u32 %v2575_v48, %v695_v55  ;;  %v696_v12 = vshrl.u32 %v2573_v44, %v695_v55  ;;  %v704_v2 = vshrl.u32 %v3620_v50, %v695_v55  ;;  %v706_v56 = vshll.u32 %v3620_v50, %v694_v20 }
  0x38   :  { %v343_v11 = vshrl.u32 %v325_v15, %v341_v45  ;;  %v346_v28 = vadd.s32 127, %v345_v58  ;;  %v699_v59 = vor.u32 %v698_v1, %v697_v49  ;;  %v707_v43 = vshrl.u32 %v2577_v52, %v695_v55 }
  0x39   :  { %v702_v24 = vor.u32 %v701_v3, %v700_v57  ;;  %v705_v23 = vor.u32 %v704_v2, %v703_v61  ;;  %v710_v15 = vshrl.u32 %v2578_v60, %v695_v55  ;;  %vm713_vm11 = vcmp.lt.s32.totalorder %v693_v62, 2 }
  0x3a   :  { %v344_v34 = vor.u32 %v343_v11, %v342_v47  ;;  %v347_v13 = vshll.u32 %v346_v28, 23  ;;  %v708_v46 = vor.u32 %v707_v43, %v706_v56  ;;  %vm714_vm12 = vcmp.lt.s32.totalorder %v693_v62, 3 }
  0x3b   :  { %v711_v49 = vor.u32 %v710_v15, %v709_v19  ;;  %vm715_vm13 = vcmp.lt.s32.totalorder %v693_v62, 4  ;;  %v716_v57 = vsel %vm712_vm10, %v696_v12, %v699_v59  ;;  %v720_v1 = vsel %vm712_vm10, %v699_v59, %v702_v24 }
  0x3c   :  { %v348_v45 = vor.u32 4788187, %v347_v13  ;;  %v351_v58 = vcvt.s32.f32 %v344_v34  ;;  %v717_v50 = vsel %vm715_vm13, %v705_v23, 2102212464  ;;  %v721_v47 = vsel %vm715_vm13, %v708_v46, 920167782 }
  0x3d   :  { %v724_v11 = vsel %vm712_vm10, %v702_v24, %v705_v23  ;;  %v356_v2 = vsel %vm271_vm8, %v355_v22, %v2762_v27  ;;  %v718_v20 = vsel %vm714_vm12, %v702_v24, %v717_v50  ;;  %v722_v61 = vsel %vm714_vm12, %v705_v23, %v721_v47 }
  0x3e   :  { %v349_v3 = vand.u32 2147483647, %v348_v45  ;;  %v725_v55 = vsel %vm715_vm13, %v711_v49, 1326507024  ;;  %v723_v34 = vsel %vm713_vm11, %v720_v1, %v722_v61  ;;  %v589_v43 = vsel %vm588_vm9, %v587_v25, 0 }
  0x3f   :  { %v726_v56 = vsel %vm714_vm12, %v708_v46, %v725_v55  ;;  %v719_v12 = vsel %vm713_vm11, %v716_v57, %v718_v20  ;;  %v2802_v13 = vmul.u32.u64.low %v2786_v9, %v723_v34  ;;  %v2803_v19 = vmul.u32.u64.high %v2786_v9, %v723_v34, %v2802_v13 }
  0x40   :  { %v352_v28 = vmul.f32 %v351_v58, %v349_v3  ;;  %v727_v59 = vsel %vm713_vm11, %v724_v11, %v726_v56  ;;  %v358_v46 = vsel %vm270_vm14, 0, %v356_v2  ;;  %v518_v22 = vmul.f32 %v2667_v40, %v2655_v33 }
  0x41   :  { %v2809_v50 = vmul.u32.u64.low %v2786_v9, %v727_v59  ;;  %v2810_v27 = vmul.u32.u64.high %v2786_v9, %v727_v59, %v2809_v50  ;;  %v522_v23 = vmul.f32 %v2670_v41, %v2658_v37  ;;  %v3633_v25 = vand.u32 2147483647, %v2766_v36 }
  0x42   :  { %v353_v24 = vxor.u32 2147483648, %v352_v28  ;;  %v2822_v6 = vand.u32 3, %v358_v46  ;;  %v735_v45 = vmul.u32 %v2786_v9, %v719_v12  ;;  %v591_v58 = vand.u32 31, %v589_v43 }
  0x43   :  { %v2818_v62 = vand.u32 8388607, %v3633_v25  ;;  %v520_v57 = vsub.f32 1.0, %v518_v22  ;;  %v524_v1 = vsub.f32 1.0, %v522_v23  ;;  %v528_v40 = vmul.f32 %v2733_v53, %v2660_v38 }
  0x44   :  { %v354_v15 = vsel %vm271_vm8, %v353_v24, %v352_v28  ;;  %v465_v41 = vadd.s32 3, %v358_v46  ;;  %vm737_vm15 = vc.u32 %v2810_v27, %v2802_v13  ;;  %v738_v3 = vadd.s32 1, %v2803_v19 }
  0x45   :  { %v357_v49 = vsel %vm270_vm14, %v2627_v4, %v354_v15  ;;  %v526_v47 = vmul.f32 %v524_v1, %v520_v57  ;;  %v530_v11 = vsub.f32 1.0, %v528_v40  ;;  %v3634_v9 = vcvt.s32.f32 %v2644_v26 }
  0x46   :  { %2530 = vcosq.f32 %v357_v49  ;;  %v739_v20 = vsel %vm737_vm15, %v738_v3, %v2803_v19  ;;  %v517_v61 = vmul.f32 %v2653_v32, %v2639_v17  ;;  %v521_v53 = vmul.f32 %v2649_v30, %v2672_v42 }
  0x47   :  { %2532 = vsinq.f32 %v357_v49  ;;  %v534_v2 = vmul.f32 %v2714_v31, %v3634_v9  ;;  %v592_v55 = vsub.s32 32, %v591_v58  ;;  %v532_v28 = vmul.f32 %v530_v11, %v526_v47 }
  0x48   :  { %v740_v56 = vadd.s32 %v739_v20, %v735_v45  ;;  %v527_v12 = vmul.f32 %v2692_v8, %v2727_v51  ;;  %v519_v59 = vsub.f32 1.0, %v517_v61  ;;  %v523_v24 = vsub.f32 1.0, %v521_v53 }
  0x49   :  { %v536_v34 = vsub.f32 1.0, %v534_v2  ;;  %v585_v26 = vor.u32 8388608, %v2818_v62  ;;  %v594_v31 = vshll.u32 %v2573_v44, %v591_v58  ;;  %v3635_v46 = vmov 2475754826  }
  0x4a   :  { %v741_v50 = vadd.s32 536870912, %v740_v56  ;;  %v529_v32 = vsub.f32 1.0, %v527_v12  ;;  %v597_v22 = vshll.u32 %v3635_v46, %v591_v58  ;;  %v525_v30 = vmul.f32 %v523_v24, %v519_v59 }
  0x4b   :  { %v2843_v19 = vmul.f32 %v536_v34, %v532_v28  ;;  %v3636_v23 = vcvt.s32.f32 %v2641_v18  ;;  %v595_v15 = vshrl.u32 %v3635_v46, %v592_v55  ;;  %v598_v8 = vshrl.u32 %v2575_v48, %v592_v55 }
  0x4c   :  { %vm363_vm0 = vcmp.lt.s32.totalorder %v2822_v6, 2  ;;  %v2852_v62 = vshrl.u32 %v741_v50, 30  ;;  %v600_v45 = vshll.u32 %v2575_v48, %v591_v58  ;;  %v3637_v49 = vmov 2102212464  }
  0x4d   :  { %v533_v25 = vmul.f32 %v2747_v63, %v3636_v23  ;;  %v601_v57 = vshrl.u32 %v3637_v49, %v592_v55  ;;  %v603_v1 = vshll.u32 %v3637_v49, %v591_v58  ;;  %v531_v40 = vmul.f32 %v529_v32, %v525_v30 }
  0x4e   :  { %v2858_v3 = vshrl.u32 %v589_v43, 5  ;;  %v604_v63 = vshrl.u32 %v2577_v52, %v592_v55  ;;  %vm364_vm2 = vcmp.eq.s32.totalorder %v2822_v6, 0  ;;  %vm367_vm3 = vcmp.eq.s32.totalorder %v2822_v6, 2 }
  0x4f   :  { %v535_v18 = vsub.f32 1.0, %v533_v25  ;;  %v466_v47 = vand.u32 3, %v465_v41  ;;  %v743_v11 = vshll.u32 %v2852_v62, 30  ;;  %v606_v20 = vshll.u32 %v2577_v52, %v591_v58 }
  0x50   :  { %v605_v2 = vor.u32 %v604_v63, %v603_v1  ;;  %v607_v61 = vshrl.u32 %v2578_v60, %v592_v55  ;;  %v596_v43 = vor.u32 %v595_v15, %v594_v31  ;;  %v599_v28 = vor.u32 %v598_v8, %v597_v22 }
  0x51   :  { %v2864_v9 = vmul.f32 %v535_v18, %v531_v40  ;;  %v2868_v53 = vsub.s32 %v740_v56, %v743_v11  ;;  %v602_v34 = vor.u32 %v601_v57, %v600_v45  ;;  %vm609_vm4 = vcmp.lt.s32.totalorder %v2858_v3, 1 }
  0x52   :  { %vm611_vm5 = vcmp.lt.s32.totalorder %v2858_v3, 3  ;;  %vm612_vm6 = vcmp.lt.s32.totalorder %v2858_v3, 4  ;;  %v2873_v41 = vshll.u32 %v585_v26, 8  ;;  %vm467_vm7 = vcmp.lt.s32.totalorder %v466_v47, 2 }
  0x53   :  { %v2531_v12 = vpop.eup %2530  ;;  %vm471_vm8 = vcmp.eq.s32.totalorder %v466_v47, 2  ;;  %v746_v58 = vsub.s32 0, %v2868_v53  ;;  %v618_v56 = vsel %vm612_vm6, %v605_v2, 920167782  ;;  %vm468_vm9 = vcmp.eq.s32.totalorder %v466_v47, 0 }
  0x54   :  { %v2533_v59 = vpop.eup %2532  ;;  %v368_v24 = vxor.u32 2147483648, %v2531_v12  ;;  %v608_v31 = vor.u32 %v607_v61, %v606_v20  ;;  %vm610_vm10 = vcmp.lt.s32.totalorder %v2858_v3, 2  ;;  %v617_v26 = vsel %vm609_vm4, %v596_v43, %v599_v28 }
  0x55   :  { %v365_v50 = vxor.u32 2147483648, %v2533_v59  ;;  %v2434_v32 = vmin.u32 %v746_v58, %v2868_v53  ;;  %v619_v22 = vsel %vm611_vm5, %v602_v34, %v618_v56  ;;  %v593_v25 = vshrl.u32 %v2573_v44, %v592_v55 }
  0x56   :  { %v369_v30 = vsel %vm367_vm3, %v368_v24, %v2533_v59  ;;  %v473_v23 = vsel %vm471_vm8, %v368_v24, %v2533_v59  ;;  %v614_v15 = vsel %vm612_vm6, %v602_v34, 2102212464  ;;  %v621_v1 = vsel %vm609_vm4, %v599_v28, %v602_v34 }
  0x57   :  { %v366_v8 = vsel %vm364_vm2, %v2531_v12, %v365_v50  ;;  %v470_v45 = vsel %vm468_vm9, %v2531_v12, %v365_v50  ;;  %v748_v57 = vclz %v2434_v32  ;;  %v620_v63 = vsel %vm610_vm10, %v617_v26, %v619_v22 }
  0x58   :  { %v370_v40 = vsel %vm363_vm0, %v366_v8, %v369_v30  ;;  %v474_v18 = vsel %vm467_vm7, %v470_v45, %v473_v23  ;;  %v622_v55 = vsel %vm612_vm6, %v608_v31, 1326507024  ;;  %v613_v4 = vsel %vm609_vm4, %v593_v25, %v596_v43 }
  0x59   :  { %v2902_v11 = vsel %vm361_vm1, nan, %v370_v40  ;;  %v2906_v20 = vsel %vm361_vm1, nan, %v474_v18  ;;  %v2435_v61 = vadd.s32 4294967294, %v748_v57  ;;  %v623_v6 = vsel %vm611_vm5, %v605_v2, %v622_v55 }
  0x5a   :  { %v2912_v47 = vrot.slane %v2906_v20, %v2776_v14  ;;  %1266 = vrot.lane.b32.xlu0 %v2902_v11, %s2579_s4  ;;  %1339 = vrot.lane.b32.xlu1 %v2902_v11, %s2580_s28  ;;  %v615_v34 = vsel %vm611_vm5, %v599_v28, %v614_v15  ;;  %v624_v2 = vsel %vm610_vm10, %v621_v1, %v623_v6  ;;  %v2582_v25 = vmov 1  }
  0x5b   :  { %vm2436_vm11 = vcmp.lt.s32.totalorder %v2435_v61, 0  ;;  %v2925_v12 = vmul.u32.u64.low %v2873_v41, %v620_v63  ;;  %v2926_v58 = vmul.u32.u64.high %v2873_v41, %v620_v63, %v2925_v12  ;;  %2462 = vpush %v2902_v11  ;;  %v736_v28 = vadd.s32 %v2802_v13, %v2810_v27 }
  0x5c   :  { %v1206_v56 = vmul.f32 %v2663_v39, %v2912_v47  ;;  %v1207_v43 = vmul.f32 %v2689_v7, %v2912_v47  ;;  %v616_v59 = vsel %vm610_vm10, %v613_v4, %v615_v34  ;;  %v1234_v24 = vmul.f32 %v2680_v54, %v2912_v47 }
  0x5d   :  { %v751_v31 = vsel %vm2436_vm11, 0, %v2435_v61  ;;  %v2943_v50 = vmul.u32.u64.low %v2873_v41, %v624_v2  ;;  %v2944_v32 = vmul.u32.u64.high %v2873_v41, %v624_v2, %v2943_v50  ;;  %v635_v27 = vadd.s32 1, %v2926_v58 }
  0x5e   :  { %1216 = vperm.xlu0 %2503, %v1206_v56   ;;  %1412 = vrot.lane.b32.xlu1 %v2902_v11, %s2581_s29  ;;  %v752_v26 = vsub.s32 32, %v751_v31  ;;  %v753_v22 = vshll.u32 %v2868_v53, %v751_v31  ;;  %v756_v13 = vsub.s32 4294967266, %v751_v31  ;;  %v632_v3 = vmul.u32 %v2873_v41, %v616_v59 }
  0x5f   :  { %vm634_vm12 = vc.u32 %v2944_v32, %v2925_v12  ;;  %v1235_v15 = vmul.f32 %v2699_v16, %v2912_v47  ;;  %v1294_v41 = vmul.f32 %v2750_v0, %v2912_v47  ;;  %v3622_v63 = vmov 2  }
  0x60   :  { %v754_v30 = vshrl.u32 %v736_v28, %v752_v26  ;;  %v757_v23 = vadd.s32 127, %v756_v13  ;;  %v636_v45 = vsel %vm634_vm12, %v635_v27, %v2926_v58  ;;  %v1293_v61 = vmul.f32 %v2704_v21, %v2912_v47 }
  0x61   :  { %v637_v57 = vadd.s32 %v636_v45, %v632_v3  ;;  %vm682_vm13 = vcmp.lt.s32.totalorder %v2764_v29, 0  ;;  %v3638_v2 = vand.u32 2147483647, %v2764_v29  ;;  %v1366_v59 = vmul.f32 %v2756_v10, %v2912_v47 }
  0x62   :  { %1221 = vperm.xlu1 %2504, %v1207_v43   ;;  %2505 = vset.pattern.permute.xlu0 %v2582_v25  ;;  %v755_v8 = vor.u32 %v754_v30, %v753_v22  ;;  %v758_v53 = vshll.u32 %v757_v23, 23  ;;  %v3641_v43 = vmov 0   ;;  %v766_v31 = vsub.s32 4, %v2852_v62 }
  0x63   :  { %1275 = vperm.xlu0 %2505, %v1234_v24   ;;  %v638_v18 = vadd.s32 536870912, %v637_v57  ;;  %vm2968_vm14 = vcmp.le.f32.partialorder %v3638_v2, 0.7853982  ;;  %v2584_v22 = vmov 3   ;;  %v1367_v27 = vmul.f32 %v2730_v35, %v2912_v47 }
  0x64   :  { %v759_v1 = vor.u32 4788187, %v758_v53  ;;  %v762_v40 = vcvt.s32.f32 %v755_v8  ;;  %v767_v3 = vsel %vm682_vm13, %v766_v31, %v2852_v62  ;;  %v633_v8 = vadd.s32 %v2925_v12, %v2944_v32  ;;  %v21_v62 = vld [vmem:[%s3607_s0] sm:$0xf] }
  0x65   :  { %v2961_v6 = vshrl.u32 %v638_v18, 30  ;;  %vm772_vm3 = vweird.f32 %v2764_v29  ;;  %vm579_vm4 = vcmp.lt.s32.totalorder %v2766_v36, 0  ;;  %vm2585_vm8 = vmmov 1  }
  0x66   :  { %2506 = vset.pattern.permute.xlu1 %v2582_v25  ;;  %v760_v55 = vand.u32 2147483647, %v759_v1 }
  0x67   :  { %1280 = vperm.xlu1 %2506, %v1235_v15   ;;  %2508 = vset.pattern.permute.xlu0 %v3622_v63  ;;  %v640_v34 = vshll.u32 %v2961_v6, 30  ;;  %v769_v15 = vsel %vm2968_vm14, 0, %v767_v3 }
  0x68   :  { %1353 = vperm.xlu0 %2508, %v1294_v41   ;;  %v763_v4 = vmul.f32 %v762_v40, %v760_v55  ;;  %v773_v45 = vand.u32 3, %v769_v15 }
  0x69   :  { %v641_v28 = vsub.s32 %v637_v57, %v640_v34 }
  0x6a   :  { %v764_v56 = vxor.u32 2147483648, %v763_v4  ;;  %vm778_vm0 = vcmp.eq.s32.totalorder %v773_v45, 2  ;;  %vm774_vm1 = vcmp.lt.s32.totalorder %v773_v45, 2  ;;  %vm775_vm2 = vcmp.eq.s32.totalorder %v773_v45, 0 }
  0x6b   :  { %2507 = vset.pattern.permute.xlu1 %v3622_v63  ;;  %v643_v26 = vsub.s32 0, %v641_v28 }
  0x6c   :  { %1348 = vperm.xlu1 %2507, %v1293_v61   ;;  %2510 = vset.pattern.permute.xlu0 %v3641_v43  ;;  %v765_v24 = vsel %vm682_vm13, %v764_v56, %v763_v4 }
  0x6d   :  { %v768_v50 = vsel %vm2968_vm14, %v2764_v29, %v765_v24  ;;  %v2430_v13 = vmin.u32 %v643_v26, %v641_v28 }
  0x6e   :  { %2534 = vcosq.f32 %v768_v50 }
  0x6f   :  { %2536 = vsinq.f32 %v768_v50  ;;  %v645_v30 = vclz %v2430_v13 }
  0x70   :  { %2509 = vset.pattern.permute.xlu1 %v2584_v22 }
  0x71   :  { %1421 = vperm.xlu1 %2509, %v1366_v59   ;;  %v2431_v23 = vadd.s32 4294967294, %v645_v30  ;;  %v663_v30 = vsub.s32 4, %v2961_v6 }
  0x73   :  { %vm2432_vm15 = vcmp.lt.s32.totalorder %v2431_v23, 0 }
  0x74   :  { %v648_v53 = vsel %vm2432_vm15, 0, %v2431_v23 }
  0x75   :  { %1426 = vperm.xlu1 %2509, %v1367_v27   ;;  %v649_v41 = vsub.s32 32, %v648_v53  ;;  %v650_v57 = vshll.u32 %v641_v28, %v648_v53  ;;  %v653_v1 = vsub.s32 4294967266, %v648_v53 }
  0x77   :  { %v651_v47 = vshrl.u32 %v633_v8, %v649_v41  ;;  %v654_v40 = vadd.s32 127, %v653_v1  ;;  %v3642_v8 = vand.u32 2147483647, %v2766_v36  ;;  %v664_v41 = vsel %vm579_vm4, %v663_v30, %v2961_v6 }
  0x79   :  { %2511 = vset.pattern.permute.xlu1 %v3641_v43  ;;  %v652_v55 = vor.u32 %v651_v47, %v650_v57  ;;  %v655_v61 = vshll.u32 %v654_v40, 23  ;;  %vm578_vm5 = vcmp.le.f32.partialorder %v3642_v8, 0.7853982  ;;  %v982_v47 = vadd.s32 3, %v769_v15 }
  0x7a   :  { %v666_v1 = vsel %vm578_vm5, 0, %v664_v41 }
  0x7b   :  { %v2535_v18 = vpop.eup %2534  ;;  %v656_v58 = vor.u32 4788187, %v655_v61  ;;  %v659_v56 = vcvt.s32.f32 %v652_v55  ;;  %v878_v40 = vadd.s32 3, %v666_v1  ;;  %v670_v55 = vand.u32 3, %v666_v1 }
  0x7c   :  { %v2537_v4 = vpop.eup %2536  ;;  %v779_v32 = vxor.u32 2147483648, %v2535_v18 }
  0x7d   :  { %v26_v12 = vpop.permute.xlu0 %25  ;;  %v776_v2 = vxor.u32 2147483648, %v2537_v4  ;;  %v657_v31 = vand.u32 2147483647, %v656_v58  ;;  %vm675_vm13 = vcmp.eq.s32.totalorder %v670_v55, 2 }
  0x7e   :  { %v2995_v34 = vmul.f32 %v26_v12, %v21_v62  ;;  %v780_v28 = vsel %vm778_vm0, %v779_v32, %v2537_v4  ;;  %v983_v62 = vand.u32 3, %v982_v47  ;;  %v879_v12 = vand.u32 3, %v878_v40 }
  0x7f   :  { %v777_v24 = vsel %vm775_vm2, %v2535_v18, %v776_v2  ;;  %v660_v13 = vmul.f32 %v659_v56, %v657_v31 }
  0x80   :  { %v2998_v59 = vand.u32 2147483647, %v2995_v34  ;;  %v781_v50 = vsel %vm774_vm1, %v777_v24, %v780_v28  ;;  %vm985_vm10 = vcmp.eq.s32.totalorder %v983_v62, 0  ;;  %vm988_vm11 = vcmp.eq.s32.totalorder %v983_v62, 2 }
  0x81   :  { %v782_v3 = vsel %vm772_vm3, nan, %v781_v50  ;;  %v661_v53 = vxor.u32 2147483648, %v660_v13  ;;  %vm984_vm14 = vcmp.lt.s32.totalorder %v983_v62, 2  ;;  %vm884_vm15 = vcmp.eq.s32.totalorder %v879_v12, 2 }
  0x82   :  { %v36_v26 = vmax.f32 %v2998_v59, 1e-30  ;;  %v40_v27 = vadd.f32 1.0, %v2998_v59  ;;  %v3008_v23 = vmul.f32 %v782_v3, %v2843_v19  ;;  %vm32_vm6 = vcmp.gt.f32.partialorder %v2998_v59, 2.4142137 }
  0x83   :  { %v662_v45 = vsel %vm579_vm4, %v661_v53, %v660_v13  ;;  %vm33_vm7 = vcmp.gt.f32.partialorder %v2998_v59, 0.41421357  ;;  %vm34_vm9 = vmxor %vm32_vm6, %vm2585_vm8  ;;  %v2398_v6 = vadd.f32 -1.0, %v2998_v59  ;;  %v987_v50 = vsel %vm985_vm10, %v2535_v18, %v776_v2 }
  0x84   :  { %2538 = vrcp.f32 %v36_v26  ;;  %1446 = vperm.xlu1 %2511, %v3008_v23   ;;  %v665_v57 = vsel %vm578_vm5, %v2766_v36, %v662_v45  ;;  %vm3020_vm12 = vmand %vm33_vm7, %vm34_vm9  ;;  %v990_v26 = vsel %vm988_vm11, %v779_v32, %v2537_v4  ;;  %vm881_vm0 = vcmp.eq.s32.totalorder %v879_v12, 0 }
  0x85   :  { %2540 = vrcp.f32 %v40_v27  ;;  %vm672_vm1 = vcmp.eq.s32.totalorder %v670_v55, 0  ;;  %vm880_vm2 = vcmp.lt.s32.totalorder %v879_v12, 2  ;;  %vm671_vm4 = vcmp.lt.s32.totalorder %v670_v55, 2 }
  0x86   :  { %2542 = vcosq.f32 %v665_v57  ;;  %vm669_vm5 = vweird.f32 %v2766_v36  ;;  %v991_v41 = vsel %vm984_vm14, %v987_v50, %v990_v26  ;;  %v3041_v62 = vsub.s32 1, %v2629_v5 }
  0x87   :  { %2544 = vsinq.f32 %v665_v57  ;;  %v3046_v12 = vrot.slane %v2902_v11, 1  ;;  %v2586_v50 = vmov 0.0  }
  0x88   :  { %v45_v26 = vsel %vm3020_vm12, 0.7853982, %v2586_v50 }
  0x8c   :  { %s2463_s0 = spop %2462 }
  0x91   :  { %v2539_v61 = vpop.eup %2538 }
  0x92   :  { %v2541_v58 = vpop.eup %2540  ;;  %v38_v56 = vmul.f32 -1.0, %v2539_v61  ;;  %v992_v61 = vsel %vm772_vm3, nan, %v991_v41  ;;  %vm29_vm3 = vcmp.lt.f32.partialorder %v2995_v34, 0.0  ;;  %v2587_v41 = vmov 1.0  }
  0x93   :  { %v42_v15 = vmul.f32 %v2541_v58, %v2398_v6  ;;  %v2543_v24 = vpop.eup %2542  ;;  %v3049_v29 = vmul.f32 %v992_v61, %v2843_v19 }
  0x94   :  { %v2545_v13 = vpop.eup %2544  ;;  %v676_v3 = vxor.u32 2147483648, %v2543_v24 }
  0x95   :  { %v43_v31 = vsel %vm3020_vm12, %v42_v15, %v2998_v59  ;;  %v673_v8 = vxor.u32 2147483648, %v2545_v13 }
  0x96   :  { %v44_v27 = vsel %vm32_vm6, %v38_v56, %v43_v31  ;;  %v886_v53 = vsel %vm884_vm15, %v676_v3, %v2545_v13  ;;  %v677_v45 = vsel %vm675_vm13, %v676_v3, %v2545_v13  ;;  %vm995_vm15 = vcmp.eq.s32.totalorder %v2629_v5, 0 }
  0x97   :  { %v47_v30 = vmul.f32 %v44_v27, %v44_v27  ;;  %v883_v4 = vsel %vm881_vm0, %v2543_v24, %v673_v8  ;;  %v674_v32 = vsel %vm672_vm1, %v2543_v24, %v673_v8 }
  0x98   :  { %v887_v2 = vsel %vm880_vm2, %v883_v4, %v886_v53  ;;  %v678_v57 = vsel %vm671_vm4, %v674_v32, %v677_v45 }
  0x99   :  { %v48_v18 = vmul.f32 0.080537446, %v47_v30  ;;  %v888_v47 = vsel %vm669_vm5, nan, %v887_v2  ;;  %v679_v40 = vsel %vm669_vm5, nan, %v678_v57 }
  0x9a   :  { %v3035_v6 = vmul.f32 %v888_v47, %v2864_v9  ;;  %v3038_v36 = vmul.f32 %v679_v40, %v2864_v9  ;;  %v1640_v9 = vrot.slane %v2906_v20, %v3041_v62 }
  0x9b   :  { %v2399_v1 = vadd.f32 -0.13877685, %v48_v18  ;;  %v30_v18 = vsel %vm29_vm3, -1.0, %v2587_v41 }
  0x9c   :  { %1453 = vperm.xlu1 %2511, %v3035_v6   ;;  %1441 = vperm.xlu0 %2510, %v3038_v36   ;;  %v1642_v19 = vmul.f32 %v2689_v7, %v1640_v9  ;;  %v1641_v31 = vmul.f32 %v2663_v39, %v1640_v9  ;;  %v1670_v53 = vmul.f32 %v2699_v16, %v1640_v9 }
  0x9d   :  { %v50_v55 = vmul.f32 %v2399_v1, %v47_v30  ;;  %v1669_v45 = vmul.f32 %v2680_v54, %v1640_v9  ;;  %v1728_v34 = vmul.f32 %v2704_v21, %v1640_v9  ;;  %v1729_v59 = vmul.f32 %v2750_v0, %v1640_v9 }
  0x9e   :  { %v1801_v57 = vmul.f32 %v2756_v10, %v1640_v9  ;;  %v1802_v40 = vmul.f32 %v2730_v35, %v1640_v9 }
  0x9f   :  { %v51_v58 = vadd.f32 0.19977711, %v50_v55 }
  0xa0   :  { %1701 = vrot.lane.b32.xlu1 %v3046_v12, %s2579_s4  ;;  %1458 = vperm.xlu0 %2510, %v3049_v29  }
  0xa1   :  { %v52_v56 = vmul.f32 %v51_v58, %v47_v30 }
  0xa3   :  { %v2400_v15 = vadd.f32 -0.3333295, %v52_v56 }
  0xa4   :  { %1847 = vrot.lane.b32.xlu1 %v3046_v12, %s2581_s29  ;;  %1774 = vrot.lane.b32.xlu0 %v3046_v12, %s2580_s28 }
  0xa5   :  { %v54_v24 = vmul.f32 %v2400_v15, %v47_v30  ;;  %v46_v30 = vsel %vm32_vm6, 1.5707964, %v45_v26 }
  0xa7   :  { %v55_v13 = vmul.f32 %v54_v24, %v44_v27 }
  0xa8   :  { %1656 = vperm.xlu1 %2511, %v1642_v19   ;;  %1651 = vperm.xlu0 %2510, %v1641_v31  }
  0xa9   :  { %v56_v3 = vadd.f32 %v55_v13, %v44_v27 }
  0xab   :  { %v57_v8 = vadd.f32 %v56_v3, %v46_v30 }
  0xac   :  { %2513 = vset.pattern.permute.xlu1 %v2582_v25  ;;  %2512 = vset.pattern.permute.xlu0 %v2582_v25 }
  0xad   :  { %v58_v4 = vmul.f32 %v57_v8, %v30_v18  ;;  %1715 = vperm.xlu1 %2513, %v1670_v53   ;;  %1710 = vperm.xlu0 %2512, %v1669_v45  }
  0xaf   :  { %v3072_v28 = vmul.f32 0.5, %v58_v4 }
  0xb1   :  { %v63_v27 = vand.u32 2139095040, %v3072_v28  ;;  %2514 = vset.pattern.permute.xlu1 %v3622_v63  ;;  %2515 = vset.pattern.permute.xlu0 %v3622_v63  ;;  %v60_v47 = vand.u32 2147483647, %v3072_v28  ;;  %vm62_vm13 = vcmp.lt.s32.totalorder %v3072_v28, 0  ;;  %vm152_vm0 = vweird.f32 %v3072_v28 }
  0xb2   :  { %1783 = vperm.xlu1 %2514, %v1728_v34   ;;  %1788 = vperm.xlu0 %2515, %v1729_v59  }
  0xb3   :  { %v64_v32 = vshrl.u32 %v63_v27, 23  ;;  %v67_v58 = vand.u32 8388607, %v60_v47  ;;  %vm61_vm14 = vcmp.le.f32.partialorder %v60_v47, 0.7853982 }
  0xb5   :  { %v2401_v2 = vadd.s32 4294967169, %v64_v32  ;;  %v68_v45 = vor.u32 8388608, %v67_v58 }
  0xb6   :  { %2516 = vset.pattern.permute.xlu1 %v2584_v22  ;;  %2517 = vset.pattern.permute.xlu0 %v2582_v25 }
  0xb7   :  { %v70_v1 = vadd.s32 1, %v2401_v2  ;;  %1856 = vperm.xlu1 %2516, %v1801_v57   ;;  %1875 = vperm.xlu0 %2517, %v3038_v36   ;;  %v108_v57 = vshll.u32 %v68_v45, 8 }
  0xb9   :  { %vm71_vm6 = vcmp.gt.s32.totalorder %v70_v1, 0 }
  0xba   :  { %v72_v61 = vsel %vm71_vm6, %v70_v1, 0 }
  0xbb   :  { %v74_v55 = vand.u32 31, %v72_v61  ;;  %1861 = vperm.xlu1 %2516, %v1802_v40   ;;  %1889 = vperm.xlu0 %2517, %v3049_v29   ;;  %v73_v15 = vshrl.u32 %v72_v61, 5 }
  0xbd   :  { %v75_v56 = vsub.s32 32, %v74_v55  ;;  %v77_v24 = vshll.u32 %v2573_v44, %v74_v55  ;;  %v80_v19 = vshll.u32 %v3635_v46, %v74_v55  ;;  %v83_v26 = vshll.u32 %v2575_v48, %v74_v55 }
  0xbe   :  { %v86_v3 = vshll.u32 %v3637_v49, %v74_v55  ;;  %v89_v8 = vshll.u32 %v2577_v52, %v74_v55  ;;  %vm92_vm7 = vcmp.lt.s32.totalorder %v73_v15, 1  ;;  %vm95_vm8 = vcmp.lt.s32.totalorder %v73_v15, 4 }
  0xbf   :  { %v78_v31 = vshrl.u32 %v3635_v46, %v75_v56  ;;  %v81_v9 = vshrl.u32 %v2575_v48, %v75_v56  ;;  %v84_v13 = vshrl.u32 %v3637_v49, %v75_v56  ;;  %v87_v30 = vshrl.u32 %v2577_v52, %v75_v56  ;;  %2518 = vset.pattern.permute.xlu1 %v2582_v25 }
  0xc0   :  { %v90_v53 = vshrl.u32 %v2578_v60, %v75_v56  ;;  %2519 = vset.pattern.permute.xlu0 %v3641_v43  ;;  %1879 = vperm.xlu1 %2518, %v3008_v23   ;;  %v76_v52 = vshrl.u32 %v2573_v44, %v75_v56  ;;  %vm94_vm9 = vcmp.lt.s32.totalorder %v73_v15, 3  ;;  %vm93_vm10 = vcmp.lt.s32.totalorder %v73_v15, 2 }
  0xc1   :  { %v79_v41 = vor.u32 %v78_v31, %v77_v24  ;;  %v82_v18 = vor.u32 %v81_v9, %v80_v19  ;;  %v85_v4 = vor.u32 %v84_v13, %v83_v26  ;;  %v88_v46 = vor.u32 %v87_v30, %v86_v3 }
  0xc2   :  { %v91_v48 = vor.u32 %v90_v53, %v89_v8  ;;  %v3110_v56 = vrot.slane %v2902_v11, 2 }
  0xc3   :  { %v97_v49 = vsel %vm95_vm8, %v85_v4, 2102212464  ;;  %v100_v34 = vsel %vm92_vm7, %v79_v41, %v82_v18  ;;  %v104_v59 = vsel %vm92_vm7, %v82_v18, %v85_v4  ;;  %v101_v60 = vsel %vm95_vm8, %v88_v46, 920167782 }
  0xc4   :  { %v105_v27 = vsel %vm95_vm8, %v91_v48, 1326507024  ;;  %v102_v32 = vsel %vm94_vm9, %v85_v4, %v101_v60  ;;  %v96_v1 = vsel %vm92_vm7, %v76_v52, %v79_v41  ;;  %v98_v40 = vsel %vm94_vm9, %v82_v18, %v97_v49  ;;  %1885 = vperm.xlu1 %2518, %v3035_v6   ;;  %2205 = vrot.lane.b32.xlu0 %v3110_v56, %s2580_s28 }
  0xc5   :  { %v106_v2 = vsel %vm94_vm9, %v88_v46, %v105_v27  ;;  %v103_v61 = vsel %vm93_vm10, %v100_v34, %v102_v32  ;;  %v99_v44 = vsel %vm93_vm10, %v96_v1, %v98_v40  ;;  %vm1021_vm7 = vcmask 1043456  }
  0xc6   :  { %v107_v55 = vsel %vm93_vm10, %v104_v59, %v106_v2  ;;  %v3106_v19 = vmul.u32.u64.low %v108_v57, %v103_v61  ;;  %v3107_v31 = vmul.u32.u64.high %v108_v57, %v103_v61, %v3106_v19  ;;  %v115_v9 = vmul.u32 %v108_v57, %v99_v44 }
  0xc7   :  { %v3103_v58 = vmul.u32.u64.low %v108_v57, %v107_v55  ;;  %v3104_v24 = vmul.u32.u64.high %v108_v57, %v107_v55, %v3103_v58  ;;  %vm1072_vm8 = vcmask 1045504   ;;  %vm1082_vm9 = vcmask 1041408  }
  0xc8   :  { %2520 = vset.pattern.permute.xlu1 %v3641_v43  ;;  %v118_v15 = vadd.s32 1, %v3107_v31  ;;  %vm1138_vm10 = vcmask 1046528  }
  0xc9   :  { %vm117_vm11 = vc.u32 %v3104_v24, %v3106_v19  ;;  %2132 = vrot.lane.b32.xlu1 %v3110_v56, %s2579_s4  ;;  %v116_v34 = vadd.s32 %v3106_v19, %v3104_v24  ;;  %v3128_v24 = vsub.s32 2, %v2629_v5 }
  0xca   :  { %v119_v3 = vsel %vm117_vm11, %v118_v15, %v3107_v31  ;;  %vm1148_vm11 = vcmask 1040384  }
  0xcb   :  { %v120_v11 = vadd.s32 %v119_v3, %v115_v9  ;;  %v3133_v44 = vrot.slane %v2906_v20, %v3128_v24 }
  0xcc   :  { %v1267_v26 = vpop.permute.xlu0 %1266  ;;  %v1340_v13 = vpop.permute.xlu1 %1339 }
  0xcd   :  { %2464 = vpush %v1267_v26  ;;  %2278 = vrot.lane.b32.xlu1 %v3110_v56, %s2581_s29  ;;  %v121_v30 = vadd.s32 536870912, %v120_v11  ;;  %v2072_v47 = vmul.f32 %v2663_v39, %v3133_v44 }
  0xce   :  { %2466 = vpush %v1340_v13  ;;  %v2073_v13 = vmul.f32 %v2689_v7, %v3133_v44 }
  0xcf   :  { %v122_v53 = vshrl.u32 %v121_v30, 30  ;;  %2082 = vperm.xlu0 %2519, %v2072_v47  }
  0xd0   :  { %v1413_v8 = vpop.permute.xlu1 %1412 }
  0xd1   :  { %2468 = vpush %v1413_v8  ;;  %v123_v45 = vshll.u32 %v122_v53, 30  ;;  %v146_v58 = vsub.s32 4, %v122_v53  ;;  %2087 = vperm.xlu1 %2520, %v2073_v13  }
  0xd2   :  { %2470 = vpush %v3046_v12 }
  0xd3   :  { %v124_v41 = vsub.s32 %v120_v11, %v123_v45  ;;  %v147_v15 = vsel %vm62_vm13, %v146_v58, %v122_v53  ;;  %2522 = vset.pattern.permute.xlu0 %v2582_v25  ;;  %v2100_v53 = vmul.f32 %v2680_v54, %v3133_v44 }
  0xd4   :  { %v149_v9 = vsel %vm61_vm14, 0, %v147_v15 }
  0xd5   :  { %v126_v18 = vsub.s32 0, %v124_v41  ;;  %v256_v3 = vadd.s32 3, %v149_v9  ;;  %v153_v30 = vand.u32 3, %v149_v9  ;;  %2521 = vset.pattern.permute.xlu1 %v2582_v25 }
  0xd6   :  { %2141 = vperm.xlu1 %2521, %v2100_v53  }
  0xd7   :  { %v2402_v4 = vmin.u32 %v126_v18, %v124_v41  ;;  %v257_v8 = vand.u32 3, %v256_v3  ;;  %vm158_vm1 = vcmp.eq.s32.totalorder %v153_v30, 2  ;;  %vm155_vm4 = vcmp.eq.s32.totalorder %v153_v30, 0 }
  0xd8   :  { %vm154_vm3 = vcmp.lt.s32.totalorder %v153_v30, 2 }
  0xd9   :  { %v128_v46 = vclz %v2402_v4  ;;  %vm262_vm2 = vcmp.eq.s32.totalorder %v257_v8, 2  ;;  %vm259_vm5 = vcmp.eq.s32.totalorder %v257_v8, 0  ;;  %vm258_vm6 = vcmp.lt.s32.totalorder %v257_v8, 2  ;;  %v3190_v13 = vpop.permute.xlu0 %1216 }
  0xda   :  { %2523 = vset.pattern.permute.xlu1 %v3622_v63 }
  0xdb   :  { %v2403_v48 = vadd.s32 4294967294, %v128_v46 }
  0xdd   :  { %vm2404_vm12 = vcmp.lt.s32.totalorder %v2403_v48, 0  ;;  %v3135_v26 = vpop.permute.xlu1 %1221 }
  0xde   :  { %v131_v49 = vsel %vm2404_vm12, 0, %v2403_v48 }
  0xdf   :  { %v132_v59 = vsub.s32 32, %v131_v49  ;;  %v136_v52 = vsub.s32 4294967266, %v131_v49  ;;  %v133_v60 = vshll.u32 %v124_v41, %v131_v49  ;;  %v1184_v41 = vsub.s32 3, %v2629_v5 }
  0xe1   :  { %v134_v27 = vshrl.u32 %v116_v34, %v132_v59  ;;  %v137_v32 = vadd.s32 127, %v136_v52 }
  0xe2   :  { %v3141_v11 = vpop.permute.xlu1 %1280 }
  0xe3   :  { %v135_v2 = vor.u32 %v134_v27, %v133_v60  ;;  %v138_v57 = vshll.u32 %v137_v32, 23  ;;  %v2159_v60 = vmul.f32 %v2704_v21, %v3133_v44  ;;  %v2101_v27 = vmul.f32 %v2699_v16, %v3133_v44 }
  0xe4   :  { %v2445_v32 = vsel %vm995_vm15, 1.0, %v2586_v50 }
  0xe5   :  { %v139_v1 = vor.u32 4788187, %v138_v57  ;;  %v142_v12 = vcvt.s32.f32 %v135_v2  ;;  %2214 = vperm.xlu1 %2523, %v2159_v60   ;;  %2146 = vperm.xlu0 %2522, %v2101_v27  }
  0xe7   :  { %v140_v40 = vand.u32 2147483647, %v139_v1  ;;  %v3150_v46 = vpop.permute.xlu1 %1348 }
  0xe9   :  { %v143_v61 = vmul.f32 %v142_v12, %v140_v40  ;;  %2524 = vset.pattern.permute.xlu0 %v2584_v22 }
  0xeb   :  { %v144_v55 = vxor.u32 2147483648, %v143_v61 }
  0xed   :  { %v145_v31 = vsel %vm62_vm13, %v144_v55, %v143_v61 }
  0xee   :  { %v148_v19 = vsel %vm61_vm14, %v3072_v28, %v145_v31  ;;  %v3182_v28 = vpop.permute.xlu1 %1421 }
  0xef   :  { %2546 = vcosq.f32 %v148_v19 }
  0xf0   :  { %2548 = vsinq.f32 %v148_v19 }
  0xfc   :  { %v2547_v20 = vpop.eup %2546 }
  0xfd   :  { %v2549_v45 = vpop.eup %2548  ;;  %v159_v18 = vxor.u32 2147483648, %v2547_v20 }
  0xfe   :  { %v156_v4 = vxor.u32 2147483648, %v2549_v45  ;;  %s2465_s7 = spop %2464 }
  0xff   :  { %v160_v25 = vsel %vm158_vm1, %v159_v18, %v2549_v45  ;;  %v264_v48 = vsel %vm262_vm2, %v159_v18, %v2549_v45 }
 0x100   :  { %v157_v49 = vsel %vm155_vm4, %v2547_v20, %v156_v4  ;;  %v261_v34 = vsel %vm259_vm5, %v2547_v20, %v156_v4  ;;  %v3193_v20 = vpop.permute.xlu1 %1426 }
 0x101   :  { %v161_v59 = vsel %vm154_vm3, %v157_v49, %v160_v25  ;;  %v265_v52 = vsel %vm258_vm6, %v261_v34, %v264_v48  ;;  %v3199_v34 = vpop.permute.xlu0 %1275 }
 0x102   :  { %v3161_v2 = vsel %vm152_vm0, nan, %v161_v59  ;;  %v3165_v57 = vsel %vm152_vm0, nan, %v265_v52  ;;  %v2233_v59 = vmul.f32 %v2730_v35, %v3133_v44 }
 0x103   :  { %v3170_v1 = vrot.slane %v3161_v2, %v2776_v14  ;;  %v3174_v40 = vrot.slane %v3165_v57, %v2776_v14  ;;  %v3177_v5 = vrot.slane %v3161_v2, %v1184_v41  ;;  %v3180_v50 = vrot.slane %v3165_v57, %v1184_v41 }
 0x104   :  { %v2160_v14 = vmul.f32 %v2750_v0, %v3133_v44 }
 0x105   :  { %v1005_v12 = vmul.f32 %v2445_v32, %v3170_v1  ;;  %v1006_v61 = vmul.f32 0.0, %v3170_v1  ;;  %v1011_v55 = vmul.f32 0.0, %v3174_v40  ;;  %v1016_v58 = vmul.f32 %v2445_v32, %v3174_v40 }
 0x106   :  { %2219 = vperm.xlu1 %2523, %v2160_v14  }
 0x107   :  { %v1012_v31 = vadd.f32 %v1011_v55, %v1005_v12  ;;  %v1013_v19 = vadd.f32 %v1011_v55, %v1006_v61  ;;  %v1017_v15 = vsub.f32 %v1006_v61, %v1011_v55  ;;  %v1018_v9 = vsub.f32 %v1006_v61, %v1016_v58 }
 0x108   :  { %v3210_v12 = vrot.slane %v3161_v2, %v3041_v62  ;;  %v3214_v61 = vrot.slane %v3165_v57, %v3041_v62 }
 0x109   :  { %v1022_v47 = vrot.slane %v1012_v31, 4  ;;  %v1023_v3 = vrot.slane %v1013_v19, 4  ;;  %v1037_v30 = vrot.slane %v1017_v15, 4  ;;  %v1038_v8 = vrot.slane %v1018_v9, 4 }
 0x10a   :  { %2525 = vset.pattern.permute.xlu1 %v2584_v22 }
 0x10b   :  { %v1024_v53 = vsel %vm1021_vm7, %v1022_v47, %v1023_v3  ;;  %v1028_v45 = vsel %vm1021_vm7, %v1023_v3, %v1022_v47  ;;  %v1039_v41 = vsel %vm1021_vm7, %v1037_v30, %v1038_v8  ;;  %v1043_v18 = vsel %vm1021_vm7, %v1038_v8, %v1037_v30  ;;  %2292 = vperm.xlu1 %2525, %v2233_v59   ;;  %v3216_v47 = vpop.permute.xlu1 %1446  ;;  %v3218_v3 = vpop.permute.xlu0 %1353 }
 0x10c   :  { %v1029_v4 = vsub.f32 %v1028_v45, %v1024_v53  ;;  %v1030_v25 = vsub.f32 %v1024_v53, %v1028_v45  ;;  %v1044_v48 = vsub.f32 %v1043_v18, %v1039_v41  ;;  %v1045_v49 = vsub.f32 %v1039_v41, %v1043_v18 }
 0x10d   :  { %v1054_v30 = vmul.f32 %v3210_v12, %v1012_v31  ;;  %v1055_v8 = vmul.f32 %v3210_v12, %v1013_v19 }
 0x10e   :  { %v1031_v52 = vmul.f32 %v1029_v4, %v2639_v17  ;;  %v1032_v60 = vmul.f32 %v1030_v25, %v2655_v33  ;;  %v1046_v27 = vmul.f32 %v1044_v48, %v2639_v17  ;;  %v1047_v32 = vmul.f32 %v1045_v49, %v2655_v33 }
 0x10f   :  { %v1064_v4 = vmul.f32 %v3210_v12, %v1017_v15  ;;  %v1065_v25 = vmul.f32 %v3210_v12, %v1018_v9  ;;  %2526 = vset.pattern.permute.xlu1 %v3622_v63 }
 0x110   :  { %v1033_v22 = vadd.f32 %v1031_v52, %v1024_v53  ;;  %v1034_v55 = vadd.f32 %v1032_v60, %v1028_v45  ;;  %v1048_v58 = vadd.f32 %v1046_v27, %v1039_v41  ;;  %v1049_v14 = vadd.f32 %v1047_v32, %v1043_v18  ;;  %2306 = vperm.xlu1 %2526, %v3038_v36  }
 0x112   :  { %v1060_v62 = vmul.f32 %v3214_v61, %v1048_v58  ;;  %v1061_v48 = vmul.f32 %v3214_v61, %v1049_v14  ;;  %v1066_v53 = vmul.f32 %v3214_v61, %v1033_v22  ;;  %v1067_v45 = vmul.f32 %v3214_v61, %v1034_v55 }
 0x114   :  { %v1062_v41 = vadd.f32 %v1060_v62, %v1054_v30  ;;  %v1063_v18 = vadd.f32 %v1061_v48, %v1055_v8  ;;  %v1068_v49 = vsub.f32 %v1064_v4, %v1066_v53  ;;  %v1069_v31 = vsub.f32 %v1065_v25, %v1067_v45  ;;  %2316 = vperm.xlu1 %2526, %v3035_v6  }
 0x115   :  { %v3249_v6 = vrot.slane %v3161_v2, %v3128_v24 }
 0x116   :  { %v1073_v19 = vrot.slane %v1062_v41, 2  ;;  %v1074_v15 = vrot.slane %v1063_v18, 2  ;;  %v1080_v9 = vrot.slane %v1063_v18, 6  ;;  %v1083_v59 = vrot.slane %v1062_v41, 6 }
 0x117   :  { %v3230_v52 = vpop.permute.xlu1 %1453  ;;  %v3232_v60 = vpop.permute.xlu0 %1441  ;;  %v1096_v27 = vrot.slane %v1068_v49, 2  ;;  %v1097_v32 = vrot.slane %v1069_v31, 2  ;;  %v1103_v22 = vrot.slane %v1069_v31, 6  ;;  %v1105_v55 = vrot.slane %v1068_v49, 6 }
 0x118   :  { %v1075_v58 = vsel %vm1072_vm8, %v1073_v19, %v1074_v15  ;;  %v1079_v14 = vsel %vm1072_vm8, %v1074_v15, %v1073_v19  ;;  %v1084_v36 = vsel %vm1082_vm9, %v1083_v59, %v1080_v9  ;;  %v1087_v30 = vsel %vm1082_vm9, %v1080_v9, %v1083_v59  ;;  %2320 = vperm.xlu1 %2526, %v3049_v29  }
 0x119   :  { %v1088_v8 = vsub.f32 %v1087_v30, %v1075_v58  ;;  %v1089_v4 = vsub.f32 %v1084_v36, %v1079_v14  ;;  %v1098_v25 = vsel %vm1072_vm8, %v1096_v27, %v1097_v32  ;;  %v1102_v62 = vsel %vm1072_vm8, %v1097_v32, %v1096_v27 }
 0x11a   :  { %v1106_v48 = vsel %vm1082_vm9, %v1105_v55, %v1103_v22  ;;  %v1109_v53 = vsel %vm1082_vm9, %v1103_v22, %v1105_v55  ;;  %v3253_v27 = vrot.slane %v3165_v57, %v3128_v24  ;;  %v2232_v32 = vmul.f32 %v2756_v10, %v3133_v44 }
 0x11b   :  { %v1702_v45 = vpop.permute.xlu1 %1701  ;;  %v3243_v63 = vpop.permute.xlu0 %1458  ;;  %v1090_v19 = vmul.f32 %v1088_v8, %v2672_v42  ;;  %v1091_v15 = vmul.f32 %v1089_v4, %v2658_v37  ;;  %v1110_v9 = vsub.f32 %v1109_v53, %v1098_v25  ;;  %v1111_v59 = vsub.f32 %v1106_v48, %v1102_v62 }
 0x11c   :  { %2472 = vpush %v1702_v45  ;;  %v1130_v8 = vmul.f32 %v3249_v6, %v1068_v49  ;;  %v1131_v2 = vmul.f32 %v3249_v6, %v1069_v31  ;;  %2287 = vperm.xlu0 %2524, %v2232_v32   ;;  %v1120_v44 = vmul.f32 %v3249_v6, %v1062_v41 }
 0x11d   :  { %v1092_v22 = vadd.f32 %v1090_v19, %v1075_v58  ;;  %v1093_v55 = vadd.f32 %v1091_v15, %v1079_v14  ;;  %v1112_v36 = vmul.f32 %v1110_v9, %v2672_v42  ;;  %v1113_v30 = vmul.f32 %v1111_v59, %v2658_v37  ;;  %2529 = vset.pattern.permute.xlu1 %v3641_v43 }
 0x11e   :  { %v1121_v58 = vmul.f32 %v3249_v6, %v1063_v18 }
 0x11f   :  { %v1848_v4 = vpop.permute.xlu1 %1847  ;;  %v1775_v48 = vpop.permute.xlu0 %1774  ;;  %v1114_v24 = vadd.f32 %v1112_v36, %v1098_v25  ;;  %v1115_v57 = vadd.f32 %v1113_v30, %v1102_v62  ;;  %v1132_v29 = vmul.f32 %v3253_v27, %v1092_v22  ;;  %v1133_v53 = vmul.f32 %v3253_v27, %v1093_v55 }
 0x120   :  { %2474 = vpush %v1775_v48  ;;  %v3645_v25 = vmov 2  }
 0x121   :  { %2476 = vpush %v1848_v4  ;;  %v1126_v49 = vmul.f32 %v3253_v27, %v1114_v24  ;;  %v1127_v31 = vmul.f32 %v3253_v27, %v1115_v57  ;;  %v1134_v14 = vsub.f32 %v1130_v8, %v1132_v29  ;;  %v1135_v45 = vsub.f32 %v1131_v2, %v1133_v53 }
 0x122   :  { %2478 = vpush %v3110_v56  ;;  %2527 = vset.pattern.permute.xlu0 %v3645_v25 }
 0x123   :  { %v1128_v62 = vadd.f32 %v1126_v49, %v1120_v44  ;;  %v1129_v19 = vadd.f32 %v1127_v31, %v1121_v58  ;;  %v1162_v41 = vrot.slane %v1134_v14, 1  ;;  %v1163_v15 = vrot.slane %v1135_v45, 1  ;;  %2310 = vperm.xlu0 %2527, %v3008_v23   ;;  %v3272_v59 = vpop.permute.xlu1 %1656 }
 0x124   :  { %v1169_v18 = vrot.slane %v1135_v45, 7  ;;  %v1171_v9 = vrot.slane %v1134_v14, 7 }
 0x125   :  { %v1139_v32 = vrot.slane %v1128_v62, 1  ;;  %v1140_v22 = vrot.slane %v1129_v19, 1  ;;  %v1146_v55 = vrot.slane %v1129_v19, 7  ;;  %v1149_v36 = vrot.slane %v1128_v62, 7 }
 0x126   :  { %v1168_v56 = vsel %vm1138_vm10, %v1163_v15, %v1162_v41  ;;  %v1172_v30 = vsel %vm1148_vm11, %v1171_v9, %v1169_v18  ;;  %v1164_v8 = vsel %vm1138_vm10, %v1162_v41, %v1163_v15  ;;  %v1175_v29 = vsel %vm1148_vm11, %v1169_v18, %v1171_v9 }
 0x127   :  { %v1145_v2 = vsel %vm1138_vm10, %v1140_v22, %v1139_v32  ;;  %v1150_v4 = vsel %vm1148_vm11, %v1149_v36, %v1146_v55  ;;  %v1177_v48 = vsub.f32 %v1172_v30, %v1168_v56  ;;  %v1141_v23 = vsel %vm1138_vm10, %v1139_v32, %v1140_v22  ;;  %2528 = vset.pattern.permute.xlu0 %v3641_v43 }
 0x128   :  { %v1155_v24 = vsub.f32 %v1150_v4, %v1145_v2  ;;  %v1153_v57 = vsel %vm1148_vm11, %v1146_v55, %v1149_v36  ;;  %v3283_v53 = vpop.permute.xlu1 %1715  ;;  %v1176_v49 = vsub.f32 %v1175_v29, %v1164_v8  ;;  %v1187_v22 = vmul.f32 %v3177_v5, %v1129_v19 }
 0x129   :  { %v1179_v44 = vmul.f32 %v1177_v48, %v2660_v38  ;;  %v1154_v58 = vsub.f32 %v1153_v57, %v1141_v23  ;;  %v1197_v36 = vmul.f32 %v3177_v5, %v1135_v45  ;;  %v1210_v4 = vstv %s2463_s0 }
 0x12a   :  { %v1157_v31 = vmul.f32 %v1155_v24, %v2660_v38  ;;  %v1178_v15 = vmul.f32 %v1176_v49, %v2727_v51  ;;  %v1186_v24 = vmul.f32 %v3177_v5, %v1128_v62 }
 0x12b   :  { %v1181_v25 = vadd.f32 %v1179_v44, %v1168_v56  ;;  %v1156_v41 = vmul.f32 %v1154_v58, %v2727_v51  ;;  %v1196_v56 = vmul.f32 %v3177_v5, %v1134_v14 }
 0x12c   :  { %v1159_v43 = vadd.f32 %v1157_v31, %v1145_v2  ;;  %v1180_v55 = vadd.f32 %v1178_v15, %v1164_v8 }
 0x12d   :  { %v3289_v32 = vpop.permute.xlu1 %1783  ;;  %v1193_v18 = vmul.f32 %v3180_v50, %v1181_v25  ;;  %v1158_v9 = vadd.f32 %v1156_v41, %v1141_v23 }
 0x12e   :  { %v1199_v30 = vmul.f32 %v3180_v50, %v1159_v43  ;;  %v1192_v2 = vmul.f32 %v3180_v50, %v1180_v55 }
 0x12f   :  { %v1195_v48 = vadd.f32 %v1193_v18, %v1187_v22  ;;  %v1198_v57 = vmul.f32 %v3180_v50, %v1158_v9 }
 0x130   :  { %v1201_v29 = vsub.f32 %v1197_v36, %v1199_v30  ;;  %v1194_v23 = vadd.f32 %v1192_v2, %v1186_v24 }
 0x131   :  { %v1224_v19 = vmul.f32 %v3190_v13, %v1195_v48  ;;  %v1213_v44 = vmul.f32 %v1210_v4, %v1195_v48  ;;  %v1200_v8 = vsub.f32 %v1196_v56, %v1198_v57  ;;  %v1269_v56 = vstv %s2465_s7 }
 0x132   :  { %v3300_v58 = vpop.permute.xlu1 %1856  ;;  %v1230_v45 = vmul.f32 %v3190_v13, %v1201_v29  ;;  %v1229_v49 = vmul.f32 %v1210_v4, %v1201_v29  ;;  %v1212_v31 = vmul.f32 %v1210_v4, %v1194_v23  ;;  %v1225_v14 = vmul.f32 %v3135_v26, %v1194_v23 }
 0x133   :  { %v1228_v25 = vmul.f32 %v1210_v4, %v1200_v8  ;;  %v1231_v62 = vmul.f32 %v3135_v26, %v1200_v8 }
 0x134   :  { %v1227_v41 = vadd.f32 %v1225_v14, %v1213_v44  ;;  %v1226_v43 = vadd.f32 %v1224_v19, %v1212_v31 }
 0x135   :  { %v1233_v15 = vadd.f32 %v1231_v62, %v1229_v49  ;;  %v1232_v22 = vadd.f32 %v1230_v45, %v1228_v25 }
 0x136   :  { %v3305_v18 = vpop.permute.xlu1 %1861  ;;  %v1239_v9 = vrot.slane %v1227_v41, 4  ;;  %v1238_v36 = vrot.slane %v1226_v43, 4  ;;  %v1271_v49 = vmul.f32 %v1269_v56, %v1226_v43 }
 0x137   :  { %v1254_v55 = vrot.slane %v1233_v15, 4  ;;  %v1253_v30 = vrot.slane %v1232_v22, 4 }
 0x138   :  { %v1240_v13 = vsel %vm1021_vm7, %v1238_v36, %v1239_v9  ;;  %v1244_v48 = vsel %vm1021_vm7, %v1239_v9, %v1238_v36  ;;  %v2363_v9 = vld [vmem:[%s3609_s2] sm:$0x1]  ;;  %v1272_v36 = vmul.f32 %v1269_v56, %v1227_v41 }
 0x139   :  { %v1255_v4 = vsel %vm1021_vm7, %v1253_v30, %v1254_v55  ;;  %v1259_v26 = vsel %vm1021_vm7, %v1254_v55, %v1253_v30  ;;  %v1246_v24 = vsub.f32 %v1240_v13, %v1244_v48  ;;  %v1245_v57 = vsub.f32 %v1244_v48, %v1240_v13  ;;  %v2372_v55 = vld [vmem:[%s3609_s2 + $0x1] sm:$0x1]  ;;  %2366 = vperm.xlu1 %2529, %v2363_v9   ;;  %s2467_s2 = spop %2466 }
 0x13a   :  { %v1261_v2 = vsub.f32 %v1255_v4, %v1259_v26  ;;  %v1260_v29 = vsub.f32 %v1259_v26, %v1255_v4  ;;  %v1287_v30 = vmul.f32 %v1269_v56, %v1232_v22  ;;  %2375 = vperm.xlu0 %2528, %v2372_v55   ;;  %v1342_v54 = vstv %s2467_s2  ;;  %s2469_s12 = spop %2468 }
 0x13b   :  { %v1248_v19 = vmul.f32 %v1246_v24, %v2655_v33  ;;  %v1247_v23 = vmul.f32 %v1245_v57, %v2639_v17  ;;  %v3315_v45 = vpop.permute.xlu1 %1879  ;;  %v1288_v24 = vmul.f32 %v1269_v56, %v1233_v15  ;;  %s2471_s13 = spop %2470 }
 0x13c   :  { %v1263_v44 = vmul.f32 %v1261_v2, %v2655_v33  ;;  %v1262_v8 = vmul.f32 %v1260_v29, %v2639_v17  ;;  %v3323_v2 = vpop.permute.xlu0 %1651 }
 0x13d   :  { %v1250_v31 = vadd.f32 %v1248_v19, %v1244_v48  ;;  %v1249_v25 = vadd.f32 %v1247_v23, %v1240_v13 }
 0x13e   :  { %v1265_v14 = vadd.f32 %v1263_v44, %v1259_v26  ;;  %v1264_v62 = vadd.f32 %v1262_v8, %v1255_v4 }
 0x13f   :  { %v1284_v43 = vmul.f32 %v3141_v11, %v1250_v31  ;;  %v1283_v48 = vmul.f32 %v3199_v34, %v1249_v25  ;;  %v3329_v44 = vpop.permute.xlu1 %1885 }
 0x140   :  { %v1290_v13 = vmul.f32 %v3141_v11, %v1265_v14  ;;  %v1289_v4 = vmul.f32 %v3199_v34, %v1264_v62  ;;  %v3331_v41 = vpop.permute.xlu0 %1710 }
 0x141   :  { %v1286_v26 = vadd.f32 %v1284_v43, %v1272_v36  ;;  %v1285_v29 = vadd.f32 %v1283_v48, %v1271_v49 }
 0x142   :  { %v1292_v57 = vadd.f32 %v1290_v13, %v1288_v24  ;;  %v1291_v19 = vadd.f32 %v1289_v4, %v1287_v30 }
 0x143   :  { %v1298_v15 = vrot.slane %v1286_v26, 2  ;;  %v1304_v22 = vrot.slane %v1286_v26, 6  ;;  %v1297_v8 = vrot.slane %v1285_v29, 2  ;;  %v1306_v31 = vrot.slane %v1285_v29, 6  ;;  %v2133_v43 = vpop.permute.xlu1 %2132 }
 0x144   :  { %v1320_v56 = vrot.slane %v1292_v57, 2  ;;  %v1326_v23 = vrot.slane %v1292_v57, 6  ;;  %v1319_v9 = vrot.slane %v1291_v19, 2  ;;  %v1328_v11 = vrot.slane %v1291_v19, 6  ;;  %v3337_v62 = vpop.permute.xlu0 %1788  ;;  %2480 = vpush %v2133_v43 }
 0x145   :  { %v1299_v14 = vsel %vm1072_vm8, %v1297_v8, %v1298_v15  ;;  %v1310_v34 = vsel %vm1082_vm9, %v1304_v22, %v1306_v31  ;;  %v1303_v30 = vsel %vm1072_vm8, %v1298_v15, %v1297_v8  ;;  %v1307_v24 = vsel %vm1082_vm9, %v1306_v31, %v1304_v22 }
 0x146   :  { %v1321_v25 = vsel %vm1072_vm8, %v1319_v9, %v1320_v56  ;;  %v1332_v49 = vsel %vm1082_vm9, %v1326_v23, %v1328_v11  ;;  %v1311_v55 = vsub.f32 %v1310_v34, %v1299_v14  ;;  %v1312_v13 = vsub.f32 %v1307_v24, %v1303_v30 }
 0x147   :  { %v1333_v36 = vsub.f32 %v1332_v49, %v1321_v25  ;;  %v1325_v48 = vsel %vm1072_vm8, %v1320_v56, %v1319_v9  ;;  %v1329_v4 = vsel %vm1082_vm9, %v1328_v11, %v1326_v23  ;;  %v1344_v31 = vmul.f32 %v1342_v54, %v1285_v29 }
 0x148   :  { %v1313_v10 = vmul.f32 %v1311_v55, %v2672_v42  ;;  %v1334_v39 = vsub.f32 %v1329_v4, %v1325_v48  ;;  %v1314_v34 = vmul.f32 %v1312_v13, %v2658_v37  ;;  %v3346_v49 = vpop.permute.xlu0 %1875  ;;  %v1360_v9 = vmul.f32 %v1342_v54, %v1291_v19 }
 0x149   :  { %v1335_v21 = vmul.f32 %v1333_v36, %v2672_v42  ;;  %v1345_v55 = vmul.f32 %v1342_v54, %v1286_v26  ;;  %v1361_v35 = vmul.f32 %v1342_v54, %v1292_v57 }
 0x14a   :  { %v1315_v15 = vadd.f32 %v1313_v10, %v1299_v14  ;;  %v1336_v22 = vmul.f32 %v1334_v39, %v2658_v37  ;;  %v1316_v24 = vadd.f32 %v1314_v34, %v1303_v30 }
 0x14b   :  { %v1337_v8 = vadd.f32 %v1335_v21, %v1321_v25 }
 0x14c   :  { %v1356_v56 = vmul.f32 %v3150_v46, %v1315_v15  ;;  %v1338_v11 = vadd.f32 %v1336_v22, %v1325_v48  ;;  %v1357_v36 = vmul.f32 %v3218_v3, %v1316_v24  ;;  %v3353_v21 = vpop.permute.xlu0 %1889 }
 0x14d   :  { %v1362_v23 = vmul.f32 %v3150_v46, %v1337_v8  ;;  %s2473_s14 = spop %2472 }
 0x14e   :  { %v1358_v43 = vadd.f32 %v1356_v56, %v1344_v31  ;;  %v1363_v13 = vmul.f32 %v3218_v3, %v1338_v11  ;;  %v1359_v10 = vadd.f32 %v1357_v36, %v1345_v55  ;;  %v1415_v11 = vstv %s2469_s12 }
 0x14f   :  { %v1364_v4 = vadd.f32 %v1362_v23, %v1360_v9 }
 0x150   :  { %v1370_v39 = vrot.slane %v1358_v43, 1  ;;  %v1379_v29 = vrot.slane %v1358_v43, 7  ;;  %v1365_v30 = vadd.f32 %v1363_v13, %v1361_v35  ;;  %v1371_v34 = vrot.slane %v1359_v10, 1  ;;  %v2206_v8 = vpop.permute.xlu0 %2205 }
 0x151   :  { %v1392_v14 = vrot.slane %v1364_v4, 1  ;;  %v1401_v25 = vrot.slane %v1364_v4, 7  ;;  %v1377_v46 = vrot.slane %v1359_v10, 7  ;;  %2482 = vpush %v2206_v8  ;;  %s2475_s15 = spop %2474 }
 0x152   :  { %v1393_v26 = vrot.slane %v1365_v30, 1  ;;  %v1399_v48 = vrot.slane %v1365_v30, 7  ;;  %v1372_v15 = vsel %vm1138_vm10, %v1370_v39, %v1371_v34  ;;  %v1376_v54 = vsel %vm1138_vm10, %v1371_v34, %v1370_v39  ;;  %s2477_s16 = spop %2476 }
 0x153   :  { %v1383_v19 = vsel %vm1148_vm11, %v1377_v46, %v1379_v29  ;;  %v1380_v3 = vsel %vm1148_vm11, %v1379_v29, %v1377_v46  ;;  %s2479_s17 = spop %2478 }
 0x154   :  { %v1384_v22 = vsub.f32 %v1383_v19, %v1372_v15  ;;  %v1405_v57 = vsel %vm1148_vm11, %v1399_v48, %v1401_v25  ;;  %v1394_v35 = vsel %vm1138_vm10, %v1392_v14, %v1393_v26  ;;  %v1385_v31 = vsub.f32 %v1380_v3, %v1376_v54 }
 0x155   :  { %v1398_v24 = vsel %vm1138_vm10, %v1393_v26, %v1392_v14  ;;  %v1406_v23 = vsub.f32 %v1405_v57, %v1394_v35  ;;  %v1402_v9 = vsel %vm1148_vm11, %v1401_v25, %v1399_v48  ;;  %v1417_v19 = vmul.f32 %v1415_v11, %v1358_v43 }
 0x156   :  { %v1386_v56 = vmul.f32 %v1384_v22, %v2727_v51  ;;  %v1387_v55 = vmul.f32 %v1385_v31, %v2660_v38  ;;  %v1407_v36 = vsub.f32 %v1402_v9, %v1398_v24  ;;  %v1418_v14 = vmul.f32 %v1415_v11, %v1359_v10 }
 0x157   :  { %v1408_v39 = vmul.f32 %v1406_v23, %v2727_v51  ;;  %v1433_v25 = vmul.f32 %v1415_v11, %v1364_v4  ;;  %v1434_v57 = vmul.f32 %v1415_v11, %v1365_v30 }
 0x158   :  { %v1388_v13 = vadd.f32 %v1386_v56, %v1372_v15  ;;  %v1389_v29 = vadd.f32 %v1387_v55, %v1376_v54  ;;  %v1409_v34 = vmul.f32 %v1407_v36, %v2660_v38  ;;  %v2279_v56 = vpop.permute.xlu1 %2278 }
 0x159   :  { %v1410_v46 = vadd.f32 %v1408_v39, %v1394_v35  ;;  %2484 = vpush %v2279_v56 }
 0x15a   :  { %v1429_v8 = vmul.f32 %v3182_v28, %v1388_v13  ;;  %v1411_v26 = vadd.f32 %v1409_v34, %v1398_v24  ;;  %v1430_v22 = vmul.f32 %v3193_v20, %v1389_v29 }
 0x15b   :  { %v1435_v48 = vmul.f32 %v3182_v28, %v1410_v46 }
 0x15c   :  { %v1431_v3 = vadd.f32 %v1429_v8, %v1417_v19  ;;  %v1432_v31 = vadd.f32 %v1430_v22, %v1418_v14  ;;  %v1436_v15 = vmul.f32 %v3193_v20, %v1411_v26 }
 0x15d   :  { %v1437_v54 = vadd.f32 %v1435_v48, %v1433_v25 }
 0x15e   :  { %v1449_v23 = vmul.f32 %v3232_v60, %v1431_v3  ;;  %v1465_v43 = vmul.f32 %v3230_v52, %v1431_v3  ;;  %v1438_v35 = vadd.f32 %v1436_v15, %v1434_v57  ;;  %v1450_v10 = vmul.f32 %v3216_v47, %v1432_v31 }
 0x15f   :  { %v1466_v24 = vmul.f32 %v3243_v63, %v1432_v31  ;;  %v1461_v4 = vmul.f32 %v3230_v52, %v1437_v54  ;;  %v1467_v28 = vmul.f32 %v3232_v60, %v1437_v54 }
 0x160   :  { %v1462_v30 = vmul.f32 %v3243_v63, %v1438_v35  ;;  %v1468_v20 = vmul.f32 %v3216_v47, %v1438_v35 }
 0x161   :  { %v1463_v9 = vsub.f32 %v1449_v23, %v1461_v4  ;;  %v1469_v11 = vadd.f32 %v1467_v28, %v1465_v43 }
 0x162   :  { %v1464_v55 = vsub.f32 %v1450_v10, %v1462_v30  ;;  %v1470_v36 = vadd.f32 %v1468_v20, %v1466_v24 }
 0x163   :  { %v1471_v13 = vmul.f32 %v1463_v9, %v3170_v1  ;;  %v1474_v39 = vmul.f32 %v1469_v11, %v3174_v40  ;;  %v1477_v29 = vmul.f32 %v1469_v11, %v3170_v1  ;;  %v1480_v34 = vmul.f32 %v1463_v9, %v3174_v40 }
 0x164   :  { %v1472_v52 = vmul.f32 %v1464_v55, %v3170_v1  ;;  %v1473_v60 = vmul.f32 %v1470_v36, %v3174_v40  ;;  %v1478_v63 = vmul.f32 %v1470_v36, %v3170_v1  ;;  %v1479_v47 = vmul.f32 %v1464_v55, %v3174_v40 }
 0x166   :  { %v1475_v46 = vadd.f32 %v1473_v60, %v1471_v13  ;;  %v1476_v19 = vadd.f32 %v1474_v39, %v1472_v52  ;;  %v1481_v8 = vsub.f32 %v1477_v29, %v1479_v47  ;;  %v1482_v14 = vsub.f32 %v1478_v63, %v1480_v34 }
 0x168   :  { %v1485_v26 = vrot.slane %v1475_v46, 4  ;;  %v1486_v22 = vrot.slane %v1476_v19, 4  ;;  %v1500_v3 = vrot.slane %v1481_v8, 4  ;;  %v1501_v25 = vrot.slane %v1482_v14, 4 }
 0x169   :  { %v1513_v11 = vmul.f32 %v1475_v46, %v3210_v12  ;;  %v1514_v55 = vmul.f32 %v1476_v19, %v3210_v12  ;;  %v1519_v36 = vmul.f32 %v1481_v8, %v3210_v12  ;;  %v1520_v13 = vmul.f32 %v1482_v14, %v3210_v12 }
 0x16a   :  { %v1487_v48 = vsel %vm1021_vm7, %v1485_v26, %v1486_v22  ;;  %v1491_v57 = vsel %vm1021_vm7, %v1486_v22, %v1485_v26  ;;  %v1502_v31 = vsel %vm1021_vm7, %v1500_v3, %v1501_v25  ;;  %v1506_v15 = vsel %vm1021_vm7, %v1501_v25, %v1500_v3 }
 0x16b   :  { %v1492_v56 = vsub.f32 %v1491_v57, %v1487_v48  ;;  %v1493_v54 = vsub.f32 %v1487_v48, %v1491_v57  ;;  %v1507_v23 = vsub.f32 %v1506_v15, %v1502_v31  ;;  %v1508_v43 = vsub.f32 %v1502_v31, %v1506_v15 }
 0x16d   :  { %v1494_v35 = vmul.f32 %v1492_v56, %v2639_v17  ;;  %v1495_v10 = vmul.f32 %v1493_v54, %v2655_v33  ;;  %v1509_v24 = vmul.f32 %v1507_v23, %v2639_v17  ;;  %v1510_v4 = vmul.f32 %v1508_v43, %v2655_v33 }
 0x16f   :  { %v1496_v28 = vadd.f32 %v1494_v35, %v1487_v48  ;;  %v1497_v30 = vadd.f32 %v1495_v10, %v1491_v57  ;;  %v1511_v20 = vadd.f32 %v1509_v24, %v1502_v31  ;;  %v1512_v9 = vadd.f32 %v1510_v4, %v1506_v15 }
 0x171   :  { %v1515_v39 = vmul.f32 %v1511_v20, %v3214_v61  ;;  %v1516_v29 = vmul.f32 %v1512_v9, %v3214_v61  ;;  %v1521_v34 = vmul.f32 %v1496_v28, %v3214_v61  ;;  %v1522_v52 = vmul.f32 %v1497_v30, %v3214_v61 }
 0x173   :  { %v1517_v60 = vadd.f32 %v1515_v39, %v1513_v11  ;;  %v1518_v63 = vadd.f32 %v1516_v29, %v1514_v55  ;;  %v1523_v47 = vsub.f32 %v1519_v36, %v1521_v34  ;;  %v1524_v26 = vsub.f32 %v1520_v13, %v1522_v52 }
 0x175   :  { %v1527_v22 = vrot.slane %v1517_v60, 2  ;;  %v1528_v46 = vrot.slane %v1518_v63, 2  ;;  %v1534_v3 = vrot.slane %v1518_v63, 6  ;;  %v1536_v19 = vrot.slane %v1517_v60, 6  ;;  %s2481_s18 = spop %2480 }
 0x176   :  { %v1549_v25 = vrot.slane %v1523_v47, 2  ;;  %v1550_v8 = vrot.slane %v1524_v26, 2  ;;  %v1556_v48 = vrot.slane %v1524_v26, 6  ;;  %v1558_v14 = vrot.slane %v1523_v47, 6 }
 0x177   :  { %v1529_v57 = vsel %vm1072_vm8, %v1527_v22, %v1528_v46  ;;  %v1533_v31 = vsel %vm1072_vm8, %v1528_v46, %v1527_v22  ;;  %v1537_v15 = vsel %vm1082_vm9, %v1536_v19, %v1534_v3  ;;  %v1540_v56 = vsel %vm1082_vm9, %v1534_v3, %v1536_v19 }
 0x178   :  { %v1541_v54 = vsub.f32 %v1540_v56, %v1529_v57  ;;  %v1542_v23 = vsub.f32 %v1537_v15, %v1533_v31  ;;  %v1551_v43 = vsel %vm1072_vm8, %v1549_v25, %v1550_v8  ;;  %v1555_v35 = vsel %vm1072_vm8, %v1550_v8, %v1549_v25 }
 0x179   :  { %v1559_v10 = vsel %vm1082_vm9, %v1558_v14, %v1556_v48  ;;  %v1562_v24 = vsel %vm1082_vm9, %v1556_v48, %v1558_v14  ;;  %v1575_v13 = vmul.f32 %v1523_v47, %v3249_v6  ;;  %v1576_v39 = vmul.f32 %v1524_v26, %v3249_v6 }
 0x17a   :  { %v1543_v4 = vmul.f32 %v1541_v54, %v2672_v42  ;;  %v1544_v28 = vmul.f32 %v1542_v23, %v2658_v37  ;;  %v1563_v30 = vsub.f32 %v1562_v24, %v1551_v43  ;;  %v1564_v20 = vsub.f32 %v1559_v10, %v1555_v35 }
 0x17b   :  { %v1569_v46 = vmul.f32 %v1517_v60, %v3249_v6  ;;  %v1570_v3 = vmul.f32 %v1518_v63, %v3249_v6 }
 0x17c   :  { %v1545_v9 = vadd.f32 %v1543_v4, %v1529_v57  ;;  %v1546_v11 = vadd.f32 %v1544_v28, %v1533_v31  ;;  %v1565_v55 = vmul.f32 %v1563_v30, %v2672_v42  ;;  %v1566_v36 = vmul.f32 %v1564_v20, %v2658_v37 }
 0x17e   :  { %v1567_v29 = vadd.f32 %v1565_v55, %v1551_v43  ;;  %v1568_v34 = vadd.f32 %v1566_v36, %v1555_v35  ;;  %v1577_v52 = vmul.f32 %v1545_v9, %v3253_v27  ;;  %v1578_v22 = vmul.f32 %v1546_v11, %v3253_v27 }
 0x180   :  { %v1571_v19 = vmul.f32 %v1567_v29, %v3253_v27  ;;  %v1572_v25 = vmul.f32 %v1568_v34, %v3253_v27  ;;  %v1579_v8 = vsub.f32 %v1575_v13, %v1577_v52  ;;  %v1580_v48 = vsub.f32 %v1576_v39, %v1578_v22 }
 0x182   :  { %v1573_v14 = vadd.f32 %v1571_v19, %v1569_v46  ;;  %v1574_v47 = vadd.f32 %v1572_v25, %v1570_v3  ;;  %v1605_v57 = vrot.slane %v1579_v8, 1  ;;  %v1606_v26 = vrot.slane %v1580_v48, 1  ;;  %s2483_s19 = spop %2482 }
 0x183   :  { %v1612_v31 = vrot.slane %v1580_v48, 7  ;;  %v1614_v15 = vrot.slane %v1579_v8, 7  ;;  %v1631_v25 = vmul.f32 %v1579_v8, %v3177_v5 }
 0x184   :  { %v1583_v56 = vrot.slane %v1573_v14, 1  ;;  %v1584_v54 = vrot.slane %v1574_v47, 1  ;;  %v1590_v23 = vrot.slane %v1574_v47, 7  ;;  %v1592_v43 = vrot.slane %v1573_v14, 7 }
 0x185   :  { %v1607_v60 = vsel %vm1138_vm10, %v1605_v57, %v1606_v26  ;;  %v1618_v63 = vsel %vm1148_vm11, %v1612_v31, %v1614_v15  ;;  %v1611_v35 = vsel %vm1138_vm10, %v1606_v26, %v1605_v57  ;;  %v1615_v9 = vsel %vm1148_vm11, %v1614_v15, %v1612_v31 }
 0x186   :  { %v1585_v10 = vsel %vm1138_vm10, %v1583_v56, %v1584_v54  ;;  %v1596_v24 = vsel %vm1148_vm11, %v1590_v23, %v1592_v43  ;;  %v1619_v4 = vsub.f32 %v1618_v63, %v1607_v60  ;;  %v1589_v28 = vsel %vm1138_vm10, %v1584_v54, %v1583_v56 }
 0x187   :  { %v1597_v30 = vsub.f32 %v1596_v24, %v1585_v10  ;;  %v1593_v20 = vsel %vm1148_vm11, %v1592_v43, %v1590_v23  ;;  %v1620_v36 = vsub.f32 %v1615_v9, %v1611_v35  ;;  %v1625_v22 = vmul.f32 %v1573_v14, %v3177_v5 }
 0x188   :  { %v1621_v11 = vmul.f32 %v1619_v4, %v2727_v51  ;;  %v1598_v55 = vsub.f32 %v1593_v20, %v1589_v28  ;;  %v1632_v26 = vmul.f32 %v1580_v48, %v3177_v5  ;;  %v1645_v31 = vstv %s2471_s13 }
 0x189   :  { %v1599_v13 = vmul.f32 %v1597_v30, %v2727_v51  ;;  %v1622_v34 = vmul.f32 %v1620_v36, %v2660_v38  ;;  %v1626_v56 = vmul.f32 %v1574_v47, %v3177_v5 }
 0x18a   :  { %v1623_v39 = vadd.f32 %v1621_v11, %v1607_v60  ;;  %v1600_v29 = vmul.f32 %v1598_v55, %v2660_v38  ;;  %s2485_s20 = spop %2484 }
 0x18b   :  { %v1601_v52 = vadd.f32 %v1599_v13, %v1585_v10  ;;  %v1624_v19 = vadd.f32 %v1622_v34, %v1611_v35 }
 0x18c   :  { %v1627_v46 = vmul.f32 %v1623_v39, %v3180_v50  ;;  %v1602_v3 = vadd.f32 %v1600_v29, %v1589_v28 }
 0x18d   :  { %v1633_v57 = vmul.f32 %v1601_v52, %v3180_v50  ;;  %v1628_v54 = vmul.f32 %v1624_v19, %v3180_v50 }
 0x18e   :  { %v1629_v15 = vadd.f32 %v1627_v46, %v1625_v22  ;;  %v1634_v23 = vmul.f32 %v1602_v3, %v3180_v50  ;;  %v1704_v3 = vstv %s2473_s14 }
 0x18f   :  { %v1635_v43 = vsub.f32 %v1631_v25, %v1633_v57  ;;  %v1630_v60 = vadd.f32 %v1628_v54, %v1626_v56 }
 0x190   :  { %v1660_v14 = vmul.f32 %v3272_v59, %v1629_v15  ;;  %v1636_v63 = vsub.f32 %v1632_v26, %v1634_v23  ;;  %v1647_v35 = vmul.f32 %v1645_v31, %v1629_v15 }
 0x191   :  { %v1666_v8 = vmul.f32 %v3272_v59, %v1635_v43  ;;  %v1663_v10 = vmul.f32 %v1645_v31, %v1635_v43  ;;  %v1659_v24 = vmul.f32 %v3323_v2, %v1630_v60  ;;  %v1648_v4 = vmul.f32 %v1645_v31, %v1630_v60 }
 0x192   :  { %v1665_v48 = vmul.f32 %v3323_v2, %v1636_v63  ;;  %v1664_v28 = vmul.f32 %v1645_v31, %v1636_v63 }
 0x193   :  { %v1661_v47 = vadd.f32 %v1659_v24, %v1647_v35  ;;  %v1662_v30 = vadd.f32 %v1660_v14, %v1648_v4 }
 0x194   :  { %v1667_v20 = vadd.f32 %v1665_v48, %v1663_v10  ;;  %v1668_v9 = vadd.f32 %v1666_v8, %v1664_v28 }
 0x195   :  { %v1673_v11 = vrot.slane %v1661_v47, 4  ;;  %v1674_v55 = vrot.slane %v1662_v30, 4  ;;  %v1706_v23 = vmul.f32 %v1704_v3, %v1661_v47  ;;  %v1707_v43 = vmul.f32 %v1704_v3, %v1662_v30 }
 0x196   :  { %v1688_v36 = vrot.slane %v1667_v20, 4  ;;  %v1689_v13 = vrot.slane %v1668_v9, 4  ;;  %v1722_v14 = vmul.f32 %v1704_v3, %v1667_v20  ;;  %v1723_v60 = vmul.f32 %v1704_v3, %v1668_v9 }
 0x197   :  { %v1675_v39 = vsel %vm1021_vm7, %v1673_v11, %v1674_v55  ;;  %v1679_v59 = vsel %vm1021_vm7, %v1674_v55, %v1673_v11 }
 0x198   :  { %v1690_v29 = vsel %vm1021_vm7, %v1688_v36, %v1689_v13  ;;  %v1694_v34 = vsel %vm1021_vm7, %v1689_v13, %v1688_v36  ;;  %v1681_v2 = vsub.f32 %v1675_v39, %v1679_v59  ;;  %v1680_v22 = vsub.f32 %v1679_v59, %v1675_v39 }
 0x199   :  { %v1696_v52 = vsub.f32 %v1690_v29, %v1694_v34  ;;  %v1695_v46 = vsub.f32 %v1694_v34, %v1690_v29 }
 0x19a   :  { %v1683_v19 = vmul.f32 %v1681_v2, %v2655_v33  ;;  %v1682_v57 = vmul.f32 %v1680_v22, %v2639_v17 }
 0x19b   :  { %v1698_v25 = vmul.f32 %v1696_v52, %v2655_v33  ;;  %v1697_v26 = vmul.f32 %v1695_v46, %v2639_v17 }
 0x19c   :  { %v1685_v31 = vadd.f32 %v1683_v19, %v1679_v59  ;;  %v1684_v56 = vadd.f32 %v1682_v57, %v1675_v39  ;;  %v1777_v19 = vstv %s2475_s15 }
 0x19d   :  { %v1700_v15 = vadd.f32 %v1698_v25, %v1694_v34  ;;  %v1699_v54 = vadd.f32 %v1697_v26, %v1690_v29 }
 0x19e   :  { %v1719_v63 = vmul.f32 %v3283_v53, %v1685_v31  ;;  %v1718_v8 = vmul.f32 %v3331_v41, %v1684_v56 }
 0x19f   :  { %v1725_v35 = vmul.f32 %v3283_v53, %v1700_v15  ;;  %v1724_v10 = vmul.f32 %v3331_v41, %v1699_v54 }
 0x1a0   :  { %v1721_v24 = vadd.f32 %v1719_v63, %v1707_v43  ;;  %v1720_v4 = vadd.f32 %v1718_v8, %v1706_v23 }
 0x1a1   :  { %v1727_v48 = vadd.f32 %v1725_v35, %v1723_v60  ;;  %v1726_v28 = vadd.f32 %v1724_v10, %v1722_v14 }
 0x1a2   :  { %v1733_v11 = vrot.slane %v1721_v24, 2  ;;  %v1739_v55 = vrot.slane %v1721_v24, 6  ;;  %v1732_v47 = vrot.slane %v1720_v4, 2  ;;  %v1741_v30 = vrot.slane %v1720_v4, 6 }
 0x1a3   :  { %v1755_v36 = vrot.slane %v1727_v48, 2  ;;  %v1761_v13 = vrot.slane %v1727_v48, 6  ;;  %v1754_v20 = vrot.slane %v1726_v28, 2  ;;  %v1763_v9 = vrot.slane %v1726_v28, 6 }
 0x1a4   :  { %v1734_v39 = vsel %vm1072_vm8, %v1732_v47, %v1733_v11  ;;  %v1745_v53 = vsel %vm1082_vm9, %v1739_v55, %v1741_v30  ;;  %v1738_v2 = vsel %vm1072_vm8, %v1733_v11, %v1732_v47  ;;  %v1742_v52 = vsel %vm1082_vm9, %v1741_v30, %v1739_v55 }
 0x1a5   :  { %v1756_v59 = vsel %vm1072_vm8, %v1754_v20, %v1755_v36  ;;  %v1767_v41 = vsel %vm1082_vm9, %v1761_v13, %v1763_v9  ;;  %v1746_v29 = vsub.f32 %v1745_v53, %v1734_v39  ;;  %v1747_v22 = vsub.f32 %v1742_v52, %v1738_v2 }
 0x1a6   :  { %v1768_v34 = vsub.f32 %v1767_v41, %v1756_v59  ;;  %v1760_v46 = vsel %vm1072_vm8, %v1755_v36, %v1754_v20  ;;  %v1764_v3 = vsel %vm1082_vm9, %v1763_v9, %v1761_v13  ;;  %v1779_v23 = vmul.f32 %v1777_v19, %v1720_v4 }
 0x1a7   :  { %v1748_v25 = vmul.f32 %v1746_v29, %v2672_v42  ;;  %v1769_v26 = vsub.f32 %v1764_v3, %v1760_v46  ;;  %v1749_v31 = vmul.f32 %v1747_v22, %v2658_v37  ;;  %v1795_v14 = vmul.f32 %v1777_v19, %v1726_v28 }
 0x1a8   :  { %v1770_v57 = vmul.f32 %v1768_v34, %v2672_v42  ;;  %v1780_v8 = vmul.f32 %v1777_v19, %v1721_v24  ;;  %v1796_v13 = vmul.f32 %v1777_v19, %v1727_v48  ;;  %v1850_v19 = vstv %s2477_s16 }
 0x1a9   :  { %v1750_v15 = vadd.f32 %v1748_v25, %v1734_v39  ;;  %v1771_v54 = vmul.f32 %v1769_v26, %v2658_v37  ;;  %v1751_v43 = vadd.f32 %v1749_v31, %v1738_v2 }
 0x1aa   :  { %v1772_v56 = vadd.f32 %v1770_v57, %v1756_v59 }
 0x1ab   :  { %v1791_v60 = vmul.f32 %v3289_v32, %v1750_v15  ;;  %v1773_v35 = vadd.f32 %v1771_v54, %v1760_v46  ;;  %v1792_v10 = vmul.f32 %v3337_v62, %v1751_v43 }
 0x1ac   :  { %v1797_v63 = vmul.f32 %v3289_v32, %v1772_v56 }
 0x1ad   :  { %v1793_v11 = vadd.f32 %v1791_v60, %v1779_v23  ;;  %v1798_v36 = vmul.f32 %v3337_v62, %v1773_v35  ;;  %v1794_v47 = vadd.f32 %v1792_v10, %v1780_v8 }
 0x1ae   :  { %v1799_v55 = vadd.f32 %v1797_v63, %v1795_v14 }
 0x1af   :  { %v1805_v30 = vrot.slane %v1793_v11, 1  ;;  %v1814_v20 = vrot.slane %v1793_v11, 7  ;;  %v1800_v39 = vadd.f32 %v1798_v36, %v1796_v13  ;;  %v1806_v28 = vrot.slane %v1794_v47, 1 }
 0x1b0   :  { %v1827_v9 = vrot.slane %v1799_v55, 1  ;;  %v1836_v4 = vrot.slane %v1799_v55, 7  ;;  %v1812_v53 = vrot.slane %v1794_v47, 7  ;;  %v1852_v23 = vmul.f32 %v1850_v19, %v1793_v11 }
 0x1b1   :  { %v1828_v59 = vrot.slane %v1800_v39, 1  ;;  %v1834_v41 = vrot.slane %v1800_v39, 7  ;;  %v1811_v32 = vsel %vm1138_vm10, %v1806_v28, %v1805_v30  ;;  %v1807_v29 = vsel %vm1138_vm10, %v1805_v30, %v1806_v28 }
 0x1b2   :  { %v1815_v24 = vsel %vm1148_vm11, %v1814_v20, %v1812_v53  ;;  %v1818_v62 = vsel %vm1148_vm11, %v1812_v53, %v1814_v20  ;;  %v1853_v14 = vmul.f32 %v1850_v19, %v1794_v47  ;;  %v1869_v8 = vmul.f32 %v1850_v19, %v1800_v39 }
 0x1b3   :  { %v1820_v48 = vsub.f32 %v1815_v24, %v1811_v32  ;;  %v1833_v34 = vsel %vm1138_vm10, %v1828_v59, %v1827_v9  ;;  %v1837_v2 = vsel %vm1148_vm11, %v1836_v4, %v1834_v41  ;;  %v1819_v52 = vsub.f32 %v1818_v62, %v1807_v29 }
 0x1b4   :  { %v1842_v22 = vsub.f32 %v1837_v2, %v1833_v34  ;;  %v1829_v46 = vsel %vm1138_vm10, %v1827_v9, %v1828_v59  ;;  %v1840_v3 = vsel %vm1148_vm11, %v1834_v41, %v1836_v4  ;;  %v1868_v36 = vmul.f32 %v1850_v19, %v1799_v55 }
 0x1b5   :  { %v1822_v25 = vmul.f32 %v1820_v48, %v2660_v38  ;;  %v1821_v57 = vmul.f32 %v1819_v52, %v2727_v51  ;;  %v1841_v26 = vsub.f32 %v1840_v3, %v1829_v46 }
 0x1b6   :  { %v1844_v31 = vmul.f32 %v1842_v22, %v2660_v38 }
 0x1b7   :  { %v1824_v15 = vadd.f32 %v1822_v25, %v1811_v32  ;;  %v1823_v56 = vadd.f32 %v1821_v57, %v1807_v29  ;;  %v1843_v54 = vmul.f32 %v1841_v26, %v2727_v51 }
 0x1b8   :  { %v1846_v43 = vadd.f32 %v1844_v31, %v1833_v34 }
 0x1b9   :  { %v1865_v60 = vmul.f32 %v3305_v18, %v1824_v15  ;;  %v1845_v63 = vadd.f32 %v1843_v54, %v1829_v46  ;;  %v1864_v35 = vmul.f32 %v3300_v58, %v1823_v56 }
 0x1ba   :  { %v1871_v10 = vmul.f32 %v3305_v18, %v1846_v43 }
 0x1bb   :  { %v1867_v13 = vadd.f32 %v1865_v60, %v1853_v14  ;;  %v1866_v30 = vadd.f32 %v1864_v35, %v1852_v23  ;;  %v1870_v20 = vmul.f32 %v3300_v58, %v1845_v63 }
 0x1bc   :  { %v1873_v9 = vadd.f32 %v1871_v10, %v1869_v8 }
 0x1bd   :  { %v1883_v4 = vmul.f32 %v3315_v45, %v1867_v13  ;;  %v1872_v28 = vadd.f32 %v1870_v20, %v1868_v36  ;;  %v1882_v11 = vmul.f32 %v3346_v49, %v1866_v30  ;;  %v1896_v47 = vmul.f32 %v3329_v44, %v1866_v30 }
 0x1be   :  { %v1899_v53 = vmul.f32 %v3315_v45, %v1873_v9  ;;  %v1893_v59 = vmul.f32 %v3353_v21, %v1873_v9  ;;  %v1897_v39 = vmul.f32 %v3353_v21, %v1867_v13 }
 0x1bf   :  { %v1898_v18 = vmul.f32 %v3346_v49, %v1872_v28  ;;  %v1892_v55 = vmul.f32 %v3329_v44, %v1872_v28 }
 0x1c0   :  { %v1895_v41 = vsub.f32 %v1883_v4, %v1893_v59  ;;  %v1901_v58 = vadd.f32 %v1899_v53, %v1897_v39 }
 0x1c1   :  { %v1894_v32 = vsub.f32 %v1882_v11, %v1892_v55  ;;  %v1900_v24 = vadd.f32 %v1898_v18, %v1896_v47 }
 0x1c2   :  { %v1903_v29 = vmul.f32 %v1895_v41, %v3170_v1  ;;  %v1904_v62 = vmul.f32 %v1901_v58, %v3174_v40  ;;  %v1909_v48 = vmul.f32 %v1901_v58, %v3170_v1  ;;  %v1910_v45 = vmul.f32 %v1895_v41, %v3174_v40 }
 0x1c3   :  { %v1902_v34 = vmul.f32 %v1894_v32, %v3170_v1  ;;  %v1905_v21 = vmul.f32 %v1900_v24, %v3174_v40  ;;  %v1908_v49 = vmul.f32 %v1900_v24, %v3170_v1  ;;  %v1911_v44 = vmul.f32 %v1894_v32, %v3174_v40 }
 0x1c5   :  { %v1906_v2 = vadd.f32 %v1904_v62, %v1902_v34  ;;  %v1907_v52 = vadd.f32 %v1905_v21, %v1903_v29  ;;  %v1912_v22 = vsub.f32 %v1908_v49, %v1910_v45  ;;  %v1913_v46 = vsub.f32 %v1909_v48, %v1911_v44 }
 0x1c7   :  { %v1916_v3 = vrot.slane %v1906_v2, 4  ;;  %v1917_v19 = vrot.slane %v1907_v52, 4  ;;  %v1931_v25 = vrot.slane %v1912_v22, 4  ;;  %v1932_v57 = vrot.slane %v1913_v46, 4 }
 0x1c8   :  { %v1944_v13 = vmul.f32 %v1906_v2, %v3210_v12  ;;  %v1945_v30 = vmul.f32 %v1907_v52, %v3210_v12  ;;  %v1950_v20 = vmul.f32 %v1912_v22, %v3210_v12  ;;  %v1951_v9 = vmul.f32 %v1913_v46, %v3210_v12 }
 0x1c9   :  { %v1918_v26 = vsel %vm1021_vm7, %v1916_v3, %v1917_v19  ;;  %v1922_v31 = vsel %vm1021_vm7, %v1917_v19, %v1916_v3  ;;  %v1933_v15 = vsel %vm1021_vm7, %v1931_v25, %v1932_v57  ;;  %v1937_v56 = vsel %vm1021_vm7, %v1932_v57, %v1931_v25 }
 0x1ca   :  { %v1923_v54 = vsub.f32 %v1922_v31, %v1918_v26  ;;  %v1924_v1 = vsub.f32 %v1918_v26, %v1922_v31  ;;  %v1938_v23 = vsub.f32 %v1937_v56, %v1933_v15  ;;  %v1939_v40 = vsub.f32 %v1933_v15, %v1937_v56 }
 0x1cc   :  { %v1925_v43 = vmul.f32 %v1923_v54, %v2639_v17  ;;  %v1926_v14 = vmul.f32 %v1924_v1, %v2655_v33  ;;  %v1940_v60 = vmul.f32 %v1938_v23, %v2639_v17  ;;  %v1941_v63 = vmul.f32 %v1939_v40, %v2655_v33 }
 0x1ce   :  { %v1927_v35 = vadd.f32 %v1925_v43, %v1918_v26  ;;  %v1928_v8 = vadd.f32 %v1926_v14, %v1922_v31  ;;  %v1942_v10 = vadd.f32 %v1940_v60, %v1933_v15  ;;  %v1943_v36 = vadd.f32 %v1941_v63, %v1937_v56 }
 0x1d0   :  { %v1946_v4 = vmul.f32 %v1942_v10, %v3214_v61  ;;  %v1947_v28 = vmul.f32 %v1943_v36, %v3214_v61  ;;  %v1952_v11 = vmul.f32 %v1927_v35, %v3214_v61  ;;  %v1953_v47 = vmul.f32 %v1928_v8, %v3214_v61 }
 0x1d2   :  { %v1948_v53 = vadd.f32 %v1946_v4, %v1944_v13  ;;  %v1949_v59 = vadd.f32 %v1947_v28, %v1945_v30  ;;  %v1954_v39 = vsub.f32 %v1950_v20, %v1952_v11  ;;  %v1955_v18 = vsub.f32 %v1951_v9, %v1953_v47 }
 0x1d4   :  { %v1958_v55 = vrot.slane %v1948_v53, 2  ;;  %v1959_v41 = vrot.slane %v1949_v59, 2  ;;  %v1965_v58 = vrot.slane %v1949_v59, 6  ;;  %v1967_v32 = vrot.slane %v1948_v53, 6 }
 0x1d5   :  { %v1980_v24 = vrot.slane %v1954_v39, 2  ;;  %v1981_v29 = vrot.slane %v1955_v18, 2  ;;  %v1987_v62 = vrot.slane %v1955_v18, 6  ;;  %v1989_v12 = vrot.slane %v1954_v39, 6 }
 0x1d6   :  { %v1964_v48 = vsel %vm1072_vm8, %v1959_v41, %v1958_v55  ;;  %v1968_v45 = vsel %vm1082_vm9, %v1967_v32, %v1965_v58  ;;  %v1960_v52 = vsel %vm1072_vm8, %v1958_v55, %v1959_v41  ;;  %v1971_v46 = vsel %vm1082_vm9, %v1965_v58, %v1967_v32 }
 0x1d7   :  { %v1973_v34 = vsub.f32 %v1968_v45, %v1964_v48  ;;  %v1982_v21 = vsel %vm1072_vm8, %v1980_v24, %v1981_v29  ;;  %v1986_v61 = vsel %vm1072_vm8, %v1981_v29, %v1980_v24  ;;  %v1990_v49 = vsel %vm1082_vm9, %v1989_v12, %v1987_v62 }
 0x1d8   :  { %v1993_v44 = vsel %vm1082_vm9, %v1987_v62, %v1989_v12  ;;  %v1995_v2 = vsub.f32 %v1990_v49, %v1986_v61  ;;  %v1972_v19 = vsub.f32 %v1971_v46, %v1960_v52  ;;  %v2007_v56 = vmul.f32 %v1955_v18, %v3249_v6 }
 0x1d9   :  { %v1994_v22 = vsub.f32 %v1993_v44, %v1982_v21  ;;  %v1975_v3 = vmul.f32 %v1973_v34, %v2658_v37  ;;  %v2001_v23 = vmul.f32 %v1949_v59, %v3249_v6  ;;  %v2000_v14 = vmul.f32 %v1948_v53, %v3249_v6 }
 0x1da   :  { %v1997_v25 = vmul.f32 %v1995_v2, %v2658_v37  ;;  %v1974_v31 = vmul.f32 %v1972_v19, %v2672_v42  ;;  %v2006_v8 = vmul.f32 %v1954_v39, %v3249_v6  ;;  %v2088_v19 = vpop.permute.xlu1 %2087 }
 0x1db   :  { %v1977_v57 = vadd.f32 %v1975_v3, %v1964_v48  ;;  %v1996_v26 = vmul.f32 %v1994_v22, %v2672_v42  ;;  %v2076_v3 = vstv %s2479_s17 }
 0x1dc   :  { %v1999_v15 = vadd.f32 %v1997_v25, %v1986_v61  ;;  %v1976_v40 = vadd.f32 %v1974_v31, %v1960_v52 }
 0x1dd   :  { %v1998_v54 = vadd.f32 %v1996_v26, %v1982_v21  ;;  %v2009_v1 = vmul.f32 %v1977_v57, %v3253_v27 }
 0x1de   :  { %v2003_v43 = vmul.f32 %v1999_v15, %v3253_v27  ;;  %v2008_v10 = vmul.f32 %v1976_v40, %v3253_v27 }
 0x1df   :  { %v2002_v60 = vmul.f32 %v1998_v54, %v3253_v27  ;;  %v2011_v63 = vsub.f32 %v2007_v56, %v2009_v1  ;;  %v2083_v54 = vpop.permute.xlu0 %2082 }
 0x1e0   :  { %v2005_v35 = vadd.f32 %v2003_v43, %v2001_v23  ;;  %v2010_v13 = vsub.f32 %v2006_v8, %v2008_v10 }
 0x1e1   :  { %v2004_v36 = vadd.f32 %v2002_v60, %v2000_v14  ;;  %v2037_v9 = vrot.slane %v2011_v63, 1  ;;  %v2043_v11 = vrot.slane %v2011_v63, 7  ;;  %v2063_v44 = vmul.f32 %v2011_v63, %v3177_v5 }
 0x1e2   :  { %v2015_v30 = vrot.slane %v2005_v35, 1  ;;  %v2021_v20 = vrot.slane %v2005_v35, 7  ;;  %v2036_v47 = vrot.slane %v2010_v13, 1  ;;  %v2045_v59 = vrot.slane %v2010_v13, 7 }
 0x1e3   :  { %v2014_v4 = vrot.slane %v2004_v36, 1  ;;  %v2023_v28 = vrot.slane %v2004_v36, 7  ;;  %v2062_v49 = vmul.f32 %v2010_v13, %v3177_v5  ;;  %v2056_v25 = vmul.f32 %v2004_v36, %v3177_v5 }
 0x1e4   :  { %v2038_v41 = vsel %vm1138_vm10, %v2036_v47, %v2037_v9  ;;  %v2042_v58 = vsel %vm1138_vm10, %v2037_v9, %v2036_v47  ;;  %v2046_v32 = vsel %vm1148_vm11, %v2045_v59, %v2043_v11  ;;  %v2049_v24 = vsel %vm1148_vm11, %v2043_v11, %v2045_v59 }
 0x1e5   :  { %v2016_v53 = vsel %vm1138_vm10, %v2014_v4, %v2015_v30  ;;  %v2020_v18 = vsel %vm1138_vm10, %v2015_v30, %v2014_v4  ;;  %v2024_v55 = vsel %vm1148_vm11, %v2023_v28, %v2021_v20  ;;  %v2027_v6 = vsel %vm1148_vm11, %v2021_v20, %v2023_v28 }
 0x1e6   :  { %v2028_v39 = vsub.f32 %v2027_v6, %v2016_v53  ;;  %v2029_v27 = vsub.f32 %v2024_v55, %v2020_v18  ;;  %v2050_v12 = vsub.f32 %v2049_v24, %v2038_v41  ;;  %v2051_v48 = vsub.f32 %v2046_v32, %v2042_v58  ;;  %v2142_v6 = vpop.permute.xlu1 %2141  ;;  %v2147_v32 = vpop.permute.xlu0 %2146 }
 0x1e7   :  { %v2057_v57 = vmul.f32 %v2005_v35, %v3177_v5 }
 0x1e8   :  { %v2030_v29 = vmul.f32 %v2028_v39, %v2727_v51  ;;  %v2031_v62 = vmul.f32 %v2029_v27, %v2660_v38  ;;  %v2052_v21 = vmul.f32 %v2050_v12, %v2727_v51  ;;  %v2053_v61 = vmul.f32 %v2051_v48, %v2660_v38 }
 0x1ea   :  { %v2032_v45 = vadd.f32 %v2030_v29, %v2016_v53  ;;  %v2033_v34 = vadd.f32 %v2031_v62, %v2020_v18  ;;  %v2054_v2 = vadd.f32 %v2052_v21, %v2038_v41  ;;  %v2055_v52 = vadd.f32 %v2053_v61, %v2042_v58 }
 0x1eb   :  { %v2135_v53 = vstv %s2481_s18 }
 0x1ec   :  { %v2064_v22 = vmul.f32 %v2032_v45, %v3180_v50  ;;  %v2065_v46 = vmul.f32 %v2033_v34, %v3180_v50  ;;  %v2058_v26 = vmul.f32 %v2054_v2, %v3180_v50  ;;  %v2059_v31 = vmul.f32 %v2055_v52, %v3180_v50 }
 0x1ee   :  { %v2066_v15 = vsub.f32 %v2062_v49, %v2064_v22  ;;  %v2067_v56 = vsub.f32 %v2063_v44, %v2065_v46  ;;  %v2060_v1 = vadd.f32 %v2058_v26, %v2056_v25  ;;  %v2061_v23 = vadd.f32 %v2059_v31, %v2057_v57 }
 0x1f0   :  { %v2095_v40 = vmul.f32 %v2076_v3, %v2067_v56  ;;  %v2097_v43 = vmul.f32 %v2088_v19, %v2066_v15  ;;  %v2094_v14 = vmul.f32 %v2076_v3, %v2066_v15  ;;  %v2096_v60 = vmul.f32 %v2083_v54, %v2067_v56 }
 0x1f1   :  { %v2079_v63 = vmul.f32 %v2076_v3, %v2061_v23  ;;  %v2091_v8 = vmul.f32 %v2088_v19, %v2060_v1  ;;  %v2078_v13 = vmul.f32 %v2076_v3, %v2060_v1  ;;  %v2090_v36 = vmul.f32 %v2083_v54, %v2061_v23  ;;  %v2215_v19 = vpop.permute.xlu1 %2214 }
 0x1f2   :  { %v2099_v10 = vadd.f32 %v2097_v43, %v2095_v40  ;;  %v2098_v30 = vadd.f32 %v2096_v60, %v2094_v14 }
 0x1f3   :  { %v2093_v5 = vadd.f32 %v2091_v8, %v2079_v63  ;;  %v2092_v20 = vadd.f32 %v2090_v36, %v2078_v13 }
 0x1f4   :  { %v2120_v35 = vrot.slane %v2099_v10, 4  ;;  %v2119_v9 = vrot.slane %v2098_v30, 4  ;;  %v2153_v48 = vmul.f32 %v2135_v53, %v2098_v30  ;;  %v2154_v45 = vmul.f32 %v2135_v53, %v2099_v10 }
 0x1f5   :  { %v2105_v50 = vrot.slane %v2093_v5, 4  ;;  %v2104_v4 = vrot.slane %v2092_v20, 4  ;;  %v2137_v44 = vmul.f32 %v2135_v53, %v2092_v20  ;;  %v2138_v2 = vmul.f32 %v2135_v53, %v2093_v5  ;;  %v2220_v63 = vpop.permute.xlu1 %2219 }
 0x1f6   :  { %v2121_v28 = vsel %vm1021_vm7, %v2119_v9, %v2120_v35  ;;  %v2125_v11 = vsel %vm1021_vm7, %v2120_v35, %v2119_v9 }
 0x1f7   :  { %v2126_v47 = vsub.f32 %v2125_v11, %v2121_v28  ;;  %v2127_v59 = vsub.f32 %v2121_v28, %v2125_v11  ;;  %v2106_v18 = vsel %vm1021_vm7, %v2104_v4, %v2105_v50  ;;  %v2110_v55 = vsel %vm1021_vm7, %v2105_v50, %v2104_v4 }
 0x1f8   :  { %v2111_v39 = vsub.f32 %v2110_v55, %v2106_v18  ;;  %v2112_v41 = vsub.f32 %v2106_v18, %v2110_v55  ;;  %v2208_v50 = vstv %s2483_s19 }
 0x1f9   :  { %v2128_v27 = vmul.f32 %v2126_v47, %v2639_v17  ;;  %v2129_v58 = vmul.f32 %v2127_v59, %v2655_v33 }
 0x1fa   :  { %v2113_v24 = vmul.f32 %v2111_v39, %v2639_v17  ;;  %v2114_v62 = vmul.f32 %v2112_v41, %v2655_v33 }
 0x1fb   :  { %v2130_v29 = vadd.f32 %v2128_v27, %v2121_v28  ;;  %v2131_v12 = vadd.f32 %v2129_v58, %v2125_v11 }
 0x1fc   :  { %v2115_v34 = vadd.f32 %v2113_v24, %v2106_v18  ;;  %v2116_v61 = vadd.f32 %v2114_v62, %v2110_v55 }
 0x1fd   :  { %v2155_v21 = vmul.f32 %v2142_v6, %v2130_v29  ;;  %v2156_v49 = vmul.f32 %v2147_v32, %v2131_v12 }
 0x1fe   :  { %v2149_v52 = vmul.f32 %v2142_v6, %v2115_v34  ;;  %v2150_v46 = vmul.f32 %v2147_v32, %v2116_v61  ;;  %v2293_v6 = vpop.permute.xlu1 %2292 }
 0x1ff   :  { %v2157_v22 = vadd.f32 %v2155_v21, %v2153_v48  ;;  %v2158_v3 = vadd.f32 %v2156_v49, %v2154_v45 }
 0x200   :  { %v2151_v25 = vadd.f32 %v2149_v52, %v2137_v44  ;;  %v2152_v26 = vadd.f32 %v2150_v46, %v2138_v2 }
 0x201   :  { %v2185_v57 = vrot.slane %v2157_v22, 2  ;;  %v2194_v17 = vrot.slane %v2157_v22, 6  ;;  %v2186_v31 = vrot.slane %v2158_v3, 2  ;;  %v2192_v33 = vrot.slane %v2158_v3, 6 }
 0x202   :  { %v2163_v15 = vrot.slane %v2151_v25, 2  ;;  %v2172_v56 = vrot.slane %v2151_v25, 6  ;;  %v2164_v54 = vrot.slane %v2152_v26, 2  ;;  %v2170_v1 = vrot.slane %v2152_v26, 6  ;;  %v2307_v2 = vpop.permute.xlu1 %2306 }
 0x203   :  { %v2187_v23 = vsel %vm1072_vm8, %v2185_v57, %v2186_v31  ;;  %v2198_v40 = vsel %vm1082_vm9, %v2192_v33, %v2194_v17  ;;  %v2191_v36 = vsel %vm1072_vm8, %v2186_v31, %v2185_v57  ;;  %v2195_v30 = vsel %vm1082_vm9, %v2194_v17, %v2192_v33 }
 0x204   :  { %v2165_v43 = vsel %vm1072_vm8, %v2163_v15, %v2164_v54  ;;  %v2176_v14 = vsel %vm1082_vm9, %v2170_v1, %v2172_v56  ;;  %v2199_v60 = vsub.f32 %v2198_v40, %v2187_v23  ;;  %v2169_v8 = vsel %vm1072_vm8, %v2164_v54, %v2163_v15 }
 0x205   :  { %v2177_v10 = vsub.f32 %v2176_v14, %v2165_v43  ;;  %v2173_v13 = vsel %vm1082_vm9, %v2172_v56, %v2170_v1  ;;  %v2200_v20 = vsub.f32 %v2195_v30, %v2191_v36  ;;  %v2226_v53 = vmul.f32 %v2208_v50, %v2157_v22 }
 0x206   :  { %v2201_v5 = vmul.f32 %v2199_v60, %v2672_v42  ;;  %v2178_v35 = vsub.f32 %v2173_v13, %v2169_v8  ;;  %v2210_v27 = vmul.f32 %v2208_v50, %v2151_v25  ;;  %v2227_v41 = vmul.f32 %v2208_v50, %v2158_v3  ;;  %v2317_v40 = vpop.permute.xlu1 %2316 }
 0x207   :  { %v2179_v9 = vmul.f32 %v2177_v10, %v2672_v42  ;;  %v2202_v11 = vmul.f32 %v2200_v20, %v2658_v37  ;;  %v2211_v58 = vmul.f32 %v2208_v50, %v2152_v26  ;;  %v2288_v26 = vpop.permute.xlu0 %2287  ;;  %v2281_v1 = vstv %s2485_s20 }
 0x208   :  { %v2203_v4 = vadd.f32 %v2201_v5, %v2187_v23  ;;  %v2180_v28 = vmul.f32 %v2178_v35, %v2658_v37 }
 0x209   :  { %v2181_v47 = vadd.f32 %v2179_v9, %v2165_v43  ;;  %v2204_v55 = vadd.f32 %v2202_v11, %v2191_v36 }
 0x20a   :  { %v2228_v59 = vmul.f32 %v2215_v19, %v2203_v4  ;;  %v2182_v18 = vadd.f32 %v2180_v28, %v2169_v8  ;;  %v2321_v11 = vpop.permute.xlu1 %2320 }
 0x20b   :  { %v2222_v39 = vmul.f32 %v2215_v19, %v2181_v47  ;;  %v2229_v29 = vmul.f32 %v2220_v63, %v2204_v55  ;;  %v2311_v9 = vpop.permute.xlu0 %2310 }
 0x20c   :  { %v2230_v32 = vadd.f32 %v2228_v59, %v2226_v53  ;;  %v2223_v24 = vmul.f32 %v2220_v63, %v2182_v18 }
 0x20d   :  { %v2224_v42 = vadd.f32 %v2222_v39, %v2210_v27  ;;  %v2231_v48 = vadd.f32 %v2229_v29, %v2227_v41 }
 0x20e   :  { %v2267_v62 = vrot.slane %v2230_v32, 7  ;;  %v2225_v12 = vadd.f32 %v2223_v24, %v2211_v58  ;;  %v2258_v45 = vrot.slane %v2230_v32, 1  ;;  %v2299_v50 = vmul.f32 %v2281_v1, %v2230_v32 }
 0x20f   :  { %v2245_v34 = vrot.slane %v2224_v42, 7  ;;  %v2236_v37 = vrot.slane %v2224_v42, 1  ;;  %v2259_v49 = vrot.slane %v2231_v48, 1  ;;  %v2265_v44 = vrot.slane %v2231_v48, 7 }
 0x210   :  { %v2237_v21 = vrot.slane %v2225_v12, 1  ;;  %v2243_v61 = vrot.slane %v2225_v12, 7  ;;  %v2284_v8 = vmul.f32 %v2281_v1, %v2225_v12  ;;  %v2300_v30 = vmul.f32 %v2281_v1, %v2231_v48  ;;  %v3646_v12 = vld [vmem:[#allocation8_spill] sm:$0xff] }
 0x211   :  { %v2264_v46 = vsel %vm1138_vm10, %v2259_v49, %v2258_v45  ;;  %v2268_v3 = vsel %vm1148_vm11, %v2267_v62, %v2265_v44  ;;  %v2260_v33 = vsel %vm1138_vm10, %v2258_v45, %v2259_v49  ;;  %v2271_v15 = vsel %vm1148_vm11, %v2265_v44, %v2267_v62  ;;  %v3649_v44 = vld [vmem:[#allocation7_spill] sm:$0xff] }
 0x212   :  { %v2242_v52 = vsel %vm1138_vm10, %v2237_v21, %v2236_v37  ;;  %v2246_v22 = vsel %vm1148_vm11, %v2245_v34, %v2243_v61  ;;  %v2273_v25 = vsub.f32 %v2268_v3, %v2264_v46  ;;  %v2238_v57 = vsel %vm1138_vm10, %v2236_v37, %v2237_v21  ;;  %v3647_v21 = vld [vmem:[#allocation5_spill] sm:$0xff] }
 0x213   :  { %v2251_v19 = vsub.f32 %v2246_v22, %v2242_v52  ;;  %v2249_v17 = vsel %vm1148_vm11, %v2243_v61, %v2245_v34  ;;  %v2272_v23 = vsub.f32 %v2271_v15, %v2260_v33  ;;  %v2283_v35 = vmul.f32 %v2281_v1, %v2224_v42  ;;  %v3648_v61 = vld [vmem:[#allocation6_spill] sm:$0xff] }
 0x214   :  { %v2250_v31 = vsub.f32 %v2249_v17, %v2238_v57  ;;  %v2275_v54 = vmul.f32 %v2273_v25, %v2660_v38  ;;  %v2340_v32 = vmul.f32 %v2699_v16, %v2689_v7  ;;  %v2351_v48 = vmul.f32 %v3646_v12, %v2750_v0 }
 0x215   :  { %v2253_v56 = vmul.f32 %v2251_v19, %v2660_v38  ;;  %v2274_v63 = vmul.f32 %v2272_v23, %v2727_v51  ;;  %v2339_v49 = vmul.f32 %v3648_v61, %v3647_v21 }
 0x216   :  { %v2252_v43 = vmul.f32 %v2250_v31, %v2727_v51  ;;  %v2277_v60 = vadd.f32 %v2275_v54, %v2264_v46 }
 0x217   :  { %v2255_v14 = vadd.f32 %v2253_v56, %v2242_v52  ;;  %v2276_v5 = vadd.f32 %v2274_v63, %v2260_v33  ;;  %v3650_v52 = vld [vmem:[#allocation9_spill] sm:$0xff]  ;;  %v2376_v63 = vpop.permute.xlu0 %2375 }
 0x218   :  { %v2254_v10 = vadd.f32 %v2252_v43, %v2238_v57  ;;  %v2302_v36 = vmul.f32 %v2293_v6, %v2277_v60 }
 0x219   :  { %v2296_v13 = vmul.f32 %v2293_v6, %v2255_v14  ;;  %v2301_v28 = vmul.f32 %v2288_v26, %v2276_v5 }
 0x21a   :  { %v2295_v20 = vmul.f32 %v2288_v26, %v2254_v10  ;;  %v2304_v4 = vadd.f32 %v2302_v36, %v2300_v30 }
 0x21b   :  { %v2298_v38 = vadd.f32 %v2296_v13, %v2284_v8  ;;  %v2303_v18 = vadd.f32 %v2301_v28, %v2299_v50  ;;  %v2367_v13 = vpop.permute.xlu1 %2366 }
 0x21c   :  { %v2297_v47 = vadd.f32 %v2295_v20, %v2283_v35  ;;  %v2324_v59 = vmul.f32 %v2321_v11, %v2304_v4  ;;  %v2330_v27 = vmul.f32 %v2311_v9, %v2304_v4 }
 0x21d   :  { %v2328_v53 = vmul.f32 %v2321_v11, %v2298_v38  ;;  %v2314_v55 = vmul.f32 %v2311_v9, %v2298_v38  ;;  %v2323_v41 = vmul.f32 %v2317_v40, %v2303_v18  ;;  %v2329_v6 = vmul.f32 %v2307_v2, %v2303_v18 }
 0x21e   :  { %v2313_v51 = vmul.f32 %v2307_v2, %v2297_v47  ;;  %v2327_v39 = vmul.f32 %v2317_v40, %v2297_v47  ;;  %v2350_v2 = vmul.f32 %v3650_v52, %v3649_v44 }
 0x21f   :  { %v2326_v58 = vsub.f32 %v2314_v55, %v2324_v59  ;;  %v2332_v24 = vadd.f32 %v2330_v27, %v2328_v53 }
 0x220   :  { %v2325_v29 = vsub.f32 %v2313_v51, %v2323_v41  ;;  %v2331_v42 = vadd.f32 %v2329_v6, %v2327_v39 }
 0x221   :  { %v2334_v62 = vmul.f32 %v2326_v58, %v2326_v58  ;;  %v2336_v45 = vmul.f32 %v2332_v24, %v2332_v24 }
 0x222   :  { %v2333_v34 = vmul.f32 %v2325_v29, %v2325_v29  ;;  %v2335_v37 = vmul.f32 %v2331_v42, %v2331_v42 }
 0x223   :  { %v2338_v22 = vadd.f32 %v2336_v45, %v2334_v62 }
 0x224   :  { %v2337_v46 = vadd.f32 %v2335_v37, %v2333_v34 }
 0x225   :  { %v2342_v3 = vmul.f32 %v2340_v32, %v2338_v22  ;;  %v2353_v19 = vmul.f32 %v2351_v48, %v2338_v22 }
 0x226   :  { %v2341_v25 = vmul.f32 %v2339_v49, %v2337_v46  ;;  %v2352_v57 = vmul.f32 %v2350_v2, %v2337_v46 }
 0x228   :  { %v2343_v17 = vadd.f32 %v2342_v3, %v2341_v25  ;;  %v2354_v7 = vadd.f32 %v2353_v19, %v2352_v57 }
 0x22a   :  { %v2344_v16 = vrot.slane %v2343_v17, 4  ;;  %v2355_v26 = vrot.slane %v2354_v7, 4 }
 0x22c   :  { %v2345_v0 = vadd.f32 %v2344_v16, %v2343_v17  ;;  %v2356_v31 = vadd.f32 %v2355_v26, %v2354_v7 }
 0x22e   :  { %v2346_v33 = vrot.slane %v2345_v0, 2  ;;  %v2357_v15 = vrot.slane %v2356_v31, 2 }
 0x230   :  { %v2347_v56 = vadd.f32 %v2346_v33, %v2345_v0  ;;  %v2358_v54 = vadd.f32 %v2357_v15, %v2356_v31 }
 0x232   :  { %v2348_v1 = vrot.slane %v2347_v56, 1  ;;  %v2359_v23 = vrot.slane %v2358_v54, 1 }
 0x234   :  { %v2349_v40 = vadd.f32 %v2348_v1, %v2347_v56  ;;  %v2360_v43 = vadd.f32 %v2359_v23, %v2358_v54 }
 0x236   :  { %v2361_v14 = vadd.f32 1.0, %v2349_v40  ;;  %v2370_v60 = vadd.f32 1.0, %v2360_v43 }
 0x238   :  { %v2362_v8 = vmul.f32 0.5, %v2361_v14  ;;  %v2371_v10 = vmul.f32 0.5, %v2370_v60 }
 0x23a   :  { %v2378_v36 = vmul.f32 %v2376_v63, %v2371_v10  ;;  %v2369_v30 = vmul.f32 %v2367_v13, %v2362_v8 }
 0x23c   :  { %v2380_v5 = vrot.slane %v2378_v36, 7 }
 0x23e   :  { %v2382_v35 = vsel %vm1148_vm11, %v2369_v30, %v2380_v5 }
 0x23f   :  { %2383 = vst [vmem:[#allocation2] sm:$0x3] %v2382_v35 }
 0x240   :  { %2561 = shalt.err (!%p2558_p4)
}
 0x241   :  { %2393 = dma.vmem_to_hbm [thread:$0]  %s2391_s1, 32, %s3612_s5, [#allocation3]  }
 0x242   :  { %2570 = dma.done.wait [#allocation3], 32  }
 0x243   :  { %2571 = vsyncadd [#allocation3], 4294967264 }
 0x244   :  { %2397 = vsyncpa [#allocation3], 1 }

</bundles_post_ra>
